<compile_context>
chip_gen: v6e
topology: v6e:2x2x1
jax: 0.10.0
libtpu: 0.0.40
codegen_flags: <defaults>
</compile_context>

<pallas_src>
import functools
import math

import jax
import jax.numpy as jnp
from jax.experimental import pallas as pl
from jax.experimental.pallas import tpu as pltpu


# ---------------------------------------------------------------------------
# small helpers
# ---------------------------------------------------------------------------
def _gelu(x):
    # tanh-approx GELU (transcendental runs on the EUP slot, frees VALU slots).
    c = 0.7978845608028654
    return 0.5 * x * (1.0 + jnp.tanh(c * (x + 0.044715 * x * x * x)))


@functools.lru_cache(maxsize=None)
def _vmem_limit_bytes():
    # Per-generation VMEM budget (v5e/v6e: 128 MiB, v7x: 64 MiB) with headroom.
    try:
        cap = int(getattr(pltpu.get_tpu_info(), "vmem_capacity_bytes",
                          64 * 1024 * 1024))
    except Exception:
        cap = 64 * 1024 * 1024
    return int(min(100 * 1024 * 1024, int(cap * 0.75)))


def _cparams(n_grid):
    return pltpu.CompilerParams(
        dimension_semantics=("parallel",) * n_grid,
        vmem_limit_bytes=_vmem_limit_bytes(),
    )


def _full(a):
    """Whole-array block (weights); constant index_map -> no re-DMA across grid steps.
    (Could additionally use pipeline_mode=pl.Buffered(1) to drop the second buffer.)"""
    nd = a.ndim

    def imap(i):
        return (0,) * nd

    return pl.BlockSpec(a.shape, imap)


def _row_tile(rows, cap=512):
    """Sublane-legal (multiple-of-8) row tile dividing `rows`; prefers >=2 grid
    steps (v7x dual-TC) while staying as large as possible (per-step amortization)."""
    if rows <= 8 or rows % 8:
        return rows
    best = rows
    t = 8
    limit = min(cap, rows // 2)
    while t <= limit:
        if rows % t == 0:
            best = t
        t += 8
    return best


def _lead_tile(n, cap=256):
    """Leading-dim tile (no sublane constraint) dividing n; prefers >=2 grid steps."""
    if n <= 1:
        return n
    for d in range(min(cap, n // 2), 0, -1):
        if n % d == 0:
            return d
    return n


def _divisor_tile(n, cap=16):
    """Largest divisor of n that is <= cap."""
    d = min(n, cap)
    while n % d:
        d -= 1
    return d


def unfold_last(x, size, step):
    L = x.shape[-1]
    n = (L - size) // step + 1
    if step == size and n * size == L:            # non-overlapping patches: free reshape
        return x.reshape(x.shape[:-1] + (n, size))
    idx = jnp.arange(n)[:, None] * step + jnp.arange(size)[None, :]
    return x[..., idx]                            # gather fallback (overlapping patches)


# ---------------------------------------------------------------------------
# kernel 1: instance normalization over time (per row), torch.std (unbiased),
#           exactly matching the reference: z = (z - mean) / (std + 1e-4)
# ---------------------------------------------------------------------------
def _instnorm_kernel(z_ref, zn_ref, stats_ref):
    z = z_ref[...]
    L = z.shape[-1]
    mean = jnp.mean(z, axis=-1, keepdims=True)
    diff = z - mean
    var = jnp.sum(diff * diff, axis=-1, keepdims=True) * (1.0 / float(L - 1))
    std = jnp.sqrt(var)
    zn_ref[...] = diff / (std + 1e-4)
    stats_ref[...] = jnp.concatenate([mean, std], axis=-1)   # packed [mean, std]


def instance_norm(z2d):
    R, L = z2d.shape
    tm = _row_tile(R)
    grid = (pl.cdiv(R, tm),)
    row = lambda i: (i, 0)
    return pl.pallas_call(
        _instnorm_kernel,
        grid=grid,
        in_specs=[pl.BlockSpec((tm, L), row)],
        out_specs=(pl.BlockSpec((tm, L), row),
                   pl.BlockSpec((tm, 2), row)),
        out_shape=(jax.ShapeDtypeStruct((R, L), jnp.float32),
                   jax.ShapeDtypeStruct((R, 2), jnp.float32)),
        compiler_params=_cparams(1),
    )(z2d)


# ---------------------------------------------------------------------------
# kernel 2: patch embedding for BOTH branches (single batched matmul per branch)
#   time: z_embed = zcube @ (Wip^T) + (bip + pos)
#   freq: f_embed = [z1u|z2u] @ (Wsd^T @ Wip^T) + (bsd @ Wip^T + bip + pos)
# ---------------------------------------------------------------------------
def _embed_kernel(zt_ref, zf_ref, wt_ref, wf_ref, pt_ref, pf_ref, o_ref):
    f32, bf16 = jnp.float32, jnp.bfloat16
    tm, T, P = zt_ref.shape
    D = wt_ref.shape[1]
    zt = zt_ref[...].reshape(tm * T, P).astype(bf16)
    zf = zf_ref[...].reshape(tm * T, 2 * P).astype(bf16)
    et = jnp.dot(zt, wt_ref[...], preferred_element_type=f32).reshape(tm, T, D) + pt_ref[...]
    ef = jnp.dot(zf, wf_ref[...], preferred_element_type=f32).reshape(tm, T, D) + pf_ref[...]
    o_ref[0] = et.astype(o_ref.dtype)
    o_ref[1] = ef.astype(o_ref.dtype)


def embed_forward(zcube, zfu, q):
    R, T, P = zcube.shape
    D = q['wt'].shape[1]
    tm = _lead_tile(R, cap=256)
    grid = (R // tm,)
    row3 = lambda i: (i, 0, 0)
    names = ['wt', 'wf', 'pos_t', 'pos_f']
    return pl.pallas_call(
        _embed_kernel,
        grid=grid,
        in_specs=[pl.BlockSpec((tm, T, P), row3),
                  pl.BlockSpec((tm, T, 2 * P), row3)] + [_full(q[n]) for n in names],
        out_specs=pl.BlockSpec((2, tm, T, D), lambda i: (0, i, 0, 0)),
        out_shape=jax.ShapeDtypeStruct((2, R, T, D), jnp.bfloat16),
        compiler_params=_cparams(1),
    )(zcube, zfu, *[q[n] for n in names])


# ---------------------------------------------------------------------------
# kernel 3: fused mixer stack (timecl -> channelcl -> patchnumcl [-> breakn])
#   the (rb, C, T, D) slab stays in VMEM; o_ref doubles as the inter-stage buffer.
#   frequency blocks (program_id >= freq_start) additionally get breakn fused in.
# ---------------------------------------------------------------------------
def _mixer_kernel(x_ref, tw1_ref, tb1_ref, tw2_ref, tb2_ref,
                  cw1_ref, cb1_ref, cw2_ref, cb2_ref,
                  pw1_ref, pb1_ref, pw2_ref, pb2_ref,
                  wbk_ref, bbk_ref, o_ref, *, freq_start):
    f32, bf16 = jnp.float32, jnp.bfloat16
    rb, C, T, D = x_ref.shape
    is_freq = pl.program_id(0) >= freq_start

    x = x_ref[...].astype(f32)                               # (rb, C, T, D)

    # --- timecl: per-d Linear(T, T) along the patch axis. Full-slab broadcast
    #     contraction over t (no per-s partial stores); d stays on the lane axis (VPU).
    def timemix(v, w_ref, b_ref):
        w = w_ref[...]                                       # (T_in, T_out, D)
        b = b_ref[...]                                       # (T_out, D)
        acc = v[:, :, 0:1, :] * w[0]
        for t in range(1, T):                                # short axis; unrolled
            acc = acc + v[:, :, t:t + 1, :] * w[t]
        return acc + b

    h = _gelu(timemix(x, tw1_ref, tb1_ref))
    y = timemix(h, tw2_ref, tb2_ref) + x                     # residual

    # --- channelcl: per channel c, ONE (rb*T, D) @ (D, D) matmul per layer (MXU) ---
    for c in range(C):
        xc = y[:, c, :, :].reshape(rb * T, D)
        hc = _gelu(jnp.dot(xc.astype(bf16), cw1_ref[c], preferred_element_type=f32)
                   + cb1_ref[c])
        oc = (jnp.dot(hc.astype(bf16), cw2_ref[c], preferred_element_type=f32)
              + cb2_ref[c] + xc)                             # residual
        o_ref[:, c, :, :] = oc.reshape(rb, T, D).astype(o_ref.dtype)

    # --- patchnumcl: per patch t, ONE (rb*C, D) @ (D, D) matmul per layer (MXU);
    #     frequency blocks get the shared breakn (D, D) matmul fused in. ---
    for t in range(T):
        xt_b = o_ref[:, :, t, :].reshape(rb * C, D)          # channelcl result (bf16)
        xt = xt_b.astype(f32)
        ht = _gelu(jnp.dot(xt_b, pw1_ref[t], preferred_element_type=f32) + pb1_ref[t])
        ot = (jnp.dot(ht.astype(bf16), pw2_ref[t], preferred_element_type=f32)
              + pb2_ref[t] + xt)                             # residual

        @pl.when(is_freq)
        def _():
            fb = (jnp.dot(ot.astype(bf16), wbk_ref[...], preferred_element_type=f32)
                  + bbk_ref[...])
            o_ref[:, :, t, :] = fb.reshape(rb, C, D).astype(o_ref.dtype)

        @pl.when(jnp.logical_not(is_freq))
        def _():
            o_ref[:, :, t, :] = ot.reshape(rb, C, D).astype(o_ref.dtype)


def mixer_forward(x4, q, *, batch):
    N, C, T, D = x4.shape                                    # N = 2 * batch (time, then freq)
    rb = _divisor_tile(batch, cap=16)                        # rb | batch -> blocks never straddle
    grid = (N // rb,)                                        # >= 2 steps (v7x dual-TC)
    blk = pl.BlockSpec((rb, C, T, D), lambda i: (i, 0, 0, 0))
    names = ['tw1', 'tb1', 'tw2', 'tb2',
             'cw1', 'cb1', 'cw2', 'cb2',
             'pw1', 'pb1', 'pw2', 'pb2', 'wbk', 'bbk']
    kernel = functools.partial(_mixer_kernel, freq_start=batch // rb)
    return pl.pallas_call(
        kernel,
        grid=grid,
        in_specs=[blk] + [_full(q[n]) for n in names],
        out_specs=blk,
        out_shape=jax.ShapeDtypeStruct((N, C, T, D), jnp.bfloat16),
        compiler_params=_cparams(1),
    )(x4, *[q[n] for n in names])


# ---------------------------------------------------------------------------
# kernel 4: Flatten_Head (breakn is already fused into the mixer's freq branch)
# ---------------------------------------------------------------------------
def _head_kernel(x_ref, w1_ref, b1_ref, w2_ref, b2_ref, w3_ref, b3_ref,
                 w4_ref, b4_ref, o_ref):
    f32, bf16 = jnp.float32, jnp.bfloat16
    h = x_ref[...].astype(f32)
    for w_ref, b_ref in ((w1_ref, b1_ref), (w2_ref, b2_ref), (w3_ref, b3_ref)):
        h = _gelu(jnp.dot(h.astype(bf16), w_ref[...], preferred_element_type=f32)
                  + b_ref[...]) + h
    o_ref[...] = jnp.dot(h.astype(bf16), w4_ref[...], preferred_element_type=f32) + b4_ref[...]


def head_forward(xf, q):
    R, nf = xf.shape
    L = q['hw4'].shape[1]
    tm = _row_tile(R)
    grid = (pl.cdiv(R, tm),)
    row = lambda i: (i, 0)
    names = ['hw1', 'hb1', 'hw2', 'hb2', 'hw3', 'hb3', 'hw4', 'hb4']
    # NOTE: for v7x-scale nf the nf x nf weights should get a K/N grid axis
    # ('arbitrary') with a VMEM accumulator instead of whole-weight residency.
    return pl.pallas_call(
        _head_kernel,
        grid=grid,
        in_specs=[pl.BlockSpec((tm, nf), row)] + [_full(q[n]) for n in names],
        out_specs=pl.BlockSpec((tm, L), row),
        out_shape=jax.ShapeDtypeStruct((R, L), jnp.float32),
        compiler_params=_cparams(1),
    )(xf, *[q[n] for n in names])


# ---------------------------------------------------------------------------
# kernel 5: lineartoseq + dsdivide (applied twice, wide-K) + W_out + de-normalization
# ---------------------------------------------------------------------------
def _final_kernel(xt_ref, fri_ref, stats_ref,
                  wlts_ref, blts_ref, wd_ref, bd_ref, wo_ref, bo_ref, o_ref):
    f32, bf16 = jnp.float32, jnp.bfloat16
    wd = wd_ref[...]
    bd = bd_ref[...]
    # lineartoseq on the (t, d)-flattened time branch
    ot = jnp.dot(xt_ref[...], wlts_ref[...], preferred_element_type=f32) + blts_ref[...]
    # dsdivide #1 on [fr | fi]                (single wide-K matmul)
    t1 = jnp.dot(fri_ref[...].astype(bf16), wd, preferred_element_type=f32) + bd
    # dsdivide #2 on [outputs | outputsf]     (single wide-K matmul)
    t2 = jnp.dot(jnp.concatenate([ot, t1], axis=-1).astype(bf16), wd,
                 preferred_element_type=f32) + bd
    y = jnp.dot(t2.astype(bf16), wo_ref[...], preferred_element_type=f32) + bo_ref[...]
    mean = stats_ref[:, 0:1]
    std = stats_ref[:, 1:2]
    o_ref[...] = y * (std + 1e-4) + mean


def final_forward(y_time, fri, stats, q):
    R, nf = y_time.shape
    L2 = fri.shape[1]
    pred = q['wo'].shape[1]
    tm = _row_tile(R)
    grid = (pl.cdiv(R, tm),)
    row = lambda i: (i, 0)
    names = ['wlts', 'blts', 'wd', 'bd', 'wo', 'bo']
    return pl.pallas_call(
        _final_kernel,
        grid=grid,
        in_specs=[pl.BlockSpec((tm, nf), row),
                  pl.BlockSpec((tm, L2), row),
                  pl.BlockSpec((tm, 2), row)] + [_full(q[n]) for n in names],
        out_specs=pl.BlockSpec((tm, pred), row),
        out_shape=jax.ShapeDtypeStruct((R, pred), jnp.float32),
        compiler_params=_cparams(1),
    )(y_time, fri, stats, *[q[n] for n in names])


# ---------------------------------------------------------------------------
# parameter init (torch layout) + one-time preparation into kernel layout
# ---------------------------------------------------------------------------
def _init_linear(key, out_f, in_f):
    k1, k2 = jax.random.split(key)
    bound = 1.0 / math.sqrt(in_f)
    w = jax.random.uniform(k1, (out_f, in_f), jnp.float32, -bound, bound)
    b = jax.random.uniform(k2, (out_f,), jnp.float32, -bound, bound)
    return w, b


def _init_group(key, G, out_f, in_f):
    k1, k2 = jax.random.split(key)
    bound = 1.0 / math.sqrt(in_f)
    w = jax.random.uniform(k1, (G, out_f, in_f), jnp.float32, -bound, bound)
    b = jax.random.uniform(k2, (G, out_f), jnp.float32, -bound, bound)
    return w, b


def init_params(key, *, seq_len, patch_len, stride, d_model, enc_in, pred_len):
    T = (seq_len - patch_len) // stride + 1
    nf = d_model * T
    keys = iter(jax.random.split(key, 24))
    p = {}
    p['seqdivide'] = _init_linear(next(keys), patch_len, 2 * patch_len)
    p['W_input_projection'] = _init_linear(next(keys), d_model, patch_len)
    p['W_pos_embedf'] = 0.01 * jax.random.normal(next(keys), (T, d_model), jnp.float32)
    p['time_w1'], p['time_b1'] = _init_group(next(keys), d_model, T, T)
    p['time_w2'], p['time_b2'] = _init_group(next(keys), d_model, T, T)
    p['chan_w1'], p['chan_b1'] = _init_group(next(keys), enc_in, d_model, d_model)
    p['chan_w2'], p['chan_b2'] = _init_group(next(keys), enc_in, d_model, d_model)
    p['pat_w1'], p['pat_b1'] = _init_group(next(keys), T, d_model, d_model)
    p['pat_w2'], p['pat_b2'] = _init_group(next(keys), T, d_model, d_model)
    p['lineartoseq'] = _init_linear(next(keys), seq_len, nf)
    p['breakn'] = _init_linear(next(keys), d_model, d_model)
    p['head_l1'] = _init_linear(next(keys), nf, nf)
    p['head_l2'] = _init_linear(next(keys), nf, nf)
    p['head_l3'] = _init_linear(next(keys), nf, nf)
    p['head_l4'] = _init_linear(next(keys), seq_len, nf)
    p['dsdivide'] = _init_linear(next(keys), seq_len, 2 * seq_len)
    p['W_out'] = _init_linear(next(keys), pred_len, seq_len)
    return p


def prepare_params(p, *, seq_len, patch_len, stride, d_model, enc_in, pred_len):
    """Pre-transpose / pre-compose weights ONCE into kernel-ready layout (bf16 matmul operands)."""
    P, D, C, L = patch_len, d_model, enc_in, seq_len
    T = (seq_len - patch_len) // stride + 1
    nf = D * T
    bf16 = jnp.bfloat16
    q = {}
    # --- patch embedding ---------------------------------------------------
    wip, bip = p['W_input_projection']                  # (D, P), (D,)
    wsd, bsd = p['seqdivide']                           # (P, 2P), (P,)
    q['wt'] = wip.T.astype(bf16)                        # (P, D)
    q['wf'] = (wsd.T @ wip.T).astype(bf16)              # (2P, D): seqdivide o W_input_projection
    pos = p['W_pos_embedf']                             # (T, D)
    q['pos_t'] = pos + bip[None, :]
    q['pos_f'] = pos + (bsd @ wip.T + bip)[None, :]
    # --- timecl (broadcast form): tw[t_in, s_out, d] = W[d][s_out, t_in] ----
    q['tw1'] = jnp.transpose(p['time_w1'], (2, 1, 0))
    q['tw2'] = jnp.transpose(p['time_w2'], (2, 1, 0))
    q['tb1'] = p['time_b1'].T                           # (T, D)
    q['tb2'] = p['time_b2'].T
    # --- channelcl / patchnumcl: per-group (D, D), pre-transposed (y = x @ w) ---
    q['cw1'] = jnp.swapaxes(p['chan_w1'], -1, -2).astype(bf16)
    q['cw2'] = jnp.swapaxes(p['chan_w2'], -1, -2).astype(bf16)
    q['cb1'] = p['chan_b1'].reshape(C, 1, D)
    q['cb2'] = p['chan_b2'].reshape(C, 1, D)
    q['pw1'] = jnp.swapaxes(p['pat_w1'], -1, -2).astype(bf16)
    q['pw2'] = jnp.swapaxes(p['pat_w2'], -1, -2).astype(bf16)
    q['pb1'] = p['pat_b1'].reshape(T, 1, D)
    q['pb2'] = p['pat_b2'].reshape(T, 1, D)
    # --- breakn: plain shared (D, D), fused into the mixer's freq branch ----
    wbk, bbk = p['breakn']
    q['wbk'] = wbk.T.astype(bf16)
    q['bbk'] = bbk.reshape(1, D)
    # --- Flatten_Head --------------------------------------------------------
    for i, name in enumerate(('head_l1', 'head_l2', 'head_l3'), start=1):
        w, b = p[name]
        q[f'hw{i}'] = w.T.astype(bf16)
        q[f'hb{i}'] = b.reshape(1, nf)
    w4, b4 = p['head_l4']
    q['hw4'] = w4.T.astype(bf16)
    q['hb4'] = b4.reshape(1, L)
    # --- lineartoseq / dsdivide (wide-K, not split) / W_out ------------------
    w, b = p['lineartoseq']
    q['wlts'] = w.T.astype(bf16)
    q['blts'] = b.reshape(1, L)
    wd, bdd = p['dsdivide']                             # (L, 2L)
    q['wd'] = wd.T.astype(bf16)                         # (2L, L)
    q['bd'] = bdd.reshape(1, L)
    wo, bo = p['W_out']
    q['wo'] = wo.T.astype(bf16)
    q['bo'] = bo.reshape(1, pred_len)
    return q


# ---------------------------------------------------------------------------
# forward pass (task_name = 'long_term_forecast')
# ---------------------------------------------------------------------------
def model_forward(q, x, mask, *, seq_len, patch_len, stride, d_model, enc_in, pred_len):
    # x: (B, seq_len, enc_in).  mask (= args[-1]) is accepted but unused by the reference path.
    del mask
    B = x.shape[0]
    C, L, D, P = enc_in, seq_len, d_model, patch_len
    T = (L - P) // stride + 1
    nf = D * T
    R = B * C

    z = jnp.transpose(x, (0, 2, 1)).reshape(R, L)            # channel-first rows (B*C, L)

    zn, stats = instance_norm(z)                             # Pallas kernel 1

    # TODO(synk): FFT has no Pallas primitive; computed with jnp.fft.
    zz = jnp.fft.fft(zn, axis=-1)
    z1 = jnp.real(zz).astype(jnp.float32)
    z2 = jnp.imag(zz).astype(jnp.float32)

    zcube = unfold_last(zn, P, stride)                       # (R, T, P)
    zfu = jnp.concatenate([unfold_last(z1, P, stride),
                           unfold_last(z2, P, stride)], axis=-1)   # (R, T, 2P) = [z1u | z2u]

    embeds = embed_forward(zcube, zfu, q)                    # Pallas kernel 2 -> (2, R, T, D) bf16
    xmix = embeds.reshape(2 * B, C, T, D)                    # contiguous, free

    ymix = mixer_forward(xmix, q, batch=B)                   # Pallas kernel 3 (mixer + breakn on freq half)
    y_time = ymix[:B].reshape(R, nf)                         # (t, d)-ordered flatten, free
    f1 = ymix[B:].reshape(R, nf)                             # = breakn(outputsf), flattened

    f1h = head_forward(f1, q)                                # Pallas kernel 4 (Flatten_Head)
    # Reference computes f2 = breakn(outputsf) with the SAME weights on the SAME input,
    # then head(f2); hence head(f2) == f1h and complex(f1, f2) == f1h * (1 + 1j).

    # TODO(synk): iFFT has no Pallas primitive; computed with jnp.fft.
    fc = jnp.fft.ifft(f1h + 1j * f1h, axis=-1)
    fri = jnp.concatenate([jnp.real(fc), jnp.imag(fc)], axis=-1).astype(jnp.float32)  # (R, 2L)

    out = final_forward(y_time, fri, stats, q)               # Pallas kernel 5 -> (R, pred_len)
    return jnp.transpose(out.reshape(B, C, pred_len), (0, 2, 1))


# ---------------------------------------------------------------------------
if __name__ == "__main__":
    cfg = dict(seq_len=16, patch_len=4, stride=4, d_model=8, enc_in=4, pred_len=8)

    key = jax.random.PRNGKey(0)
    kp, kx = jax.random.split(key)
    torch_params = init_params(kp, **cfg)
    prep = prepare_params(torch_params, **cfg)

    B = 2
    x = jax.random.normal(kx, (B, cfg['seq_len'], cfg['enc_in']), jnp.float32)
    mask = jnp.ones((B, cfg['seq_len'], cfg['enc_in']), jnp.float32)   # args[-1], unused

    fwd = jax.jit(functools.partial(model_forward, **cfg))
    out = fwd(prep, x, mask)
    out = jax.block_until_ready(out)

    assert out.shape == (B, cfg['pred_len'], cfg['enc_in'])
    assert bool(jnp.all(jnp.isfinite(out)))
    print("KERNEL_OK")
</pallas_src>

<mosaic_0001>
module attributes {stable_mosaic.version = 11 : i64} {
  func.func @_instnorm_kernel(%arg0: i32, %arg1: memref<8x16xf32, #tpu.memory_space<vmem>>, %arg2: memref<8x16xf32, #tpu.memory_space<vmem>>, %arg3: memref<8x2xf32, #tpu.memory_space<vmem>>) attributes {dimension_semantics = [#tpu.dimension_semantics<parallel>], iteration_bounds = array<i64: 1>, scalar_prefetch = 0 : i64, scratch_operands = 0 : i64, tpu.core_type = #tpu.core_type<tc>, window_params = [{transform_indices = @transform_0, window_bounds = array<i64: 8, 16>}, {transform_indices = @transform_1, window_bounds = array<i64: 8, 16>}, {transform_indices = @transform_2, window_bounds = array<i64: 8, 2>}]} {
    %c0 = arith.constant 0 : index
    %c0_0 = arith.constant 0 : index
    %0 = vector.load %arg1[%c0, %c0_0] : memref<8x16xf32, #tpu.memory_space<vmem>>, vector<8x16xf32>
    %cst = arith.constant dense<0.000000e+00> : vector<8xf32>
    %1 = vector.multi_reduction <add>, %0, %cst [1] : vector<8x16xf32> to vector<8xf32>
    %2 = vector.shape_cast %1 : vector<8xf32> to vector<8x1xf32>
    %cst_1 = arith.constant 1.600000e+01 : f32
    %3 = vector.broadcast %cst_1 : f32 to vector<8x1xf32>
    %4 = arith.divf %2, %3 : vector<8x1xf32>
    %5 = vector.broadcast %4 : vector<8x1xf32> to vector<8x16xf32>
    %6 = arith.subf %0, %5 : vector<8x16xf32>
    %7 = arith.mulf %6, %6 : vector<8x16xf32>
    %cst_2 = arith.constant dense<0.000000e+00> : vector<8xf32>
    %8 = vector.multi_reduction <add>, %7, %cst_2 [1] : vector<8x16xf32> to vector<8xf32>
    %9 = vector.shape_cast %8 : vector<8xf32> to vector<8x1xf32>
    %cst_3 = arith.constant 0.0666666701 : f32
    %10 = vector.broadcast %cst_3 : f32 to vector<8x1xf32>
    %11 = arith.mulf %9, %10 : vector<8x1xf32>
    %12 = math.sqrt %11 : vector<8x1xf32>
    %cst_4 = arith.constant 9.99999974E-5 : f32
    %13 = vector.broadcast %cst_4 : f32 to vector<8x1xf32>
    %14 = arith.addf %12, %13 : vector<8x1xf32>
    %15 = vector.broadcast %14 : vector<8x1xf32> to vector<8x16xf32>
    %16 = arith.divf %6, %15 : vector<8x16xf32>
    %c0_5 = arith.constant 0 : index
    %c0_6 = arith.constant 0 : index
    %17 = vector.load %arg2[%c0_5, %c0_6] : memref<8x16xf32, #tpu.memory_space<vmem>>, vector<8x16xf32>
    tpu.vector_store %arg2[%c0_5, %c0_6], %16 {strides = array<i32>} : memref<8x16xf32, #tpu.memory_space<vmem>>, vector<8x16xf32>,
    %18 = tpu.concatenate %4, %12 in 1 : vector<8x1xf32>, vector<8x1xf32> -> vector<8x2xf32>
    %c0_7 = arith.constant 0 : index
    %c0_8 = arith.constant 0 : index
    %19 = vector.load %arg3[%c0_7, %c0_8] : memref<8x2xf32, #tpu.memory_space<vmem>>, vector<8x2xf32>
    tpu.vector_store %arg3[%c0_7, %c0_8], %18 {strides = array<i32>} : memref<8x2xf32, #tpu.memory_space<vmem>>, vector<8x2xf32>,
    return
  }
  func.func @transform_0(%arg0: i32) -> (i32, i32) {
    %c0_i32 = arith.constant 0 : i32
    %c0_i32_0 = arith.constant 0 : i32
    return %arg0, %c0_i32 : i32, i32
  }
  func.func @transform_1(%arg0: i32) -> (i32, i32) {
    %c0_i32 = arith.constant 0 : i32
    %c0_i32_0 = arith.constant 0 : i32
    return %arg0, %c0_i32 : i32, i32
  }
  func.func @transform_2(%arg0: i32) -> (i32, i32) {
    %c0_i32 = arith.constant 0 : i32
    %c0_i32_0 = arith.constant 0 : i32
    return %arg0, %c0_i32 : i32, i32
  }
}

module attributes {stable_mosaic.version = 11 : i64} {
  func.func @_embed_kernel(%arg0: i32, %arg1: memref<4x4x4xf32, #tpu.memory_space<vmem>>, %arg2: memref<4x4x8xf32, #tpu.memory_space<vmem>>, %arg3: memref<4x8xbf16, #tpu.memory_space<vmem>>, %arg4: memref<8x8xbf16, #tpu.memory_space<vmem>>, %arg5: memref<4x8xf32, #tpu.memory_space<vmem>>, %arg6: memref<4x8xf32, #tpu.memory_space<vmem>>, %arg7: memref<2x4x4x8xbf16, #tpu.memory_space<vmem>>) attributes {dimension_semantics = [#tpu.dimension_semantics<parallel>], iteration_bounds = array<i64: 2>, scalar_prefetch = 0 : i64, scratch_operands = 0 : i64, tpu.core_type = #tpu.core_type<tc>, window_params = [{transform_indices = @transform_0, window_bounds = array<i64: 4, 4, 4>}, {transform_indices = @transform_1, window_bounds = array<i64: 4, 4, 8>}, {pipeline_mode = #tpu.pipeline_mode<synchronous>, transform_indices = @transform_2, window_bounds = array<i64: 4, 8>}, {pipeline_mode = #tpu.pipeline_mode<synchronous>, transform_indices = @transform_3, window_bounds = array<i64: 8, 8>}, {pipeline_mode = #tpu.pipeline_mode<synchronous>, transform_indices = @transform_4, window_bounds = array<i64: 4, 8>}, {pipeline_mode = #tpu.pipeline_mode<synchronous>, transform_indices = @transform_5, window_bounds = array<i64: 4, 8>}, {transform_indices = @transform_6, window_bounds = array<i64: 2, 4, 4, 8>}]} {
    %c0 = arith.constant 0 : index
    %c0_0 = arith.constant 0 : index
    %c0_1 = arith.constant 0 : index
    %0 = vector.load %arg1[%c0, %c0_0, %c0_1] : memref<4x4x4xf32, #tpu.memory_space<vmem>>, vector<4x4x4xf32>
    %1 = vector.shape_cast %0 : vector<4x4x4xf32> to vector<16x4xf32>
    %2 = arith.truncf %1 : vector<16x4xf32> to vector<16x4xbf16>
    %c0_2 = arith.constant 0 : index
    %c0_3 = arith.constant 0 : index
    %c0_4 = arith.constant 0 : index
    %3 = vector.load %arg2[%c0_2, %c0_3, %c0_4] : memref<4x4x8xf32, #tpu.memory_space<vmem>>, vector<4x4x8xf32>
    %4 = vector.shape_cast %3 : vector<4x4x8xf32> to vector<16x8xf32>
    %5 = arith.truncf %4 : vector<16x8xf32> to vector<16x8xbf16>
    %c0_5 = arith.constant 0 : index
    %c0_6 = arith.constant 0 : index
    %6 = vector.load %arg3[%c0_5, %c0_6] : memref<4x8xbf16, #tpu.memory_space<vmem>>, vector<4x8xbf16>
    %cst = arith.constant dense<0.000000e+00> : vector<16x8xf32>
    %7 = tpu.matmul %2, %6, %cst {dimension_numbers = #tpu.dot_dimension_numbers<[1], [0], [0], [1], [0, 0, 1, 1], [], []>} : vector<16x4xbf16>, vector<4x8xbf16>, vector<16x8xf32> -> vector<16x8xf32>
    %8 = vector.shape_cast %7 : vector<16x8xf32> to vector<4x4x8xf32>
    %c0_7 = arith.constant 0 : index
    %c0_8 = arith.constant 0 : index
    %9 = vector.load %arg5[%c0_7, %c0_8] : memref<4x8xf32, #tpu.memory_space<vmem>>, vector<4x8xf32>
    %10 = vector.shape_cast %9 : vector<4x8xf32> to vector<1x4x8xf32>
    %11 = vector.broadcast %10 : vector<1x4x8xf32> to vector<4x4x8xf32>
    %12 = arith.addf %8, %11 : vector<4x4x8xf32>
    %c0_9 = arith.constant 0 : index
    %c0_10 = arith.constant 0 : index
    %13 = vector.load %arg4[%c0_9, %c0_10] : memref<8x8xbf16, #tpu.memory_space<vmem>>, vector<8x8xbf16>
    %cst_11 = arith.constant dense<0.000000e+00> : vector<16x8xf32>
    %14 = tpu.matmul %5, %13, %cst_11 {dimension_numbers = #tpu.dot_dimension_numbers<[1], [0], [0], [1], [0, 0, 1, 1], [], []>} : vector<16x8xbf16>, vector<8x8xbf16>, vector<16x8xf32> -> vector<16x8xf32>
    %15 = vector.shape_cast %14 : vector<16x8xf32> to vector<4x4x8xf32>
    %c0_12 = arith.constant 0 : index
    %c0_13 = arith.constant 0 : index
    %16 = vector.load %arg6[%c0_12, %c0_13] : memref<4x8xf32, #tpu.memory_space<vmem>>, vector<4x8xf32>
    %17 = vector.shape_cast %16 : vector<4x8xf32> to vector<1x4x8xf32>
    %18 = vector.broadcast %17 : vector<1x4x8xf32> to vector<4x4x8xf32>
    %19 = arith.addf %15, %18 : vector<4x4x8xf32>
    %20 = arith.truncf %12 : vector<4x4x8xf32> to vector<4x4x8xbf16>
    %c0_14 = arith.constant 0 : index
    %c0_15 = arith.constant 0 : index
    %c0_16 = arith.constant 0 : index
    %c0_17 = arith.constant 0 : index
    %21 = vector.load %arg7[%c0_14, %c0_15, %c0_16, %c0_17] : memref<2x4x4x8xbf16, #tpu.memory_space<vmem>>, vector<1x4x4x8xbf16>
    %22 = vector.shape_cast %21 : vector<1x4x4x8xbf16> to vector<4x4x8xbf16>
    %23 = vector.shape_cast %20 : vector<4x4x8xbf16> to vector<1x4x4x8xbf16>
    tpu.vector_store %arg7[%c0_14, %c0_15, %c0_16, %c0_17], %23 {strides = array<i32>} : memref<2x4x4x8xbf16, #tpu.memory_space<vmem>>, vector<1x4x4x8xbf16>,
    %24 = arith.truncf %19 : vector<4x4x8xf32> to vector<4x4x8xbf16>
    %c1 = arith.constant 1 : index
    %c0_18 = arith.constant 0 : index
    %c0_19 = arith.constant 0 : index
    %c0_20 = arith.constant 0 : index
    %25 = vector.load %arg7[%c1, %c0_18, %c0_19, %c0_20] : memref<2x4x4x8xbf16, #tpu.memory_space<vmem>>, vector<1x4x4x8xbf16>
    %26 = vector.shape_cast %25 : vector<1x4x4x8xbf16> to vector<4x4x8xbf16>
    %27 = vector.shape_cast %24 : vector<4x4x8xbf16> to vector<1x4x4x8xbf16>
    tpu.vector_store %arg7[%c1, %c0_18, %c0_19, %c0_20], %27 {strides = array<i32>} : memref<2x4x4x8xbf16, #tpu.memory_space<vmem>>, vector<1x4x4x8xbf16>,
    return
  }
  func.func @transform_0(%arg0: i32) -> (i32, i32, i32) {
    %c0_i32 = arith.constant 0 : i32
    %c0_i32_0 = arith.constant 0 : i32
    %c0_i32_1 = arith.constant 0 : i32
    return %arg0, %c0_i32, %c0_i32_0 : i32, i32, i32
  }
  func.func @transform_1(%arg0: i32) -> (i32, i32, i32) {
    %c0_i32 = arith.constant 0 : i32
    %c0_i32_0 = arith.constant 0 : i32
    %c0_i32_1 = arith.constant 0 : i32
    return %arg0, %c0_i32, %c0_i32_0 : i32, i32, i32
  }
  func.func @transform_2(%arg0: i32) -> (i32, i32) {
    %c0_i32 = arith.constant 0 : i32
    %c0_i32_0 = arith.constant 0 : i32
    %c0_i32_1 = arith.constant 0 : i32
    return %c0_i32, %c0_i32_0 : i32, i32
  }
  func.func @transform_3(%arg0: i32) -> (i32, i32) {
    %c0_i32 = arith.constant 0 : i32
    %c0_i32_0 = arith.constant 0 : i32
    %c0_i32_1 = arith.constant 0 : i32
    return %c0_i32, %c0_i32_0 : i32, i32
  }
  func.func @transform_4(%arg0: i32) -> (i32, i32) {
    %c0_i32 = arith.constant 0 : i32
    %c0_i32_0 = arith.constant 0 : i32
    %c0_i32_1 = arith.constant 0 : i32
    return %c0_i32, %c0_i32_0 : i32, i32
  }
  func.func @transform_5(%arg0: i32) -> (i32, i32) {
    %c0_i32 = arith.constant 0 : i32
    %c0_i32_0 = arith.constant 0 : i32
    %c0_i32_1 = arith.constant 0 : i32
    return %c0_i32, %c0_i32_0 : i32, i32
  }
  func.func @transform_6(%arg0: i32) -> (i32, i32, i32, i32) {
    %c0_i32 = arith.constant 0 : i32
    %c0_i32_0 = arith.constant 0 : i32
    %c0_i32_1 = arith.constant 0 : i32
    %c0_i32_2 = arith.constant 0 : i32
    return %c0_i32, %arg0, %c0_i32_0, %c0_i32_1 : i32, i32, i32, i32
  }
}

module attributes {stable_mosaic.version = 11 : i64} {
  func.func @_mixer_kernel(%arg0: i32, %arg1: memref<2x4x4x8xbf16, #tpu.memory_space<vmem>>, %arg2: memref<4x4x8xf32, #tpu.memory_space<vmem>>, %arg3: memref<4x8xf32, #tpu.memory_space<vmem>>, %arg4: memref<4x4x8xf32, #tpu.memory_space<vmem>>, %arg5: memref<4x8xf32, #tpu.memory_space<vmem>>, %arg6: memref<4x8x8xbf16, #tpu.memory_space<vmem>>, %arg7: memref<4x1x8xf32, #tpu.memory_space<vmem>>, %arg8: memref<4x8x8xbf16, #tpu.memory_space<vmem>>, %arg9: memref<4x1x8xf32, #tpu.memory_space<vmem>>, %arg10: memref<4x8x8xbf16, #tpu.memory_space<vmem>>, %arg11: memref<4x1x8xf32, #tpu.memory_space<vmem>>, %arg12: memref<4x8x8xbf16, #tpu.memory_space<vmem>>, %arg13: memref<4x1x8xf32, #tpu.memory_space<vmem>>, %arg14: memref<8x8xbf16, #tpu.memory_space<vmem>>, %arg15: memref<1x8xf32, #tpu.memory_space<vmem>>, %arg16: memref<2x4x4x8xbf16, #tpu.memory_space<vmem>>) attributes {dimension_semantics = [#tpu.dimension_semantics<parallel>], iteration_bounds = array<i64: 2>, scalar_prefetch = 0 : i64, scratch_operands = 0 : i64, tpu.core_type = #tpu.core_type<tc>, window_params = [{transform_indices = @transform_0, window_bounds = array<i64: 2, 4, 4, 8>}, {pipeline_mode = #tpu.pipeline_mode<synchronous>, transform_indices = @transform_1, window_bounds = array<i64: 4, 4, 8>}, {pipeline_mode = #tpu.pipeline_mode<synchronous>, transform_indices = @transform_2, window_bounds = array<i64: 4, 8>}, {pipeline_mode = #tpu.pipeline_mode<synchronous>, transform_indices = @transform_3, window_bounds = array<i64: 4, 4, 8>}, {pipeline_mode = #tpu.pipeline_mode<synchronous>, transform_indices = @transform_4, window_bounds = array<i64: 4, 8>}, {pipeline_mode = #tpu.pipeline_mode<synchronous>, transform_indices = @transform_5, window_bounds = array<i64: 4, 8, 8>}, {pipeline_mode = #tpu.pipeline_mode<synchronous>, transform_indices = @transform_6, window_bounds = array<i64: 4, 1, 8>}, {pipeline_mode = #tpu.pipeline_mode<synchronous>, transform_indices = @transform_7, window_bounds = array<i64: 4, 8, 8>}, {pipeline_mode = #tpu.pipeline_mode<synchronous>, transform_indices = @transform_8, window_bounds = array<i64: 4, 1, 8>}, {pipeline_mode = #tpu.pipeline_mode<synchronous>, transform_indices = @transform_9, window_bounds = array<i64: 4, 8, 8>}, {pipeline_mode = #tpu.pipeline_mode<synchronous>, transform_indices = @transform_10, window_bounds = array<i64: 4, 1, 8>}, {pipeline_mode = #tpu.pipeline_mode<synchronous>, transform_indices = @transform_11, window_bounds = array<i64: 4, 8, 8>}, {pipeline_mode = #tpu.pipeline_mode<synchronous>, transform_indices = @transform_12, window_bounds = array<i64: 4, 1, 8>}, {pipeline_mode = #tpu.pipeline_mode<synchronous>, transform_indices = @transform_13, window_bounds = array<i64: 8, 8>}, {pipeline_mode = #tpu.pipeline_mode<synchronous>, transform_indices = @transform_14, window_bounds = array<i64: 1, 8>}, {transform_indices = @transform_15, window_bounds = array<i64: 2, 4, 4, 8>}]} {
    %c1_i32 = arith.constant 1 : i32
    %0 = arith.cmpi sge, %arg0, %c1_i32 : i32
    %c0 = arith.constant 0 : index
    %c0_0 = arith.constant 0 : index
    %c0_1 = arith.constant 0 : index
    %c0_2 = arith.constant 0 : index
    %1 = vector.load %arg1[%c0, %c0_0, %c0_1, %c0_2] : memref<2x4x4x8xbf16, #tpu.memory_space<vmem>>, vector<2x4x4x8xbf16>
    %2 = arith.extf %1 : vector<2x4x4x8xbf16> to vector<2x4x4x8xf32>
    %c0_3 = arith.constant 0 : index
    %c0_4 = arith.constant 0 : index
    %c0_5 = arith.constant 0 : index
    %3 = vector.load %arg2[%c0_3, %c0_4, %c0_5] : memref<4x4x8xf32, #tpu.memory_space<vmem>>, vector<4x4x8xf32>
    %c0_6 = arith.constant 0 : index
    %c0_7 = arith.constant 0 : index
    %4 = vector.load %arg3[%c0_6, %c0_7] : memref<4x8xf32, #tpu.memory_space<vmem>>, vector<4x8xf32>
    %5 = vector.extract_strided_slice %2 {offsets = [0, 0, 0, 0], sizes = [2, 4, 1, 8], strides = [1, 1, 1, 1]} : vector<2x4x4x8xf32> to vector<2x4x1x8xf32>
    %6 = vector.extract_strided_slice %3 {offsets = [0, 0, 0], sizes = [1, 4, 8], strides = [1, 1, 1]} : vector<4x4x8xf32> to vector<1x4x8xf32>
    %7 = vector.shape_cast %6 : vector<1x4x8xf32> to vector<4x8xf32>
    %8 = vector.shape_cast %7 : vector<4x8xf32> to vector<1x1x4x8xf32>
    %9 = vector.broadcast %5 : vector<2x4x1x8xf32> to vector<2x4x4x8xf32>
    %10 = vector.broadcast %8 : vector<1x1x4x8xf32> to vector<2x4x4x8xf32>
    %11 = arith.mulf %9, %10 : vector<2x4x4x8xf32>
    %12 = vector.extract_strided_slice %2 {offsets = [0, 0, 1, 0], sizes = [2, 4, 1, 8], strides = [1, 1, 1, 1]} : vector<2x4x4x8xf32> to vector<2x4x1x8xf32>
    %13 = vector.extract_strided_slice %3 {offsets = [1, 0, 0], sizes = [1, 4, 8], strides = [1, 1, 1]} : vector<4x4x8xf32> to vector<1x4x8xf32>
    %14 = vector.shape_cast %13 : vector<1x4x8xf32> to vector<4x8xf32>
    %15 = vector.shape_cast %14 : vector<4x8xf32> to vector<1x1x4x8xf32>
    %16 = vector.broadcast %12 : vector<2x4x1x8xf32> to vector<2x4x4x8xf32>
    %17 = vector.broadcast %15 : vector<1x1x4x8xf32> to vector<2x4x4x8xf32>
    %18 = arith.mulf %16, %17 : vector<2x4x4x8xf32>
    %19 = arith.addf %11, %18 : vector<2x4x4x8xf32>
    %20 = vector.extract_strided_slice %2 {offsets = [0, 0, 2, 0], sizes = [2, 4, 1, 8], strides = [1, 1, 1, 1]} : vector<2x4x4x8xf32> to vector<2x4x1x8xf32>
    %21 = vector.extract_strided_slice %3 {offsets = [2, 0, 0], sizes = [1, 4, 8], strides = [1, 1, 1]} : vector<4x4x8xf32> to vector<1x4x8xf32>
    %22 = vector.shape_cast %21 : vector<1x4x8xf32> to vector<4x8xf32>
    %23 = vector.shape_cast %22 : vector<4x8xf32> to vector<1x1x4x8xf32>
    %24 = vector.broadcast %20 : vector<2x4x1x8xf32> to vector<2x4x4x8xf32>
    %25 = vector.broadcast %23 : vector<1x1x4x8xf32> to vector<2x4x4x8xf32>
    %26 = arith.mulf %24, %25 : vector<2x4x4x8xf32>
    %27 = arith.addf %19, %26 : vector<2x4x4x8xf32>
    %28 = vector.extract_strided_slice %2 {offsets = [0, 0, 3, 0], sizes = [2, 4, 1, 8], strides = [1, 1, 1, 1]} : vector<2x4x4x8xf32> to vector<2x4x1x8xf32>
    %29 = vector.extract_strided_slice %3 {offsets = [3, 0, 0], sizes = [1, 4, 8], strides = [1, 1, 1]} : vector<4x4x8xf32> to vector<1x4x8xf32>
    %30 = vector.shape_cast %29 : vector<1x4x8xf32> to vector<4x8xf32>
    %31 = vector.shape_cast %30 : vector<4x8xf32> to vector<1x1x4x8xf32>
    %32 = vector.broadcast %28 : vector<2x4x1x8xf32> to vector<2x4x4x8xf32>
    %33 = vector.broadcast %31 : vector<1x1x4x8xf32> to vector<2x4x4x8xf32>
    %34 = arith.mulf %32, %33 : vector<2x4x4x8xf32>
    %35 = arith.addf %27, %34 : vector<2x4x4x8xf32>
    %36 = vector.shape_cast %4 : vector<4x8xf32> to vector<1x1x4x8xf32>
    %37 = vector.broadcast %36 : vector<1x1x4x8xf32> to vector<2x4x4x8xf32>
    %38 = arith.addf %35, %37 : vector<2x4x4x8xf32>
    %cst = arith.constant 5.000000e-01 : f32
    %39 = vector.broadcast %cst : f32 to vector<2x4x4x8xf32>
    %40 = arith.mulf %39, %38 : vector<2x4x4x8xf32>
    %cst_8 = arith.constant 4.471500e-02 : f32
    %41 = vector.broadcast %cst_8 : f32 to vector<2x4x4x8xf32>
    %42 = arith.mulf %41, %38 : vector<2x4x4x8xf32>
    %43 = arith.mulf %42, %38 : vector<2x4x4x8xf32>
    %44 = arith.mulf %43, %38 : vector<2x4x4x8xf32>
    %45 = arith.addf %38, %44 : vector<2x4x4x8xf32>
    %cst_9 = arith.constant 0.797884583 : f32
    %46 = vector.broadcast %cst_9 : f32 to vector<2x4x4x8xf32>
    %47 = arith.mulf %46, %45 : vector<2x4x4x8xf32>
    %48 = math.tanh %47 : vector<2x4x4x8xf32>
    %cst_10 = arith.constant 1.000000e+00 : f32
    %49 = vector.broadcast %cst_10 : f32 to vector<2x4x4x8xf32>
    %50 = arith.addf %49, %48 : vector<2x4x4x8xf32>
    %51 = arith.mulf %40, %50 : vector<2x4x4x8xf32>
    %c0_11 = arith.constant 0 : index
    %c0_12 = arith.constant 0 : index
    %c0_13 = arith.constant 0 : index
    %52 = vector.load %arg4[%c0_11, %c0_12, %c0_13] : memref<4x4x8xf32, #tpu.memory_space<vmem>>, vector<4x4x8xf32>
    %c0_14 = arith.constant 0 : index
    %c0_15 = arith.constant 0 : index
    %53 = vector.load %arg5[%c0_14, %c0_15] : memref<4x8xf32, #tpu.memory_space<vmem>>, vector<4x8xf32>
    %54 = vector.extract_strided_slice %51 {offsets = [0, 0, 0, 0], sizes = [2, 4, 1, 8], strides = [1, 1, 1, 1]} : vector<2x4x4x8xf32> to vector<2x4x1x8xf32>
    %55 = vector.extract_strided_slice %52 {offsets = [0, 0, 0], sizes = [1, 4, 8], strides = [1, 1, 1]} : vector<4x4x8xf32> to vector<1x4x8xf32>
    %56 = vector.shape_cast %55 : vector<1x4x8xf32> to vector<4x8xf32>
    %57 = vector.shape_cast %56 : vector<4x8xf32> to vector<1x1x4x8xf32>
    %58 = vector.broadcast %54 : vector<2x4x1x8xf32> to vector<2x4x4x8xf32>
    %59 = vector.broadcast %57 : vector<1x1x4x8xf32> to vector<2x4x4x8xf32>
    %60 = arith.mulf %58, %59 : vector<2x4x4x8xf32>
    %61 = vector.extract_strided_slice %51 {offsets = [0, 0, 1, 0], sizes = [2, 4, 1, 8], strides = [1, 1, 1, 1]} : vector<2x4x4x8xf32> to vector<2x4x1x8xf32>
    %62 = vector.extract_strided_slice %52 {offsets = [1, 0, 0], sizes = [1, 4, 8], strides = [1, 1, 1]} : vector<4x4x8xf32> to vector<1x4x8xf32>
    %63 = vector.shape_cast %62 : vector<1x4x8xf32> to vector<4x8xf32>
    %64 = vector.shape_cast %63 : vector<4x8xf32> to vector<1x1x4x8xf32>
    %65 = vector.broadcast %61 : vector<2x4x1x8xf32> to vector<2x4x4x8xf32>
    %66 = vector.broadcast %64 : vector<1x1x4x8xf32> to vector<2x4x4x8xf32>
    %67 = arith.mulf %65, %66 : vector<2x4x4x8xf32>
    %68 = arith.addf %60, %67 : vector<2x4x4x8xf32>
    %69 = vector.extract_strided_slice %51 {offsets = [0, 0, 2, 0], sizes = [2, 4, 1, 8], strides = [1, 1, 1, 1]} : vector<2x4x4x8xf32> to vector<2x4x1x8xf32>
    %70 = vector.extract_strided_slice %52 {offsets = [2, 0, 0], sizes = [1, 4, 8], strides = [1, 1, 1]} : vector<4x4x8xf32> to vector<1x4x8xf32>
    %71 = vector.shape_cast %70 : vector<1x4x8xf32> to vector<4x8xf32>
    %72 = vector.shape_cast %71 : vector<4x8xf32> to vector<1x1x4x8xf32>
    %73 = vector.broadcast %69 : vector<2x4x1x8xf32> to vector<2x4x4x8xf32>
    %74 = vector.broadcast %72 : vector<1x1x4x8xf32> to vector<2x4x4x8xf32>
    %75 = arith.mulf %73, %74 : vector<2x4x4x8xf32>
    %76 = arith.addf %68, %75 : vector<2x4x4x8xf32>
    %77 = vector.extract_strided_slice %51 {offsets = [0, 0, 3, 0], sizes = [2, 4, 1, 8], strides = [1, 1, 1, 1]} : vector<2x4x4x8xf32> to vector<2x4x1x8xf32>
    %78 = vector.extract_strided_slice %52 {offsets = [3, 0, 0], sizes = [1, 4, 8], strides = [1, 1, 1]} : vector<4x4x8xf32> to vector<1x4x8xf32>
    %79 = vector.shape_cast %78 : vector<1x4x8xf32> to vector<4x8xf32>
    %80 = vector.shape_cast %79 : vector<4x8xf32> to vector<1x1x4x8xf32>
    %81 = vector.broadcast %77 : vector<2x4x1x8xf32> to vector<2x4x4x8xf32>
    %82 = vector.broadcast %80 : vector<1x1x4x8xf32> to vector<2x4x4x8xf32>
    %83 = arith.mulf %81, %82 : vector<2x4x4x8xf32>
    %84 = arith.addf %76, %83 : vector<2x4x4x8xf32>
    %85 = vector.shape_cast %53 : vector<4x8xf32> to vector<1x1x4x8xf32>
    %86 = vector.broadcast %85 : vector<1x1x4x8xf32> to vector<2x4x4x8xf32>
    %87 = arith.addf %84, %86 : vector<2x4x4x8xf32>
    %88 = arith.addf %87, %2 : vector<2x4x4x8xf32>
    %89 = vector.extract_strided_slice %88 {offsets = [0, 0, 0, 0], sizes = [2, 1, 4, 8], strides = [1, 1, 1, 1]} : vector<2x4x4x8xf32> to vector<2x1x4x8xf32>
    %90 = vector.shape_cast %89 : vector<2x1x4x8xf32> to vector<2x4x8xf32>
    %91 = vector.shape_cast %90 : vector<2x4x8xf32> to vector<8x8xf32>
    %92 = arith.truncf %91 : vector<8x8xf32> to vector<8x8xbf16>
    %c0_16 = arith.constant 0 : index
    %c0_17 = arith.constant 0 : index
    %c0_18 = arith.constant 0 : index
    %93 = vector.load %arg6[%c0_16, %c0_17, %c0_18] : memref<4x8x8xbf16, #tpu.memory_space<vmem>>, vector<1x8x8xbf16>
    %94 = vector.shape_cast %93 : vector<1x8x8xbf16> to vector<8x8xbf16>
    %cst_19 = arith.constant dense<0.000000e+00> : vector<8x8xf32>
    %95 = tpu.matmul %92, %94, %cst_19 {dimension_numbers = #tpu.dot_dimension_numbers<[1], [0], [0], [1], [0, 0, 1, 1], [], []>} : vector<8x8xbf16>, vector<8x8xbf16>, vector<8x8xf32> -> vector<8x8xf32>
    %c0_20 = arith.constant 0 : index
    %c0_21 = arith.constant 0 : index
    %c0_22 = arith.constant 0 : index
    %96 = vector.load %arg7[%c0_20, %c0_21, %c0_22] : memref<4x1x8xf32, #tpu.memory_space<vmem>>, vector<1x1x8xf32>
    %97 = vector.shape_cast %96 : vector<1x1x8xf32> to vector<1x8xf32>
    %98 = vector.broadcast %97 : vector<1x8xf32> to vector<8x8xf32>
    %99 = arith.addf %95, %98 : vector<8x8xf32>
    %cst_23 = arith.constant 5.000000e-01 : f32
    %100 = vector.broadcast %cst_23 : f32 to vector<8x8xf32>
    %101 = arith.mulf %100, %99 : vector<8x8xf32>
    %cst_24 = arith.constant 4.471500e-02 : f32
    %102 = vector.broadcast %cst_24 : f32 to vector<8x8xf32>
    %103 = arith.mulf %102, %99 : vector<8x8xf32>
    %104 = arith.mulf %103, %99 : vector<8x8xf32>
    %105 = arith.mulf %104, %99 : vector<8x8xf32>
    %106 = arith.addf %99, %105 : vector<8x8xf32>
    %cst_25 = arith.constant 0.797884583 : f32
    %107 = vector.broadcast %cst_25 : f32 to vector<8x8xf32>
    %108 = arith.mulf %107, %106 : vector<8x8xf32>
    %109 = math.tanh %108 : vector<8x8xf32>
    %cst_26 = arith.constant 1.000000e+00 : f32
    %110 = vector.broadcast %cst_26 : f32 to vector<8x8xf32>
    %111 = arith.addf %110, %109 : vector<8x8xf32>
    %112 = arith.mulf %101, %111 : vector<8x8xf32>
    %113 = arith.truncf %112 : vector<8x8xf32> to vector<8x8xbf16>
    %c0_27 = arith.constant 0 : index
    %c0_28 = arith.constant 0 : index
    %c0_29 = arith.constant 0 : index
    %114 = vector.load %arg8[%c0_27, %c0_28, %c0_29] : memref<4x8x8xbf16, #tpu.memory_space<vmem>>, vector<1x8x8xbf16>
    %115 = vector.shape_cast %114 : vector<1x8x8xbf16> to vector<8x8xbf16>
    %cst_30 = arith.constant dense<0.000000e+00> : vector<8x8xf32>
    %116 = tpu.matmul %113, %115, %cst_30 {dimension_numbers = #tpu.dot_dimension_numbers<[1], [0], [0], [1], [0, 0, 1, 1], [], []>} : vector<8x8xbf16>, vector<8x8xbf16>, vector<8x8xf32> -> vector<8x8xf32>
    %c0_31 = arith.constant 0 : index
    %c0_32 = arith.constant 0 : index
    %c0_33 = arith.constant 0 : index
    %117 = vector.load %arg9[%c0_31, %c0_32, %c0_33] : memref<4x1x8xf32, #tpu.memory_space<vmem>>, vector<1x1x8xf32>
    %118 = vector.shape_cast %117 : vector<1x1x8xf32> to vector<1x8xf32>
    %119 = vector.broadcast %118 : vector<1x8xf32> to vector<8x8xf32>
    %120 = arith.addf %116, %119 : vector<8x8xf32>
    %121 = arith.addf %120, %91 : vector<8x8xf32>
    %122 = vector.shape_cast %121 : vector<8x8xf32> to vector<2x4x8xf32>
    %123 = arith.truncf %122 : vector<2x4x8xf32> to vector<2x4x8xbf16>
    %c0_34 = arith.constant 0 : index
    %c0_35 = arith.constant 0 : index
    %c0_36 = arith.constant 0 : index
    %c0_37 = arith.constant 0 : index
    %124 = vector.load %arg16[%c0_34, %c0_35, %c0_36, %c0_37] : memref<2x4x4x8xbf16, #tpu.memory_space<vmem>>, vector<2x1x4x8xbf16>
    %125 = vector.shape_cast %124 : vector<2x1x4x8xbf16> to vector<2x4x8xbf16>
    %126 = vector.shape_cast %123 : vector<2x4x8xbf16> to vector<2x1x4x8xbf16>
    tpu.vector_store %arg16[%c0_34, %c0_35, %c0_36, %c0_37], %126 {strides = array<i32>} : memref<2x4x4x8xbf16, #tpu.memory_space<vmem>>, vector<2x1x4x8xbf16>,
    %127 = vector.extract_strided_slice %88 {offsets = [0, 1, 0, 0], sizes = [2, 1, 4, 8], strides = [1, 1, 1, 1]} : vector<2x4x4x8xf32> to vector<2x1x4x8xf32>
    %128 = vector.shape_cast %127 : vector<2x1x4x8xf32> to vector<2x4x8xf32>
    %129 = vector.shape_cast %128 : vector<2x4x8xf32> to vector<8x8xf32>
    %130 = arith.truncf %129 : vector<8x8xf32> to vector<8x8xbf16>
    %c1 = arith.constant 1 : index
    %c0_38 = arith.constant 0 : index
    %c0_39 = arith.constant 0 : index
    %131 = vector.load %arg6[%c1, %c0_38, %c0_39] : memref<4x8x8xbf16, #tpu.memory_space<vmem>>, vector<1x8x8xbf16>
    %132 = vector.shape_cast %131 : vector<1x8x8xbf16> to vector<8x8xbf16>
    %cst_40 = arith.constant dense<0.000000e+00> : vector<8x8xf32>
    %133 = tpu.matmul %130, %132, %cst_40 {dimension_numbers = #tpu.dot_dimension_numbers<[1], [0], [0], [1], [0, 0, 1, 1], [], []>} : vector<8x8xbf16>, vector<8x8xbf16>, vector<8x8xf32> -> vector<8x8xf32>
    %c1_41 = arith.constant 1 : index
    %c0_42 = arith.constant 0 : index
    %c0_43 = arith.constant 0 : index
    %134 = vector.load %arg7[%c1_41, %c0_42, %c0_43] : memref<4x1x8xf32, #tpu.memory_space<vmem>>, vector<1x1x8xf32>
    %135 = vector.shape_cast %134 : vector<1x1x8xf32> to vector<1x8xf32>
    %136 = vector.broadcast %135 : vector<1x8xf32> to vector<8x8xf32>
    %137 = arith.addf %133, %136 : vector<8x8xf32>
    %cst_44 = arith.constant 5.000000e-01 : f32
    %138 = vector.broadcast %cst_44 : f32 to vector<8x8xf32>
    %139 = arith.mulf %138, %137 : vector<8x8xf32>
    %cst_45 = arith.constant 4.471500e-02 : f32
    %140 = vector.broadcast %cst_45 : f32 to vector<8x8xf32>
    %141 = arith.mulf %140, %137 : vector<8x8xf32>
    %142 = arith.mulf %141, %137 : vector<8x8xf32>
    %143 = arith.mulf %142, %137 : vector<8x8xf32>
    %144 = arith.addf %137, %143 : vector<8x8xf32>
    %cst_46 = arith.constant 0.797884583 : f32
    %145 = vector.broadcast %cst_46 : f32 to vector<8x8xf32>
    %146 = arith.mulf %145, %144 : vector<8x8xf32>
    %147 = math.tanh %146 : vector<8x8xf32>
    %cst_47 = arith.constant 1.000000e+00 : f32
    %148 = vector.broadcast %cst_47 : f32 to vector<8x8xf32>
    %149 = arith.addf %148, %147 : vector<8x8xf32>
    %150 = arith.mulf %139, %149 : vector<8x8xf32>
    %151 = arith.truncf %150 : vector<8x8xf32> to vector<8x8xbf16>
    %c1_48 = arith.constant 1 : index
    %c0_49 = arith.constant 0 : index
    %c0_50 = arith.constant 0 : index
    %152 = vector.load %arg8[%c1_48, %c0_49, %c0_50] : memref<4x8x8xbf16, #tpu.memory_space<vmem>>, vector<1x8x8xbf16>
    %153 = vector.shape_cast %152 : vector<1x8x8xbf16> to vector<8x8xbf16>
    %cst_51 = arith.constant dense<0.000000e+00> : vector<8x8xf32>
    %154 = tpu.matmul %151, %153, %cst_51 {dimension_numbers = #tpu.dot_dimension_numbers<[1], [0], [0], [1], [0, 0, 1, 1], [], []>} : vector<8x8xbf16>, vector<8x8xbf16>, vector<8x8xf32> -> vector<8x8xf32>
    %c1_52 = arith.constant 1 : index
    %c0_53 = arith.constant 0 : index
    %c0_54 = arith.constant 0 : index
    %155 = vector.load %arg9[%c1_52, %c0_53, %c0_54] : memref<4x1x8xf32, #tpu.memory_space<vmem>>, vector<1x1x8xf32>
    %156 = vector.shape_cast %155 : vector<1x1x8xf32> to vector<1x8xf32>
    %157 = vector.broadcast %156 : vector<1x8xf32> to vector<8x8xf32>
    %158 = arith.addf %154, %157 : vector<8x8xf32>
    %159 = arith.addf %158, %129 : vector<8x8xf32>
    %160 = vector.shape_cast %159 : vector<8x8xf32> to vector<2x4x8xf32>
    %161 = arith.truncf %160 : vector<2x4x8xf32> to vector<2x4x8xbf16>
    %c0_55 = arith.constant 0 : index
    %c1_56 = arith.constant 1 : index
    %c0_57 = arith.constant 0 : index
    %c0_58 = arith.constant 0 : index
    %162 = vector.load %arg16[%c0_55, %c1_56, %c0_57, %c0_58] : memref<2x4x4x8xbf16, #tpu.memory_space<vmem>>, vector<2x1x4x8xbf16>
    %163 = vector.shape_cast %162 : vector<2x1x4x8xbf16> to vector<2x4x8xbf16>
    %164 = vector.shape_cast %161 : vector<2x4x8xbf16> to vector<2x1x4x8xbf16>
    tpu.vector_store %arg16[%c0_55, %c1_56, %c0_57, %c0_58], %164 {strides = array<i32>} : memref<2x4x4x8xbf16, #tpu.memory_space<vmem>>, vector<2x1x4x8xbf16>,
    %165 = vector.extract_strided_slice %88 {offsets = [0, 2, 0, 0], sizes = [2, 1, 4, 8], strides = [1, 1, 1, 1]} : vector<2x4x4x8xf32> to vector<2x1x4x8xf32>
    %166 = vector.shape_cast %165 : vector<2x1x4x8xf32> to vector<2x4x8xf32>
    %167 = vector.shape_cast %166 : vector<2x4x8xf32> to vector<8x8xf32>
    %168 = arith.truncf %167 : vector<8x8xf32> to vector<8x8xbf16>
    %c2 = arith.constant 2 : index
    %c0_59 = arith.constant 0 : index
    %c0_60 = arith.constant 0 : index
    %169 = vector.load %arg6[%c2, %c0_59, %c0_60] : memref<4x8x8xbf16, #tpu.memory_space<vmem>>, vector<1x8x8xbf16>
    %170 = vector.shape_cast %169 : vector<1x8x8xbf16> to vector<8x8xbf16>
    %cst_61 = arith.constant dense<0.000000e+00> : vector<8x8xf32>
    %171 = tpu.matmul %168, %170, %cst_61 {dimension_numbers = #tpu.dot_dimension_numbers<[1], [0], [0], [1], [0, 0, 1, 1], [], []>} : vector<8x8xbf16>, vector<8x8xbf16>, vector<8x8xf32> -> vector<8x8xf32>
    %c2_62 = arith.constant 2 : index
    %c0_63 = arith.constant 0 : index
    %c0_64 = arith.constant 0 : index
    %172 = vector.load %arg7[%c2_62, %c0_63, %c0_64] : memref<4x1x8xf32, #tpu.memory_space<vmem>>, vector<1x1x8xf32>
    %173 = vector.shape_cast %172 : vector<1x1x8xf32> to vector<1x8xf32>
    %174 = vector.broadcast %173 : vector<1x8xf32> to vector<8x8xf32>
    %175 = arith.addf %171, %174 : vector<8x8xf32>
    %cst_65 = arith.constant 5.000000e-01 : f32
    %176 = vector.broadcast %cst_65 : f32 to vector<8x8xf32>
    %177 = arith.mulf %176, %175 : vector<8x8xf32>
    %cst_66 = arith.constant 4.471500e-02 : f32
    %178 = vector.broadcast %cst_66 : f32 to vector<8x8xf32>
    %179 = arith.mulf %178, %175 : vector<8x8xf32>
    %180 = arith.mulf %179, %175 : vector<8x8xf32>
    %181 = arith.mulf %180, %175 : vector<8x8xf32>
    %182 = arith.addf %175, %181 : vector<8x8xf32>
    %cst_67 = arith.constant 0.797884583 : f32
    %183 = vector.broadcast %cst_67 : f32 to vector<8x8xf32>
    %184 = arith.mulf %183, %182 : vector<8x8xf32>
    %185 = math.tanh %184 : vector<8x8xf32>
    %cst_68 = arith.constant 1.000000e+00 : f32
    %186 = vector.broadcast %cst_68 : f32 to vector<8x8xf32>
    %187 = arith.addf %186, %185 : vector<8x8xf32>
    %188 = arith.mulf %177, %187 : vector<8x8xf32>
    %189 = arith.truncf %188 : vector<8x8xf32> to vector<8x8xbf16>
    %c2_69 = arith.constant 2 : index
    %c0_70 = arith.constant 0 : index
    %c0_71 = arith.constant 0 : index
    %190 = vector.load %arg8[%c2_69, %c0_70, %c0_71] : memref<4x8x8xbf16, #tpu.memory_space<vmem>>, vector<1x8x8xbf16>
    %191 = vector.shape_cast %190 : vector<1x8x8xbf16> to vector<8x8xbf16>
    %cst_72 = arith.constant dense<0.000000e+00> : vector<8x8xf32>
    %192 = tpu.matmul %189, %191, %cst_72 {dimension_numbers = #tpu.dot_dimension_numbers<[1], [0], [0], [1], [0, 0, 1, 1], [], []>} : vector<8x8xbf16>, vector<8x8xbf16>, vector<8x8xf32> -> vector<8x8xf32>
    %c2_73 = arith.constant 2 : index
    %c0_74 = arith.constant 0 : index
    %c0_75 = arith.constant 0 : index
    %193 = vector.load %arg9[%c2_73, %c0_74, %c0_75] : memref<4x1x8xf32, #tpu.memory_space<vmem>>, vector<1x1x8xf32>
    %194 = vector.shape_cast %193 : vector<1x1x8xf32> to vector<1x8xf32>
    %195 = vector.broadcast %194 : vector<1x8xf32> to vector<8x8xf32>
    %196 = arith.addf %192, %195 : vector<8x8xf32>
    %197 = arith.addf %196, %167 : vector<8x8xf32>
    %198 = vector.shape_cast %197 : vector<8x8xf32> to vector<2x4x8xf32>
    %199 = arith.truncf %198 : vector<2x4x8xf32> to vector<2x4x8xbf16>
    %c0_76 = arith.constant 0 : index
    %c2_77 = arith.constant 2 : index
    %c0_78 = arith.constant 0 : index
    %c0_79 = arith.constant 0 : index
    %200 = vector.load %arg16[%c0_76, %c2_77, %c0_78, %c0_79] : memref<2x4x4x8xbf16, #tpu.memory_space<vmem>>, vector<2x1x4x8xbf16>
    %201 = vector.shape_cast %200 : vector<2x1x4x8xbf16> to vector<2x4x8xbf16>
    %202 = vector.shape_cast %199 : vector<2x4x8xbf16> to vector<2x1x4x8xbf16>
    tpu.vector_store %arg16[%c0_76, %c2_77, %c0_78, %c0_79], %202 {strides = array<i32>} : memref<2x4x4x8xbf16, #tpu.memory_space<vmem>>, vector<2x1x4x8xbf16>,
    %203 = vector.extract_strided_slice %88 {offsets = [0, 3, 0, 0], sizes = [2, 1, 4, 8], strides = [1, 1, 1, 1]} : vector<2x4x4x8xf32> to vector<2x1x4x8xf32>
    %204 = vector.shape_cast %203 : vector<2x1x4x8xf32> to vector<2x4x8xf32>
    %205 = vector.shape_cast %204 : vector<2x4x8xf32> to vector<8x8xf32>
    %206 = arith.truncf %205 : vector<8x8xf32> to vector<8x8xbf16>
    %c3 = arith.constant 3 : index
    %c0_80 = arith.constant 0 : index
    %c0_81 = arith.constant 0 : index
    %207 = vector.load %arg6[%c3, %c0_80, %c0_81] : memref<4x8x8xbf16, #tpu.memory_space<vmem>>, vector<1x8x8xbf16>
    %208 = vector.shape_cast %207 : vector<1x8x8xbf16> to vector<8x8xbf16>
    %cst_82 = arith.constant dense<0.000000e+00> : vector<8x8xf32>
    %209 = tpu.matmul %206, %208, %cst_82 {dimension_numbers = #tpu.dot_dimension_numbers<[1], [0], [0], [1], [0, 0, 1, 1], [], []>} : vector<8x8xbf16>, vector<8x8xbf16>, vector<8x8xf32> -> vector<8x8xf32>
    %c3_83 = arith.constant 3 : index
    %c0_84 = arith.constant 0 : index
    %c0_85 = arith.constant 0 : index
    %210 = vector.load %arg7[%c3_83, %c0_84, %c0_85] : memref<4x1x8xf32, #tpu.memory_space<vmem>>, vector<1x1x8xf32>
    %211 = vector.shape_cast %210 : vector<1x1x8xf32> to vector<1x8xf32>
    %212 = vector.broadcast %211 : vector<1x8xf32> to vector<8x8xf32>
    %213 = arith.addf %209, %212 : vector<8x8xf32>
    %cst_86 = arith.constant 5.000000e-01 : f32
    %214 = vector.broadcast %cst_86 : f32 to vector<8x8xf32>
    %215 = arith.mulf %214, %213 : vector<8x8xf32>
    %cst_87 = arith.constant 4.471500e-02 : f32
    %216 = vector.broadcast %cst_87 : f32 to vector<8x8xf32>
    %217 = arith.mulf %216, %213 : vector<8x8xf32>
    %218 = arith.mulf %217, %213 : vector<8x8xf32>
    %219 = arith.mulf %218, %213 : vector<8x8xf32>
    %220 = arith.addf %213, %219 : vector<8x8xf32>
    %cst_88 = arith.constant 0.797884583 : f32
    %221 = vector.broadcast %cst_88 : f32 to vector<8x8xf32>
    %222 = arith.mulf %221, %220 : vector<8x8xf32>
    %223 = math.tanh %222 : vector<8x8xf32>
    %cst_89 = arith.constant 1.000000e+00 : f32
    %224 = vector.broadcast %cst_89 : f32 to vector<8x8xf32>
    %225 = arith.addf %224, %223 : vector<8x8xf32>
    %226 = arith.mulf %215, %225 : vector<8x8xf32>
    %227 = arith.truncf %226 : vector<8x8xf32> to vector<8x8xbf16>
    %c3_90 = arith.constant 3 : index
    %c0_91 = arith.constant 0 : index
    %c0_92 = arith.constant 0 : index
    %228 = vector.load %arg8[%c3_90, %c0_91, %c0_92] : memref<4x8x8xbf16, #tpu.memory_space<vmem>>, vector<1x8x8xbf16>
    %229 = vector.shape_cast %228 : vector<1x8x8xbf16> to vector<8x8xbf16>
    %cst_93 = arith.constant dense<0.000000e+00> : vector<8x8xf32>
    %230 = tpu.matmul %227, %229, %cst_93 {dimension_numbers = #tpu.dot_dimension_numbers<[1], [0], [0], [1], [0, 0, 1, 1], [], []>} : vector<8x8xbf16>, vector<8x8xbf16>, vector<8x8xf32> -> vector<8x8xf32>
    %c3_94 = arith.constant 3 : index
    %c0_95 = arith.constant 0 : index
    %c0_96 = arith.constant 0 : index
    %231 = vector.load %arg9[%c3_94, %c0_95, %c0_96] : memref<4x1x8xf32, #tpu.memory_space<vmem>>, vector<1x1x8xf32>
    %232 = vector.shape_cast %231 : vector<1x1x8xf32> to vector<1x8xf32>
    %233 = vector.broadcast %232 : vector<1x8xf32> to vector<8x8xf32>
    %234 = arith.addf %230, %233 : vector<8x8xf32>
    %235 = arith.addf %234, %205 : vector<8x8xf32>
    %236 = vector.shape_cast %235 : vector<8x8xf32> to vector<2x4x8xf32>
    %237 = arith.truncf %236 : vector<2x4x8xf32> to vector<2x4x8xbf16>
    %c0_97 = arith.constant 0 : index
    %c3_98 = arith.constant 3 : index
    %c0_99 = arith.constant 0 : index
    %c0_100 = arith.constant 0 : index
    %238 = vector.load %arg16[%c0_97, %c3_98, %c0_99, %c0_100] : memref<2x4x4x8xbf16, #tpu.memory_space<vmem>>, vector<2x1x4x8xbf16>
    %239 = vector.shape_cast %238 : vector<2x1x4x8xbf16> to vector<2x4x8xbf16>
    %240 = vector.shape_cast %237 : vector<2x4x8xbf16> to vector<2x1x4x8xbf16>
    tpu.vector_store %arg16[%c0_97, %c3_98, %c0_99, %c0_100], %240 {strides = array<i32>} : memref<2x4x4x8xbf16, #tpu.memory_space<vmem>>, vector<2x1x4x8xbf16>,
    %c0_101 = arith.constant 0 : index
    %c0_102 = arith.constant 0 : index
    %c0_103 = arith.constant 0 : index
    %c0_104 = arith.constant 0 : index
    %241 = vector.load %arg16[%c0_101, %c0_102, %c0_103, %c0_104] : memref<2x4x4x8xbf16, #tpu.memory_space<vmem>>, vector<2x4x1x8xbf16>
    %242 = vector.shape_cast %241 : vector<2x4x1x8xbf16> to vector<2x4x8xbf16>
    %243 = vector.shape_cast %242 : vector<2x4x8xbf16> to vector<8x8xbf16>
    %244 = arith.extf %243 : vector<8x8xbf16> to vector<8x8xf32>
    %c0_105 = arith.constant 0 : index
    %c0_106 = arith.constant 0 : index
    %c0_107 = arith.constant 0 : index
    %245 = vector.load %arg10[%c0_105, %c0_106, %c0_107] : memref<4x8x8xbf16, #tpu.memory_space<vmem>>, vector<1x8x8xbf16>
    %246 = vector.shape_cast %245 : vector<1x8x8xbf16> to vector<8x8xbf16>
    %cst_108 = arith.constant dense<0.000000e+00> : vector<8x8xf32>
    %247 = tpu.matmul %243, %246, %cst_108 {dimension_numbers = #tpu.dot_dimension_numbers<[1], [0], [0], [1], [0, 0, 1, 1], [], []>} : vector<8x8xbf16>, vector<8x8xbf16>, vector<8x8xf32> -> vector<8x8xf32>
    %c0_109 = arith.constant 0 : index
    %c0_110 = arith.constant 0 : index
    %c0_111 = arith.constant 0 : index
    %248 = vector.load %arg11[%c0_109, %c0_110, %c0_111] : memref<4x1x8xf32, #tpu.memory_space<vmem>>, vector<1x1x8xf32>
    %249 = vector.shape_cast %248 : vector<1x1x8xf32> to vector<1x8xf32>
    %250 = vector.broadcast %249 : vector<1x8xf32> to vector<8x8xf32>
    %251 = arith.addf %247, %250 : vector<8x8xf32>
    %cst_112 = arith.constant 5.000000e-01 : f32
    %252 = vector.broadcast %cst_112 : f32 to vector<8x8xf32>
    %253 = arith.mulf %252, %251 : vector<8x8xf32>
    %cst_113 = arith.constant 4.471500e-02 : f32
    %254 = vector.broadcast %cst_113 : f32 to vector<8x8xf32>
    %255 = arith.mulf %254, %251 : vector<8x8xf32>
    %256 = arith.mulf %255, %251 : vector<8x8xf32>
    %257 = arith.mulf %256, %251 : vector<8x8xf32>
    %258 = arith.addf %251, %257 : vector<8x8xf32>
    %cst_114 = arith.constant 0.797884583 : f32
    %259 = vector.broadcast %cst_114 : f32 to vector<8x8xf32>
    %260 = arith.mulf %259, %258 : vector<8x8xf32>
    %261 = math.tanh %260 : vector<8x8xf32>
    %cst_115 = arith.constant 1.000000e+00 : f32
    %262 = vector.broadcast %cst_115 : f32 to vector<8x8xf32>
    %263 = arith.addf %262, %261 : vector<8x8xf32>
    %264 = arith.mulf %253, %263 : vector<8x8xf32>
    %265 = arith.truncf %264 : vector<8x8xf32> to vector<8x8xbf16>
    %c0_116 = arith.constant 0 : index
    %c0_117 = arith.constant 0 : index
    %c0_118 = arith.constant 0 : index
    %266 = vector.load %arg12[%c0_116, %c0_117, %c0_118] : memref<4x8x8xbf16, #tpu.memory_space<vmem>>, vector<1x8x8xbf16>
    %267 = vector.shape_cast %266 : vector<1x8x8xbf16> to vector<8x8xbf16>
    %cst_119 = arith.constant dense<0.000000e+00> : vector<8x8xf32>
    %268 = tpu.matmul %265, %267, %cst_119 {dimension_numbers = #tpu.dot_dimension_numbers<[1], [0], [0], [1], [0, 0, 1, 1], [], []>} : vector<8x8xbf16>, vector<8x8xbf16>, vector<8x8xf32> -> vector<8x8xf32>
    %c0_120 = arith.constant 0 : index
    %c0_121 = arith.constant 0 : index
    %c0_122 = arith.constant 0 : index
    %269 = vector.load %arg13[%c0_120, %c0_121, %c0_122] : memref<4x1x8xf32, #tpu.memory_space<vmem>>, vector<1x1x8xf32>
    %270 = vector.shape_cast %269 : vector<1x1x8xf32> to vector<1x8xf32>
    %271 = vector.broadcast %270 : vector<1x8xf32> to vector<8x8xf32>
    %272 = arith.addf %268, %271 : vector<8x8xf32>
    %273 = arith.addf %272, %244 : vector<8x8xf32>
    %274 = arith.extui %0 : i1 to i32
    %c0_i32 = arith.constant 0 : i32
    %275 = arith.cmpi ne, %274, %c0_i32 : i32
    scf.if %275 {
      %393 = arith.truncf %273 : vector<8x8xf32> to vector<8x8xbf16>
      %c0_199 = arith.constant 0 : index
      %c0_200 = arith.constant 0 : index
      %394 = vector.load %arg14[%c0_199, %c0_200] : memref<8x8xbf16, #tpu.memory_space<vmem>>, vector<8x8xbf16>
      %cst_201 = arith.constant dense<0.000000e+00> : vector<8x8xf32>
      %395 = tpu.matmul %393, %394, %cst_201 {dimension_numbers = #tpu.dot_dimension_numbers<[1], [0], [0], [1], [0, 0, 1, 1], [], []>} : vector<8x8xbf16>, vector<8x8xbf16>, vector<8x8xf32> -> vector<8x8xf32>
      %c0_202 = arith.constant 0 : index
      %c0_203 = arith.constant 0 : index
      %396 = vector.load %arg15[%c0_202, %c0_203] : memref<1x8xf32, #tpu.memory_space<vmem>>, vector<1x8xf32>
      %397 = vector.broadcast %396 : vector<1x8xf32> to vector<8x8xf32>
      %398 = arith.addf %395, %397 : vector<8x8xf32>
      %399 = vector.shape_cast %398 : vector<8x8xf32> to vector<2x4x8xf32>
      %400 = arith.truncf %399 : vector<2x4x8xf32> to vector<2x4x8xbf16>
      %c0_204 = arith.constant 0 : index
      %c0_205 = arith.constant 0 : index
      %c0_206 = arith.constant 0 : index
      %c0_207 = arith.constant 0 : index
      %401 = vector.load %arg16[%c0_204, %c0_205, %c0_206, %c0_207] : memref<2x4x4x8xbf16, #tpu.memory_space<vmem>>, vector<2x4x1x8xbf16>
      %402 = vector.shape_cast %401 : vector<2x4x1x8xbf16> to vector<2x4x8xbf16>
      %403 = vector.shape_cast %400 : vector<2x4x8xbf16> to vector<2x4x1x8xbf16>
      tpu.vector_store %arg16[%c0_204, %c0_205, %c0_206, %c0_207], %403 {strides = array<i32>} : memref<2x4x4x8xbf16, #tpu.memory_space<vmem>>, vector<2x4x1x8xbf16>,
    } else {
    }
    %true = arith.constant true
    %276 = arith.xori %0, %true : i1
    %277 = arith.extui %276 : i1 to i32
    %c0_i32_123 = arith.constant 0 : i32
    %278 = arith.cmpi ne, %277, %c0_i32_123 : i32
    scf.if %278 {
      %393 = vector.shape_cast %273 : vector<8x8xf32> to vector<2x4x8xf32>
      %394 = arith.truncf %393 : vector<2x4x8xf32> to vector<2x4x8xbf16>
      %c0_199 = arith.constant 0 : index
      %c0_200 = arith.constant 0 : index
      %c0_201 = arith.constant 0 : index
      %c0_202 = arith.constant 0 : index
      %395 = vector.load %arg16[%c0_199, %c0_200, %c0_201, %c0_202] : memref<2x4x4x8xbf16, #tpu.memory_space<vmem>>, vector<2x4x1x8xbf16>
      %396 = vector.shape_cast %395 : vector<2x4x1x8xbf16> to vector<2x4x8xbf16>
      %397 = vector.shape_cast %394 : vector<2x4x8xbf16> to vector<2x4x1x8xbf16>
      tpu.vector_store %arg16[%c0_199, %c0_200, %c0_201, %c0_202], %397 {strides = array<i32>} : memref<2x4x4x8xbf16, #tpu.memory_space<vmem>>, vector<2x4x1x8xbf16>,
    } else {
    }
    %c0_124 = arith.constant 0 : index
    %c0_125 = arith.constant 0 : index
    %c1_126 = arith.constant 1 : index
    %c0_127 = arith.constant 0 : index
    %279 = vector.load %arg16[%c0_124, %c0_125, %c1_126, %c0_127] : memref<2x4x4x8xbf16, #tpu.memory_space<vmem>>, vector<2x4x1x8xbf16>
    %280 = vector.shape_cast %279 : vector<2x4x1x8xbf16> to vector<2x4x8xbf16>
    %281 = vector.shape_cast %280 : vector<2x4x8xbf16> to vector<8x8xbf16>
    %282 = arith.extf %281 : vector<8x8xbf16> to vector<8x8xf32>
    %c1_128 = arith.constant 1 : index
    %c0_129 = arith.constant 0 : index
    %c0_130 = arith.constant 0 : index
    %283 = vector.load %arg10[%c1_128, %c0_129, %c0_130] : memref<4x8x8xbf16, #tpu.memory_space<vmem>>, vector<1x8x8xbf16>
    %284 = vector.shape_cast %283 : vector<1x8x8xbf16> to vector<8x8xbf16>
    %cst_131 = arith.constant dense<0.000000e+00> : vector<8x8xf32>
    %285 = tpu.matmul %281, %284, %cst_131 {dimension_numbers = #tpu.dot_dimension_numbers<[1], [0], [0], [1], [0, 0, 1, 1], [], []>} : vector<8x8xbf16>, vector<8x8xbf16>, vector<8x8xf32> -> vector<8x8xf32>
    %c1_132 = arith.constant 1 : index
    %c0_133 = arith.constant 0 : index
    %c0_134 = arith.constant 0 : index
    %286 = vector.load %arg11[%c1_132, %c0_133, %c0_134] : memref<4x1x8xf32, #tpu.memory_space<vmem>>, vector<1x1x8xf32>
    %287 = vector.shape_cast %286 : vector<1x1x8xf32> to vector<1x8xf32>
    %288 = vector.broadcast %287 : vector<1x8xf32> to vector<8x8xf32>
    %289 = arith.addf %285, %288 : vector<8x8xf32>
    %cst_135 = arith.constant 5.000000e-01 : f32
    %290 = vector.broadcast %cst_135 : f32 to vector<8x8xf32>
    %291 = arith.mulf %290, %289 : vector<8x8xf32>
    %cst_136 = arith.constant 4.471500e-02 : f32
    %292 = vector.broadcast %cst_136 : f32 to vector<8x8xf32>
    %293 = arith.mulf %292, %289 : vector<8x8xf32>
    %294 = arith.mulf %293, %289 : vector<8x8xf32>
    %295 = arith.mulf %294, %289 : vector<8x8xf32>
    %296 = arith.addf %289, %295 : vector<8x8xf32>
    %cst_137 = arith.constant 0.797884583 : f32
    %297 = vector.broadcast %cst_137 : f32 to vector<8x8xf32>
    %298 = arith.mulf %297, %296 : vector<8x8xf32>
    %299 = math.tanh %298 : vector<8x8xf32>
    %cst_138 = arith.constant 1.000000e+00 : f32
    %300 = vector.broadcast %cst_138 : f32 to vector<8x8xf32>
    %301 = arith.addf %300, %299 : vector<8x8xf32>
    %302 = arith.mulf %291, %301 : vector<8x8xf32>
    %303 = arith.truncf %302 : vector<8x8xf32> to vector<8x8xbf16>
    %c1_139 = arith.constant 1 : index
    %c0_140 = arith.constant 0 : index
    %c0_141 = arith.constant 0 : index
    %304 = vector.load %arg12[%c1_139, %c0_140, %c0_141] : memref<4x8x8xbf16, #tpu.memory_space<vmem>>, vector<1x8x8xbf16>
    %305 = vector.shape_cast %304 : vector<1x8x8xbf16> to vector<8x8xbf16>
    %cst_142 = arith.constant dense<0.000000e+00> : vector<8x8xf32>
    %306 = tpu.matmul %303, %305, %cst_142 {dimension_numbers = #tpu.dot_dimension_numbers<[1], [0], [0], [1], [0, 0, 1, 1], [], []>} : vector<8x8xbf16>, vector<8x8xbf16>, vector<8x8xf32> -> vector<8x8xf32>
    %c1_143 = arith.constant 1 : index
    %c0_144 = arith.constant 0 : index
    %c0_145 = arith.constant 0 : index
    %307 = vector.load %arg13[%c1_143, %c0_144, %c0_145] : memref<4x1x8xf32, #tpu.memory_space<vmem>>, vector<1x1x8xf32>
    %308 = vector.shape_cast %307 : vector<1x1x8xf32> to vector<1x8xf32>
    %309 = vector.broadcast %308 : vector<1x8xf32> to vector<8x8xf32>
    %310 = arith.addf %306, %309 : vector<8x8xf32>
    %311 = arith.addf %310, %282 : vector<8x8xf32>
    %312 = arith.extui %0 : i1 to i32
    %c0_i32_146 = arith.constant 0 : i32
    %313 = arith.cmpi ne, %312, %c0_i32_146 : i32
    scf.if %313 {
      %393 = arith.truncf %311 : vector<8x8xf32> to vector<8x8xbf16>
      %c0_199 = arith.constant 0 : index
      %c0_200 = arith.constant 0 : index
      %394 = vector.load %arg14[%c0_199, %c0_200] : memref<8x8xbf16, #tpu.memory_space<vmem>>, vector<8x8xbf16>
      %cst_201 = arith.constant dense<0.000000e+00> : vector<8x8xf32>
      %395 = tpu.matmul %393, %394, %cst_201 {dimension_numbers = #tpu.dot_dimension_numbers<[1], [0], [0], [1], [0, 0, 1, 1], [], []>} : vector<8x8xbf16>, vector<8x8xbf16>, vector<8x8xf32> -> vector<8x8xf32>
      %c0_202 = arith.constant 0 : index
      %c0_203 = arith.constant 0 : index
      %396 = vector.load %arg15[%c0_202, %c0_203] : memref<1x8xf32, #tpu.memory_space<vmem>>, vector<1x8xf32>
      %397 = vector.broadcast %396 : vector<1x8xf32> to vector<8x8xf32>
      %398 = arith.addf %395, %397 : vector<8x8xf32>
      %399 = vector.shape_cast %398 : vector<8x8xf32> to vector<2x4x8xf32>
      %400 = arith.truncf %399 : vector<2x4x8xf32> to vector<2x4x8xbf16>
      %c0_204 = arith.constant 0 : index
      %c0_205 = arith.constant 0 : index
      %c1_206 = arith.constant 1 : index
      %c0_207 = arith.constant 0 : index
      %401 = vector.load %arg16[%c0_204, %c0_205, %c1_206, %c0_207] : memref<2x4x4x8xbf16, #tpu.memory_space<vmem>>, vector<2x4x1x8xbf16>
      %402 = vector.shape_cast %401 : vector<2x4x1x8xbf16> to vector<2x4x8xbf16>
      %403 = vector.shape_cast %400 : vector<2x4x8xbf16> to vector<2x4x1x8xbf16>
      tpu.vector_store %arg16[%c0_204, %c0_205, %c1_206, %c0_207], %403 {strides = array<i32>} : memref<2x4x4x8xbf16, #tpu.memory_space<vmem>>, vector<2x4x1x8xbf16>,
    } else {
    }
    %true_147 = arith.constant true
    %314 = arith.xori %0, %true_147 : i1
    %315 = arith.extui %314 : i1 to i32
    %c0_i32_148 = arith.constant 0 : i32
    %316 = arith.cmpi ne, %315, %c0_i32_148 : i32
    scf.if %316 {
      %393 = vector.shape_cast %311 : vector<8x8xf32> to vector<2x4x8xf32>
      %394 = arith.truncf %393 : vector<2x4x8xf32> to vector<2x4x8xbf16>
      %c0_199 = arith.constant 0 : index
      %c0_200 = arith.constant 0 : index
      %c1_201 = arith.constant 1 : index
      %c0_202 = arith.constant 0 : index
      %395 = vector.load %arg16[%c0_199, %c0_200, %c1_201, %c0_202] : memref<2x4x4x8xbf16, #tpu.memory_space<vmem>>, vector<2x4x1x8xbf16>
      %396 = vector.shape_cast %395 : vector<2x4x1x8xbf16> to vector<2x4x8xbf16>
      %397 = vector.shape_cast %394 : vector<2x4x8xbf16> to vector<2x4x1x8xbf16>
      tpu.vector_store %arg16[%c0_199, %c0_200, %c1_201, %c0_202], %397 {strides = array<i32>} : memref<2x4x4x8xbf16, #tpu.memory_space<vmem>>, vector<2x4x1x8xbf16>,
    } else {
    }
    %c0_149 = arith.constant 0 : index
    %c0_150 = arith.constant 0 : index
    %c2_151 = arith.constant 2 : index
    %c0_152 = arith.constant 0 : index
    %317 = vector.load %arg16[%c0_149, %c0_150, %c2_151, %c0_152] : memref<2x4x4x8xbf16, #tpu.memory_space<vmem>>, vector<2x4x1x8xbf16>
    %318 = vector.shape_cast %317 : vector<2x4x1x8xbf16> to vector<2x4x8xbf16>
    %319 = vector.shape_cast %318 : vector<2x4x8xbf16> to vector<8x8xbf16>
    %320 = arith.extf %319 : vector<8x8xbf16> to vector<8x8xf32>
    %c2_153 = arith.constant 2 : index
    %c0_154 = arith.constant 0 : index
    %c0_155 = arith.constant 0 : index
    %321 = vector.load %arg10[%c2_153, %c0_154, %c0_155] : memref<4x8x8xbf16, #tpu.memory_space<vmem>>, vector<1x8x8xbf16>
    %322 = vector.shape_cast %321 : vector<1x8x8xbf16> to vector<8x8xbf16>
    %cst_156 = arith.constant dense<0.000000e+00> : vector<8x8xf32>
    %323 = tpu.matmul %319, %322, %cst_156 {dimension_numbers = #tpu.dot_dimension_numbers<[1], [0], [0], [1], [0, 0, 1, 1], [], []>} : vector<8x8xbf16>, vector<8x8xbf16>, vector<8x8xf32> -> vector<8x8xf32>
    %c2_157 = arith.constant 2 : index
    %c0_158 = arith.constant 0 : index
    %c0_159 = arith.constant 0 : index
    %324 = vector.load %arg11[%c2_157, %c0_158, %c0_159] : memref<4x1x8xf32, #tpu.memory_space<vmem>>, vector<1x1x8xf32>
    %325 = vector.shape_cast %324 : vector<1x1x8xf32> to vector<1x8xf32>
    %326 = vector.broadcast %325 : vector<1x8xf32> to vector<8x8xf32>
    %327 = arith.addf %323, %326 : vector<8x8xf32>
    %cst_160 = arith.constant 5.000000e-01 : f32
    %328 = vector.broadcast %cst_160 : f32 to vector<8x8xf32>
    %329 = arith.mulf %328, %327 : vector<8x8xf32>
    %cst_161 = arith.constant 4.471500e-02 : f32
    %330 = vector.broadcast %cst_161 : f32 to vector<8x8xf32>
    %331 = arith.mulf %330, %327 : vector<8x8xf32>
    %332 = arith.mulf %331, %327 : vector<8x8xf32>
    %333 = arith.mulf %332, %327 : vector<8x8xf32>
    %334 = arith.addf %327, %333 : vector<8x8xf32>
    %cst_162 = arith.constant 0.797884583 : f32
    %335 = vector.broadcast %cst_162 : f32 to vector<8x8xf32>
    %336 = arith.mulf %335, %334 : vector<8x8xf32>
    %337 = math.tanh %336 : vector<8x8xf32>
    %cst_163 = arith.constant 1.000000e+00 : f32
    %338 = vector.broadcast %cst_163 : f32 to vector<8x8xf32>
    %339 = arith.addf %338, %337 : vector<8x8xf32>
    %340 = arith.mulf %329, %339 : vector<8x8xf32>
    %341 = arith.truncf %340 : vector<8x8xf32> to vector<8x8xbf16>
    %c2_164 = arith.constant 2 : index
    %c0_165 = arith.constant 0 : index
    %c0_166 = arith.constant 0 : index
    %342 = vector.load %arg12[%c2_164, %c0_165, %c0_166] : memref<4x8x8xbf16, #tpu.memory_space<vmem>>, vector<1x8x8xbf16>
    %343 = vector.shape_cast %342 : vector<1x8x8xbf16> to vector<8x8xbf16>
    %cst_167 = arith.constant dense<0.000000e+00> : vector<8x8xf32>
    %344 = tpu.matmul %341, %343, %cst_167 {dimension_numbers = #tpu.dot_dimension_numbers<[1], [0], [0], [1], [0, 0, 1, 1], [], []>} : vector<8x8xbf16>, vector<8x8xbf16>, vector<8x8xf32> -> vector<8x8xf32>
    %c2_168 = arith.constant 2 : index
    %c0_169 = arith.constant 0 : index
    %c0_170 = arith.constant 0 : index
    %345 = vector.load %arg13[%c2_168, %c0_169, %c0_170] : memref<4x1x8xf32, #tpu.memory_space<vmem>>, vector<1x1x8xf32>
    %346 = vector.shape_cast %345 : vector<1x1x8xf32> to vector<1x8xf32>
    %347 = vector.broadcast %346 : vector<1x8xf32> to vector<8x8xf32>
    %348 = arith.addf %344, %347 : vector<8x8xf32>
    %349 = arith.addf %348, %320 : vector<8x8xf32>
    %350 = arith.extui %0 : i1 to i32
    %c0_i32_171 = arith.constant 0 : i32
    %351 = arith.cmpi ne, %350, %c0_i32_171 : i32
    scf.if %351 {
      %393 = arith.truncf %349 : vector<8x8xf32> to vector<8x8xbf16>
      %c0_199 = arith.constant 0 : index
      %c0_200 = arith.constant 0 : index
      %394 = vector.load %arg14[%c0_199, %c0_200] : memref<8x8xbf16, #tpu.memory_space<vmem>>, vector<8x8xbf16>
      %cst_201 = arith.constant dense<0.000000e+00> : vector<8x8xf32>
      %395 = tpu.matmul %393, %394, %cst_201 {dimension_numbers = #tpu.dot_dimension_numbers<[1], [0], [0], [1], [0, 0, 1, 1], [], []>} : vector<8x8xbf16>, vector<8x8xbf16>, vector<8x8xf32> -> vector<8x8xf32>
      %c0_202 = arith.constant 0 : index
      %c0_203 = arith.constant 0 : index
      %396 = vector.load %arg15[%c0_202, %c0_203] : memref<1x8xf32, #tpu.memory_space<vmem>>, vector<1x8xf32>
      %397 = vector.broadcast %396 : vector<1x8xf32> to vector<8x8xf32>
      %398 = arith.addf %395, %397 : vector<8x8xf32>
      %399 = vector.shape_cast %398 : vector<8x8xf32> to vector<2x4x8xf32>
      %400 = arith.truncf %399 : vector<2x4x8xf32> to vector<2x4x8xbf16>
      %c0_204 = arith.constant 0 : index
      %c0_205 = arith.constant 0 : index
      %c2_206 = arith.constant 2 : index
      %c0_207 = arith.constant 0 : index
      %401 = vector.load %arg16[%c0_204, %c0_205, %c2_206, %c0_207] : memref<2x4x4x8xbf16, #tpu.memory_space<vmem>>, vector<2x4x1x8xbf16>
      %402 = vector.shape_cast %401 : vector<2x4x1x8xbf16> to vector<2x4x8xbf16>
      %403 = vector.shape_cast %400 : vector<2x4x8xbf16> to vector<2x4x1x8xbf16>
      tpu.vector_store %arg16[%c0_204, %c0_205, %c2_206, %c0_207], %403 {strides = array<i32>} : memref<2x4x4x8xbf16, #tpu.memory_space<vmem>>, vector<2x4x1x8xbf16>,
    } else {
    }
    %true_172 = arith.constant true
    %352 = arith.xori %0, %true_172 : i1
    %353 = arith.extui %352 : i1 to i32
    %c0_i32_173 = arith.constant 0 : i32
    %354 = arith.cmpi ne, %353, %c0_i32_173 : i32
    scf.if %354 {
      %393 = vector.shape_cast %349 : vector<8x8xf32> to vector<2x4x8xf32>
      %394 = arith.truncf %393 : vector<2x4x8xf32> to vector<2x4x8xbf16>
      %c0_199 = arith.constant 0 : index
      %c0_200 = arith.constant 0 : index
      %c2_201 = arith.constant 2 : index
      %c0_202 = arith.constant 0 : index
      %395 = vector.load %arg16[%c0_199, %c0_200, %c2_201, %c0_202] : memref<2x4x4x8xbf16, #tpu.memory_space<vmem>>, vector<2x4x1x8xbf16>
      %396 = vector.shape_cast %395 : vector<2x4x1x8xbf16> to vector<2x4x8xbf16>
      %397 = vector.shape_cast %394 : vector<2x4x8xbf16> to vector<2x4x1x8xbf16>
      tpu.vector_store %arg16[%c0_199, %c0_200, %c2_201, %c0_202], %397 {strides = array<i32>} : memref<2x4x4x8xbf16, #tpu.memory_space<vmem>>, vector<2x4x1x8xbf16>,
    } else {
    }
    %c0_174 = arith.constant 0 : index
    %c0_175 = arith.constant 0 : index
    %c3_176 = arith.constant 3 : index
    %c0_177 = arith.constant 0 : index
    %355 = vector.load %arg16[%c0_174, %c0_175, %c3_176, %c0_177] : memref<2x4x4x8xbf16, #tpu.memory_space<vmem>>, vector<2x4x1x8xbf16>
    %356 = vector.shape_cast %355 : vector<2x4x1x8xbf16> to vector<2x4x8xbf16>
    %357 = vector.shape_cast %356 : vector<2x4x8xbf16> to vector<8x8xbf16>
    %358 = arith.extf %357 : vector<8x8xbf16> to vector<8x8xf32>
    %c3_178 = arith.constant 3 : index
    %c0_179 = arith.constant 0 : index
    %c0_180 = arith.constant 0 : index
    %359 = vector.load %arg10[%c3_178, %c0_179, %c0_180] : memref<4x8x8xbf16, #tpu.memory_space<vmem>>, vector<1x8x8xbf16>
    %360 = vector.shape_cast %359 : vector<1x8x8xbf16> to vector<8x8xbf16>
    %cst_181 = arith.constant dense<0.000000e+00> : vector<8x8xf32>
    %361 = tpu.matmul %357, %360, %cst_181 {dimension_numbers = #tpu.dot_dimension_numbers<[1], [0], [0], [1], [0, 0, 1, 1], [], []>} : vector<8x8xbf16>, vector<8x8xbf16>, vector<8x8xf32> -> vector<8x8xf32>
    %c3_182 = arith.constant 3 : index
    %c0_183 = arith.constant 0 : index
    %c0_184 = arith.constant 0 : index
    %362 = vector.load %arg11[%c3_182, %c0_183, %c0_184] : memref<4x1x8xf32, #tpu.memory_space<vmem>>, vector<1x1x8xf32>
    %363 = vector.shape_cast %362 : vector<1x1x8xf32> to vector<1x8xf32>
    %364 = vector.broadcast %363 : vector<1x8xf32> to vector<8x8xf32>
    %365 = arith.addf %361, %364 : vector<8x8xf32>
    %cst_185 = arith.constant 5.000000e-01 : f32
    %366 = vector.broadcast %cst_185 : f32 to vector<8x8xf32>
    %367 = arith.mulf %366, %365 : vector<8x8xf32>
    %cst_186 = arith.constant 4.471500e-02 : f32
    %368 = vector.broadcast %cst_186 : f32 to vector<8x8xf32>
    %369 = arith.mulf %368, %365 : vector<8x8xf32>
    %370 = arith.mulf %369, %365 : vector<8x8xf32>
    %371 = arith.mulf %370, %365 : vector<8x8xf32>
    %372 = arith.addf %365, %371 : vector<8x8xf32>
    %cst_187 = arith.constant 0.797884583 : f32
    %373 = vector.broadcast %cst_187 : f32 to vector<8x8xf32>
    %374 = arith.mulf %373, %372 : vector<8x8xf32>
    %375 = math.tanh %374 : vector<8x8xf32>
    %cst_188 = arith.constant 1.000000e+00 : f32
    %376 = vector.broadcast %cst_188 : f32 to vector<8x8xf32>
    %377 = arith.addf %376, %375 : vector<8x8xf32>
    %378 = arith.mulf %367, %377 : vector<8x8xf32>
    %379 = arith.truncf %378 : vector<8x8xf32> to vector<8x8xbf16>
    %c3_189 = arith.constant 3 : index
    %c0_190 = arith.constant 0 : index
    %c0_191 = arith.constant 0 : index
    %380 = vector.load %arg12[%c3_189, %c0_190, %c0_191] : memref<4x8x8xbf16, #tpu.memory_space<vmem>>, vector<1x8x8xbf16>
    %381 = vector.shape_cast %380 : vector<1x8x8xbf16> to vector<8x8xbf16>
    %cst_192 = arith.constant dense<0.000000e+00> : vector<8x8xf32>
    %382 = tpu.matmul %379, %381, %cst_192 {dimension_numbers = #tpu.dot_dimension_numbers<[1], [0], [0], [1], [0, 0, 1, 1], [], []>} : vector<8x8xbf16>, vector<8x8xbf16>, vector<8x8xf32> -> vector<8x8xf32>
    %c3_193 = arith.constant 3 : index
    %c0_194 = arith.constant 0 : index
    %c0_195 = arith.constant 0 : index
    %383 = vector.load %arg13[%c3_193, %c0_194, %c0_195] : memref<4x1x8xf32, #tpu.memory_space<vmem>>, vector<1x1x8xf32>
    %384 = vector.shape_cast %383 : vector<1x1x8xf32> to vector<1x8xf32>
    %385 = vector.broadcast %384 : vector<1x8xf32> to vector<8x8xf32>
    %386 = arith.addf %382, %385 : vector<8x8xf32>
    %387 = arith.addf %386, %358 : vector<8x8xf32>
    %388 = arith.extui %0 : i1 to i32
    %c0_i32_196 = arith.constant 0 : i32
    %389 = arith.cmpi ne, %388, %c0_i32_196 : i32
    scf.if %389 {
      %393 = arith.truncf %387 : vector<8x8xf32> to vector<8x8xbf16>
      %c0_199 = arith.constant 0 : index
      %c0_200 = arith.constant 0 : index
      %394 = vector.load %arg14[%c0_199, %c0_200] : memref<8x8xbf16, #tpu.memory_space<vmem>>, vector<8x8xbf16>
      %cst_201 = arith.constant dense<0.000000e+00> : vector<8x8xf32>
      %395 = tpu.matmul %393, %394, %cst_201 {dimension_numbers = #tpu.dot_dimension_numbers<[1], [0], [0], [1], [0, 0, 1, 1], [], []>} : vector<8x8xbf16>, vector<8x8xbf16>, vector<8x8xf32> -> vector<8x8xf32>
      %c0_202 = arith.constant 0 : index
      %c0_203 = arith.constant 0 : index
      %396 = vector.load %arg15[%c0_202, %c0_203] : memref<1x8xf32, #tpu.memory_space<vmem>>, vector<1x8xf32>
      %397 = vector.broadcast %396 : vector<1x8xf32> to vector<8x8xf32>
      %398 = arith.addf %395, %397 : vector<8x8xf32>
      %399 = vector.shape_cast %398 : vector<8x8xf32> to vector<2x4x8xf32>
      %400 = arith.truncf %399 : vector<2x4x8xf32> to vector<2x4x8xbf16>
      %c0_204 = arith.constant 0 : index
      %c0_205 = arith.constant 0 : index
      %c3_206 = arith.constant 3 : index
      %c0_207 = arith.constant 0 : index
      %401 = vector.load %arg16[%c0_204, %c0_205, %c3_206, %c0_207] : memref<2x4x4x8xbf16, #tpu.memory_space<vmem>>, vector<2x4x1x8xbf16>
      %402 = vector.shape_cast %401 : vector<2x4x1x8xbf16> to vector<2x4x8xbf16>
      %403 = vector.shape_cast %400 : vector<2x4x8xbf16> to vector<2x4x1x8xbf16>
      tpu.vector_store %arg16[%c0_204, %c0_205, %c3_206, %c0_207], %403 {strides = array<i32>} : memref<2x4x4x8xbf16, #tpu.memory_space<vmem>>, vector<2x4x1x8xbf16>,
    } else {
    }
    %true_197 = arith.constant true
    %390 = arith.xori %0, %true_197 : i1
    %391 = arith.extui %390 : i1 to i32
    %c0_i32_198 = arith.constant 0 : i32
    %392 = arith.cmpi ne, %391, %c0_i32_198 : i32
    scf.if %392 {
      %393 = vector.shape_cast %387 : vector<8x8xf32> to vector<2x4x8xf32>
      %394 = arith.truncf %393 : vector<2x4x8xf32> to vector<2x4x8xbf16>
      %c0_199 = arith.constant 0 : index
      %c0_200 = arith.constant 0 : index
      %c3_201 = arith.constant 3 : index
      %c0_202 = arith.constant 0 : index
      %395 = vector.load %arg16[%c0_199, %c0_200, %c3_201, %c0_202] : memref<2x4x4x8xbf16, #tpu.memory_space<vmem>>, vector<2x4x1x8xbf16>
      %396 = vector.shape_cast %395 : vector<2x4x1x8xbf16> to vector<2x4x8xbf16>
      %397 = vector.shape_cast %394 : vector<2x4x8xbf16> to vector<2x4x1x8xbf16>
      tpu.vector_store %arg16[%c0_199, %c0_200, %c3_201, %c0_202], %397 {strides = array<i32>} : memref<2x4x4x8xbf16, #tpu.memory_space<vmem>>, vector<2x4x1x8xbf16>,
    } else {
    }
    return
  }
  func.func @transform_0(%arg0: i32) -> (i32, i32, i32, i32) {
    %c0_i32 = arith.constant 0 : i32
    %c0_i32_0 = arith.constant 0 : i32
    %c0_i32_1 = arith.constant 0 : i32
    %c0_i32_2 = arith.constant 0 : i32
    return %arg0, %c0_i32, %c0_i32_0, %c0_i32_1 : i32, i32, i32, i32
  }
  func.func @transform_1(%arg0: i32) -> (i32, i32, i32) {
    %c0_i32 = arith.constant 0 : i32
    %c0_i32_0 = arith.constant 0 : i32
    %c0_i32_1 = arith.constant 0 : i32
    %c0_i32_2 = arith.constant 0 : i32
    return %c0_i32, %c0_i32_0, %c0_i32_1 : i32, i32, i32
  }
  func.func @transform_2(%arg0: i32) -> (i32, i32) {
    %c0_i32 = arith.constant 0 : i32
    %c0_i32_0 = arith.constant 0 : i32
    %c0_i32_1 = arith.constant 0 : i32
    return %c0_i32, %c0_i32_0 : i32, i32
  }
  func.func @transform_3(%arg0: i32) -> (i32, i32, i32) {
    %c0_i32 = arith.constant 0 : i32
    %c0_i32_0 = arith.constant 0 : i32
    %c0_i32_1 = arith.constant 0 : i32
    %c0_i32_2 = arith.constant 0 : i32
    return %c0_i32, %c0_i32_0, %c0_i32_1 : i32, i32, i32
  }
  func.func @transform_4(%arg0: i32) -> (i32, i32) {
    %c0_i32 = arith.constant 0 : i32
    %c0_i32_0 = arith.constant 0 : i32
    %c0_i32_1 = arith.constant 0 : i32
    return %c0_i32, %c0_i32_0 : i32, i32
  }
  func.func @transform_5(%arg0: i32) -> (i32, i32, i32) {
    %c0_i32 = arith.constant 0 : i32
    %c0_i32_0 = arith.constant 0 : i32
    %c0_i32_1 = arith.constant 0 : i32
    %c0_i32_2 = arith.constant 0 : i32
    return %c0_i32, %c0_i32_0, %c0_i32_1 : i32, i32, i32
  }
  func.func @transform_6(%arg0: i32) -> (i32, i32, i32) {
    %c0_i32 = arith.constant 0 : i32
    %c0_i32_0 = arith.constant 0 : i32
    %c0_i32_1 = arith.constant 0 : i32
    %c0_i32_2 = arith.constant 0 : i32
    return %c0_i32, %c0_i32_0, %c0_i32_1 : i32, i32, i32
  }
  func.func @transform_7(%arg0: i32) -> (i32, i32, i32) {
    %c0_i32 = arith.constant 0 : i32
    %c0_i32_0 = arith.constant 0 : i32
    %c0_i32_1 = arith.constant 0 : i32
    %c0_i32_2 = arith.constant 0 : i32
    return %c0_i32, %c0_i32_0, %c0_i32_1 : i32, i32, i32
  }
  func.func @transform_8(%arg0: i32) -> (i32, i32, i32) {
    %c0_i32 = arith.constant 0 : i32
    %c0_i32_0 = arith.constant 0 : i32
    %c0_i32_1 = arith.constant 0 : i32
    %c0_i32_2 = arith.constant 0 : i32
    return %c0_i32, %c0_i32_0, %c0_i32_1 : i32, i32, i32
  }
  func.func @transform_9(%arg0: i32) -> (i32, i32, i32) {
    %c0_i32 = arith.constant 0 : i32
    %c0_i32_0 = arith.constant 0 : i32
    %c0_i32_1 = arith.constant 0 : i32
    %c0_i32_2 = arith.constant 0 : i32
    return %c0_i32, %c0_i32_0, %c0_i32_1 : i32, i32, i32
  }
  func.func @transform_10(%arg0: i32) -> (i32, i32, i32) {
    %c0_i32 = arith.constant 0 : i32
    %c0_i32_0 = arith.constant 0 : i32
    %c0_i32_1 = arith.constant 0 : i32
    %c0_i32_2 = arith.constant 0 : i32
    return %c0_i32, %c0_i32_0, %c0_i32_1 : i32, i32, i32
  }
  func.func @transform_11(%arg0: i32) -> (i32, i32, i32) {
    %c0_i32 = arith.constant 0 : i32
    %c0_i32_0 = arith.constant 0 : i32
    %c0_i32_1 = arith.constant 0 : i32
    %c0_i32_2 = arith.constant 0 : i32
    return %c0_i32, %c0_i32_0, %c0_i32_1 : i32, i32, i32
  }
  func.func @transform_12(%arg0: i32) -> (i32, i32, i32) {
    %c0_i32 = arith.constant 0 : i32
    %c0_i32_0 = arith.constant 0 : i32
    %c0_i32_1 = arith.constant 0 : i32
    %c0_i32_2 = arith.constant 0 : i32
    return %c0_i32, %c0_i32_0, %c0_i32_1 : i32, i32, i32
  }
  func.func @transform_13(%arg0: i32) -> (i32, i32) {
    %c0_i32 = arith.constant 0 : i32
    %c0_i32_0 = arith.constant 0 : i32
    %c0_i32_1 = arith.constant 0 : i32
    return %c0_i32, %c0_i32_0 : i32, i32
  }
  func.func @transform_14(%arg0: i32) -> (i32, i32) {
    %c0_i32 = arith.constant 0 : i32
    %c0_i32_0 = arith.constant 0 : i32
    %c0_i32_1 = arith.constant 0 : i32
    return %c0_i32, %c0_i32_0 : i32, i32
  }
  func.func @transform_15(%arg0: i32) -> (i32, i32, i32, i32) {
    %c0_i32 = arith.constant 0 : i32
    %c0_i32_0 = arith.constant 0 : i32
    %c0_i32_1 = arith.constant 0 : i32
    %c0_i32_2 = arith.constant 0 : i32
    return %arg0, %c0_i32, %c0_i32_0, %c0_i32_1 : i32, i32, i32, i32
  }
}

module attributes {stable_mosaic.version = 11 : i64} {
  func.func @_head_kernel(%arg0: i32, %arg1: memref<8x32xbf16, #tpu.memory_space<vmem>>, %arg2: memref<32x32xbf16, #tpu.memory_space<vmem>>, %arg3: memref<1x32xf32, #tpu.memory_space<vmem>>, %arg4: memref<32x32xbf16, #tpu.memory_space<vmem>>, %arg5: memref<1x32xf32, #tpu.memory_space<vmem>>, %arg6: memref<32x32xbf16, #tpu.memory_space<vmem>>, %arg7: memref<1x32xf32, #tpu.memory_space<vmem>>, %arg8: memref<32x16xbf16, #tpu.memory_space<vmem>>, %arg9: memref<1x16xf32, #tpu.memory_space<vmem>>, %arg10: memref<8x16xf32, #tpu.memory_space<vmem>>) attributes {dimension_semantics = [#tpu.dimension_semantics<parallel>], iteration_bounds = array<i64: 1>, scalar_prefetch = 0 : i64, scratch_operands = 0 : i64, tpu.core_type = #tpu.core_type<tc>, window_params = [{transform_indices = @transform_0, window_bounds = array<i64: 8, 32>}, {pipeline_mode = #tpu.pipeline_mode<synchronous>, transform_indices = @transform_1, window_bounds = array<i64: 32, 32>}, {pipeline_mode = #tpu.pipeline_mode<synchronous>, transform_indices = @transform_2, window_bounds = array<i64: 1, 32>}, {pipeline_mode = #tpu.pipeline_mode<synchronous>, transform_indices = @transform_3, window_bounds = array<i64: 32, 32>}, {pipeline_mode = #tpu.pipeline_mode<synchronous>, transform_indices = @transform_4, window_bounds = array<i64: 1, 32>}, {pipeline_mode = #tpu.pipeline_mode<synchronous>, transform_indices = @transform_5, window_bounds = array<i64: 32, 32>}, {pipeline_mode = #tpu.pipeline_mode<synchronous>, transform_indices = @transform_6, window_bounds = array<i64: 1, 32>}, {pipeline_mode = #tpu.pipeline_mode<synchronous>, transform_indices = @transform_7, window_bounds = array<i64: 32, 16>}, {pipeline_mode = #tpu.pipeline_mode<synchronous>, transform_indices = @transform_8, window_bounds = array<i64: 1, 16>}, {transform_indices = @transform_9, window_bounds = array<i64: 8, 16>}]} {
    %c0 = arith.constant 0 : index
    %c0_0 = arith.constant 0 : index
    %0 = vector.load %arg1[%c0, %c0_0] : memref<8x32xbf16, #tpu.memory_space<vmem>>, vector<8x32xbf16>
    %1 = arith.extf %0 : vector<8x32xbf16> to vector<8x32xf32>
    %2 = arith.truncf %1 : vector<8x32xf32> to vector<8x32xbf16>
    %c0_1 = arith.constant 0 : index
    %c0_2 = arith.constant 0 : index
    %3 = vector.load %arg2[%c0_1, %c0_2] : memref<32x32xbf16, #tpu.memory_space<vmem>>, vector<32x32xbf16>
    %cst = arith.constant dense<0.000000e+00> : vector<8x32xf32>
    %4 = tpu.matmul %2, %3, %cst {dimension_numbers = #tpu.dot_dimension_numbers<[1], [0], [0], [1], [0, 0, 1, 1], [], []>} : vector<8x32xbf16>, vector<32x32xbf16>, vector<8x32xf32> -> vector<8x32xf32>
    %c0_3 = arith.constant 0 : index
    %c0_4 = arith.constant 0 : index
    %5 = vector.load %arg3[%c0_3, %c0_4] : memref<1x32xf32, #tpu.memory_space<vmem>>, vector<1x32xf32>
    %6 = vector.broadcast %5 : vector<1x32xf32> to vector<8x32xf32>
    %7 = arith.addf %4, %6 : vector<8x32xf32>
    %cst_5 = arith.constant 5.000000e-01 : f32
    %8 = vector.broadcast %cst_5 : f32 to vector<8x32xf32>
    %9 = arith.mulf %8, %7 : vector<8x32xf32>
    %cst_6 = arith.constant 4.471500e-02 : f32
    %10 = vector.broadcast %cst_6 : f32 to vector<8x32xf32>
    %11 = arith.mulf %10, %7 : vector<8x32xf32>
    %12 = arith.mulf %11, %7 : vector<8x32xf32>
    %13 = arith.mulf %12, %7 : vector<8x32xf32>
    %14 = arith.addf %7, %13 : vector<8x32xf32>
    %cst_7 = arith.constant 0.797884583 : f32
    %15 = vector.broadcast %cst_7 : f32 to vector<8x32xf32>
    %16 = arith.mulf %15, %14 : vector<8x32xf32>
    %17 = math.tanh %16 : vector<8x32xf32>
    %cst_8 = arith.constant 1.000000e+00 : f32
    %18 = vector.broadcast %cst_8 : f32 to vector<8x32xf32>
    %19 = arith.addf %18, %17 : vector<8x32xf32>
    %20 = arith.mulf %9, %19 : vector<8x32xf32>
    %21 = arith.addf %20, %1 : vector<8x32xf32>
    %22 = arith.truncf %21 : vector<8x32xf32> to vector<8x32xbf16>
    %c0_9 = arith.constant 0 : index
    %c0_10 = arith.constant 0 : index
    %23 = vector.load %arg4[%c0_9, %c0_10] : memref<32x32xbf16, #tpu.memory_space<vmem>>, vector<32x32xbf16>
    %cst_11 = arith.constant dense<0.000000e+00> : vector<8x32xf32>
    %24 = tpu.matmul %22, %23, %cst_11 {dimension_numbers = #tpu.dot_dimension_numbers<[1], [0], [0], [1], [0, 0, 1, 1], [], []>} : vector<8x32xbf16>, vector<32x32xbf16>, vector<8x32xf32> -> vector<8x32xf32>
    %c0_12 = arith.constant 0 : index
    %c0_13 = arith.constant 0 : index
    %25 = vector.load %arg5[%c0_12, %c0_13] : memref<1x32xf32, #tpu.memory_space<vmem>>, vector<1x32xf32>
    %26 = vector.broadcast %25 : vector<1x32xf32> to vector<8x32xf32>
    %27 = arith.addf %24, %26 : vector<8x32xf32>
    %cst_14 = arith.constant 5.000000e-01 : f32
    %28 = vector.broadcast %cst_14 : f32 to vector<8x32xf32>
    %29 = arith.mulf %28, %27 : vector<8x32xf32>
    %cst_15 = arith.constant 4.471500e-02 : f32
    %30 = vector.broadcast %cst_15 : f32 to vector<8x32xf32>
    %31 = arith.mulf %30, %27 : vector<8x32xf32>
    %32 = arith.mulf %31, %27 : vector<8x32xf32>
    %33 = arith.mulf %32, %27 : vector<8x32xf32>
    %34 = arith.addf %27, %33 : vector<8x32xf32>
    %cst_16 = arith.constant 0.797884583 : f32
    %35 = vector.broadcast %cst_16 : f32 to vector<8x32xf32>
    %36 = arith.mulf %35, %34 : vector<8x32xf32>
    %37 = math.tanh %36 : vector<8x32xf32>
    %cst_17 = arith.constant 1.000000e+00 : f32
    %38 = vector.broadcast %cst_17 : f32 to vector<8x32xf32>
    %39 = arith.addf %38, %37 : vector<8x32xf32>
    %40 = arith.mulf %29, %39 : vector<8x32xf32>
    %41 = arith.addf %40, %21 : vector<8x32xf32>
    %42 = arith.truncf %41 : vector<8x32xf32> to vector<8x32xbf16>
    %c0_18 = arith.constant 0 : index
    %c0_19 = arith.constant 0 : index
    %43 = vector.load %arg6[%c0_18, %c0_19] : memref<32x32xbf16, #tpu.memory_space<vmem>>, vector<32x32xbf16>
    %cst_20 = arith.constant dense<0.000000e+00> : vector<8x32xf32>
    %44 = tpu.matmul %42, %43, %cst_20 {dimension_numbers = #tpu.dot_dimension_numbers<[1], [0], [0], [1], [0, 0, 1, 1], [], []>} : vector<8x32xbf16>, vector<32x32xbf16>, vector<8x32xf32> -> vector<8x32xf32>
    %c0_21 = arith.constant 0 : index
    %c0_22 = arith.constant 0 : index
    %45 = vector.load %arg7[%c0_21, %c0_22] : memref<1x32xf32, #tpu.memory_space<vmem>>, vector<1x32xf32>
    %46 = vector.broadcast %45 : vector<1x32xf32> to vector<8x32xf32>
    %47 = arith.addf %44, %46 : vector<8x32xf32>
    %cst_23 = arith.constant 5.000000e-01 : f32
    %48 = vector.broadcast %cst_23 : f32 to vector<8x32xf32>
    %49 = arith.mulf %48, %47 : vector<8x32xf32>
    %cst_24 = arith.constant 4.471500e-02 : f32
    %50 = vector.broadcast %cst_24 : f32 to vector<8x32xf32>
    %51 = arith.mulf %50, %47 : vector<8x32xf32>
    %52 = arith.mulf %51, %47 : vector<8x32xf32>
    %53 = arith.mulf %52, %47 : vector<8x32xf32>
    %54 = arith.addf %47, %53 : vector<8x32xf32>
    %cst_25 = arith.constant 0.797884583 : f32
    %55 = vector.broadcast %cst_25 : f32 to vector<8x32xf32>
    %56 = arith.mulf %55, %54 : vector<8x32xf32>
    %57 = math.tanh %56 : vector<8x32xf32>
    %cst_26 = arith.constant 1.000000e+00 : f32
    %58 = vector.broadcast %cst_26 : f32 to vector<8x32xf32>
    %59 = arith.addf %58, %57 : vector<8x32xf32>
    %60 = arith.mulf %49, %59 : vector<8x32xf32>
    %61 = arith.addf %60, %41 : vector<8x32xf32>
    %62 = arith.truncf %61 : vector<8x32xf32> to vector<8x32xbf16>
    %c0_27 = arith.constant 0 : index
    %c0_28 = arith.constant 0 : index
    %63 = vector.load %arg8[%c0_27, %c0_28] : memref<32x16xbf16, #tpu.memory_space<vmem>>, vector<32x16xbf16>
    %cst_29 = arith.constant dense<0.000000e+00> : vector<8x16xf32>
    %64 = tpu.matmul %62, %63, %cst_29 {dimension_numbers = #tpu.dot_dimension_numbers<[1], [0], [0], [1], [0, 0, 1, 1], [], []>} : vector<8x32xbf16>, vector<32x16xbf16>, vector<8x16xf32> -> vector<8x16xf32>
    %c0_30 = arith.constant 0 : index
    %c0_31 = arith.constant 0 : index
    %65 = vector.load %arg9[%c0_30, %c0_31] : memref<1x16xf32, #tpu.memory_space<vmem>>, vector<1x16xf32>
    %66 = vector.broadcast %65 : vector<1x16xf32> to vector<8x16xf32>
    %67 = arith.addf %64, %66 : vector<8x16xf32>
    %c0_32 = arith.constant 0 : index
    %c0_33 = arith.constant 0 : index
    %68 = vector.load %arg10[%c0_32, %c0_33] : memref<8x16xf32, #tpu.memory_space<vmem>>, vector<8x16xf32>
    tpu.vector_store %arg10[%c0_32, %c0_33], %67 {strides = array<i32>} : memref<8x16xf32, #tpu.memory_space<vmem>>, vector<8x16xf32>,
    return
  }
  func.func @transform_0(%arg0: i32) -> (i32, i32) {
    %c0_i32 = arith.constant 0 : i32
    %c0_i32_0 = arith.constant 0 : i32
    return %arg0, %c0_i32 : i32, i32
  }
  func.func @transform_1(%arg0: i32) -> (i32, i32) {
    %c0_i32 = arith.constant 0 : i32
    %c0_i32_0 = arith.constant 0 : i32
    %c0_i32_1 = arith.constant 0 : i32
    return %c0_i32, %c0_i32_0 : i32, i32
  }
  func.func @transform_2(%arg0: i32) -> (i32, i32) {
    %c0_i32 = arith.constant 0 : i32
    %c0_i32_0 = arith.constant 0 : i32
    %c0_i32_1 = arith.constant 0 : i32
    return %c0_i32, %c0_i32_0 : i32, i32
  }
  func.func @transform_3(%arg0: i32) -> (i32, i32) {
    %c0_i32 = arith.constant 0 : i32
    %c0_i32_0 = arith.constant 0 : i32
    %c0_i32_1 = arith.constant 0 : i32
    return %c0_i32, %c0_i32_0 : i32, i32
  }
  func.func @transform_4(%arg0: i32) -> (i32, i32) {
    %c0_i32 = arith.constant 0 : i32
    %c0_i32_0 = arith.constant 0 : i32
    %c0_i32_1 = arith.constant 0 : i32
    return %c0_i32, %c0_i32_0 : i32, i32
  }
  func.func @transform_5(%arg0: i32) -> (i32, i32) {
    %c0_i32 = arith.constant 0 : i32
    %c0_i32_0 = arith.constant 0 : i32
    %c0_i32_1 = arith.constant 0 : i32
    return %c0_i32, %c0_i32_0 : i32, i32
  }
  func.func @transform_6(%arg0: i32) -> (i32, i32) {
    %c0_i32 = arith.constant 0 : i32
    %c0_i32_0 = arith.constant 0 : i32
    %c0_i32_1 = arith.constant 0 : i32
    return %c0_i32, %c0_i32_0 : i32, i32
  }
  func.func @transform_7(%arg0: i32) -> (i32, i32) {
    %c0_i32 = arith.constant 0 : i32
    %c0_i32_0 = arith.constant 0 : i32
    %c0_i32_1 = arith.constant 0 : i32
    return %c0_i32, %c0_i32_0 : i32, i32
  }
  func.func @transform_8(%arg0: i32) -> (i32, i32) {
    %c0_i32 = arith.constant 0 : i32
    %c0_i32_0 = arith.constant 0 : i32
    %c0_i32_1 = arith.constant 0 : i32
    return %c0_i32, %c0_i32_0 : i32, i32
  }
  func.func @transform_9(%arg0: i32) -> (i32, i32) {
    %c0_i32 = arith.constant 0 : i32
    %c0_i32_0 = arith.constant 0 : i32
    return %arg0, %c0_i32 : i32, i32
  }
}

module attributes {stable_mosaic.version = 11 : i64} {
  func.func @_final_kernel(%arg0: i32, %arg1: memref<8x32xbf16, #tpu.memory_space<vmem>>, %arg2: memref<8x32xf32, #tpu.memory_space<vmem>>, %arg3: memref<8x2xf32, #tpu.memory_space<vmem>>, %arg4: memref<32x16xbf16, #tpu.memory_space<vmem>>, %arg5: memref<1x16xf32, #tpu.memory_space<vmem>>, %arg6: memref<32x16xbf16, #tpu.memory_space<vmem>>, %arg7: memref<1x16xf32, #tpu.memory_space<vmem>>, %arg8: memref<16x8xbf16, #tpu.memory_space<vmem>>, %arg9: memref<1x8xf32, #tpu.memory_space<vmem>>, %arg10: memref<8x8xf32, #tpu.memory_space<vmem>>) attributes {dimension_semantics = [#tpu.dimension_semantics<parallel>], iteration_bounds = array<i64: 1>, scalar_prefetch = 0 : i64, scratch_operands = 0 : i64, tpu.core_type = #tpu.core_type<tc>, window_params = [{transform_indices = @transform_0, window_bounds = array<i64: 8, 32>}, {transform_indices = @transform_1, window_bounds = array<i64: 8, 32>}, {transform_indices = @transform_2, window_bounds = array<i64: 8, 2>}, {pipeline_mode = #tpu.pipeline_mode<synchronous>, transform_indices = @transform_3, window_bounds = array<i64: 32, 16>}, {pipeline_mode = #tpu.pipeline_mode<synchronous>, transform_indices = @transform_4, window_bounds = array<i64: 1, 16>}, {pipeline_mode = #tpu.pipeline_mode<synchronous>, transform_indices = @transform_5, window_bounds = array<i64: 32, 16>}, {pipeline_mode = #tpu.pipeline_mode<synchronous>, transform_indices = @transform_6, window_bounds = array<i64: 1, 16>}, {pipeline_mode = #tpu.pipeline_mode<synchronous>, transform_indices = @transform_7, window_bounds = array<i64: 16, 8>}, {pipeline_mode = #tpu.pipeline_mode<synchronous>, transform_indices = @transform_8, window_bounds = array<i64: 1, 8>}, {transform_indices = @transform_9, window_bounds = array<i64: 8, 8>}]} {
    %c0 = arith.constant 0 : index
    %c0_0 = arith.constant 0 : index
    %0 = vector.load %arg6[%c0, %c0_0] : memref<32x16xbf16, #tpu.memory_space<vmem>>, vector<32x16xbf16>
    %c0_1 = arith.constant 0 : index
    %c0_2 = arith.constant 0 : index
    %1 = vector.load %arg7[%c0_1, %c0_2] : memref<1x16xf32, #tpu.memory_space<vmem>>, vector<1x16xf32>
    %c0_3 = arith.constant 0 : index
    %c0_4 = arith.constant 0 : index
    %2 = vector.load %arg1[%c0_3, %c0_4] : memref<8x32xbf16, #tpu.memory_space<vmem>>, vector<8x32xbf16>
    %c0_5 = arith.constant 0 : index
    %c0_6 = arith.constant 0 : index
    %3 = vector.load %arg4[%c0_5, %c0_6] : memref<32x16xbf16, #tpu.memory_space<vmem>>, vector<32x16xbf16>
    %cst = arith.constant dense<0.000000e+00> : vector<8x16xf32>
    %4 = tpu.matmul %2, %3, %cst {dimension_numbers = #tpu.dot_dimension_numbers<[1], [0], [0], [1], [0, 0, 1, 1], [], []>} : vector<8x32xbf16>, vector<32x16xbf16>, vector<8x16xf32> -> vector<8x16xf32>
    %c0_7 = arith.constant 0 : index
    %c0_8 = arith.constant 0 : index
    %5 = vector.load %arg5[%c0_7, %c0_8] : memref<1x16xf32, #tpu.memory_space<vmem>>, vector<1x16xf32>
    %6 = vector.broadcast %5 : vector<1x16xf32> to vector<8x16xf32>
    %7 = arith.addf %4, %6 : vector<8x16xf32>
    %c0_9 = arith.constant 0 : index
    %c0_10 = arith.constant 0 : index
    %8 = vector.load %arg2[%c0_9, %c0_10] : memref<8x32xf32, #tpu.memory_space<vmem>>, vector<8x32xf32>
    %9 = arith.truncf %8 : vector<8x32xf32> to vector<8x32xbf16>
    %cst_11 = arith.constant dense<0.000000e+00> : vector<8x16xf32>
    %10 = tpu.matmul %9, %0, %cst_11 {dimension_numbers = #tpu.dot_dimension_numbers<[1], [0], [0], [1], [0, 0, 1, 1], [], []>} : vector<8x32xbf16>, vector<32x16xbf16>, vector<8x16xf32> -> vector<8x16xf32>
    %11 = vector.broadcast %1 : vector<1x16xf32> to vector<8x16xf32>
    %12 = arith.addf %10, %11 : vector<8x16xf32>
    %13 = tpu.concatenate %7, %12 in 1 : vector<8x16xf32>, vector<8x16xf32> -> vector<8x32xf32>
    %14 = arith.truncf %13 : vector<8x32xf32> to vector<8x32xbf16>
    %cst_12 = arith.constant dense<0.000000e+00> : vector<8x16xf32>
    %15 = tpu.matmul %14, %0, %cst_12 {dimension_numbers = #tpu.dot_dimension_numbers<[1], [0], [0], [1], [0, 0, 1, 1], [], []>} : vector<8x32xbf16>, vector<32x16xbf16>, vector<8x16xf32> -> vector<8x16xf32>
    %16 = vector.broadcast %1 : vector<1x16xf32> to vector<8x16xf32>
    %17 = arith.addf %15, %16 : vector<8x16xf32>
    %18 = arith.truncf %17 : vector<8x16xf32> to vector<8x16xbf16>
    %c0_13 = arith.constant 0 : index
    %c0_14 = arith.constant 0 : index
    %19 = vector.load %arg8[%c0_13, %c0_14] : memref<16x8xbf16, #tpu.memory_space<vmem>>, vector<16x8xbf16>
    %cst_15 = arith.constant dense<0.000000e+00> : vector<8x8xf32>
    %20 = tpu.matmul %18, %19, %cst_15 {dimension_numbers = #tpu.dot_dimension_numbers<[1], [0], [0], [1], [0, 0, 1, 1], [], []>} : vector<8x16xbf16>, vector<16x8xbf16>, vector<8x8xf32> -> vector<8x8xf32>
    %c0_16 = arith.constant 0 : index
    %c0_17 = arith.constant 0 : index
    %21 = vector.load %arg9[%c0_16, %c0_17] : memref<1x8xf32, #tpu.memory_space<vmem>>, vector<1x8xf32>
    %22 = vector.broadcast %21 : vector<1x8xf32> to vector<8x8xf32>
    %23 = arith.addf %20, %22 : vector<8x8xf32>
    %c0_18 = arith.constant 0 : index
    %c0_19 = arith.constant 0 : index
    %24 = vector.load %arg3[%c0_18, %c0_19] : memref<8x2xf32, #tpu.memory_space<vmem>>, vector<8x1xf32>
    %c0_20 = arith.constant 0 : index
    %c1 = arith.constant 1 : index
    %25 = vector.load %arg3[%c0_20, %c1] : memref<8x2xf32, #tpu.memory_space<vmem>>, vector<8x1xf32>
    %cst_21 = arith.constant 9.99999974E-5 : f32
    %26 = vector.broadcast %cst_21 : f32 to vector<8x1xf32>
    %27 = arith.addf %25, %26 : vector<8x1xf32>
    %28 = vector.broadcast %27 : vector<8x1xf32> to vector<8x8xf32>
    %29 = arith.mulf %23, %28 : vector<8x8xf32>
    %30 = vector.broadcast %24 : vector<8x1xf32> to vector<8x8xf32>
    %31 = arith.addf %29, %30 : vector<8x8xf32>
    %c0_22 = arith.constant 0 : index
    %c0_23 = arith.constant 0 : index
    %32 = vector.load %arg10[%c0_22, %c0_23] : memref<8x8xf32, #tpu.memory_space<vmem>>, vector<8x8xf32>
    tpu.vector_store %arg10[%c0_22, %c0_23], %31 {strides = array<i32>} : memref<8x8xf32, #tpu.memory_space<vmem>>, vector<8x8xf32>,
    return
  }
  func.func @transform_0(%arg0: i32) -> (i32, i32) {
    %c0_i32 = arith.constant 0 : i32
    %c0_i32_0 = arith.constant 0 : i32
    return %arg0, %c0_i32 : i32, i32
  }
  func.func @transform_1(%arg0: i32) -> (i32, i32) {
    %c0_i32 = arith.constant 0 : i32
    %c0_i32_0 = arith.constant 0 : i32
    return %arg0, %c0_i32 : i32, i32
  }
  func.func @transform_2(%arg0: i32) -> (i32, i32) {
    %c0_i32 = arith.constant 0 : i32
    %c0_i32_0 = arith.constant 0 : i32
    return %arg0, %c0_i32 : i32, i32
  }
  func.func @transform_3(%arg0: i32) -> (i32, i32) {
    %c0_i32 = arith.constant 0 : i32
    %c0_i32_0 = arith.constant 0 : i32
    %c0_i32_1 = arith.constant 0 : i32
    return %c0_i32, %c0_i32_0 : i32, i32
  }
  func.func @transform_4(%arg0: i32) -> (i32, i32) {
    %c0_i32 = arith.constant 0 : i32
    %c0_i32_0 = arith.constant 0 : i32
    %c0_i32_1 = arith.constant 0 : i32
    return %c0_i32, %c0_i32_0 : i32, i32
  }
  func.func @transform_5(%arg0: i32) -> (i32, i32) {
    %c0_i32 = arith.constant 0 : i32
    %c0_i32_0 = arith.constant 0 : i32
    %c0_i32_1 = arith.constant 0 : i32
    return %c0_i32, %c0_i32_0 : i32, i32
  }
  func.func @transform_6(%arg0: i32) -> (i32, i32) {
    %c0_i32 = arith.constant 0 : i32
    %c0_i32_0 = arith.constant 0 : i32
    %c0_i32_1 = arith.constant 0 : i32
    return %c0_i32, %c0_i32_0 : i32, i32
  }
  func.func @transform_7(%arg0: i32) -> (i32, i32) {
    %c0_i32 = arith.constant 0 : i32
    %c0_i32_0 = arith.constant 0 : i32
    %c0_i32_1 = arith.constant 0 : i32
    return %c0_i32, %c0_i32_0 : i32, i32
  }
  func.func @transform_8(%arg0: i32) -> (i32, i32) {
    %c0_i32 = arith.constant 0 : i32
    %c0_i32_0 = arith.constant 0 : i32
    %c0_i32_1 = arith.constant 0 : i32
    return %c0_i32, %c0_i32_0 : i32, i32
  }
  func.func @transform_9(%arg0: i32) -> (i32, i32) {
    %c0_i32 = arith.constant 0 : i32
    %c0_i32_0 = arith.constant 0 : i32
    return %arg0, %c0_i32 : i32, i32
  }
}

</mosaic_0001>

<bundles_post_ra>
// kernel: model_forward.5
= control target key start
LH: loop header
LB: loop body
LE: loop exit
PB: predicated region body
PF: predicated region fallthrough
CT: control target
= control target key end

     0   :  { %vm11_vm0 = vcmask 130048   ;;  %vm34_vm1 = vcmask 7168   ;;  %vm36_vm3 = vcmask 15360   ;;  %s77_s0 = inlined_call_operand.vmem [shape: f32[8,16], index: 0, kind: input, shape index: {}]   ;;  %s78_s2 = inlined_call_operand.vmem [shape: f32[8,2], index: 2, kind: output, shape index: {1}]   ;;  %s79_s1 = inlined_call_operand.vmem [shape: f32[8,16], index: 1, kind: output, shape index: {0}]  }
   0x1   :  { %v10_v0 = vld [vmem:[%s77_s0] sm:$0xff] }
   0x2   :  { %v12_v1 = vsel %vm11_vm0, %v10_v0, 0.0 }
   0x3   :  { %13 = vadd.xlane.f32.xlu0 %v12_v1 }
  0x8c   :  { %v14_v2 = vpop.xlane.xlu0 %13 }
  0x8d   :  { %v16_v3 = vmul.f32 0.0625, %v14_v2 }
  0x8f   :  { %v17_v4 = vsub.f32 %v10_v0, %v16_v3 }
  0x91   :  { %v18_v5 = vmul.f32 %v17_v4, %v17_v4 }
  0x93   :  { %v19_v6 = vsel %vm11_vm0, %v18_v5, 0.0 }
  0x94   :  { %20 = vadd.xlane.f32.xlu0 %v19_v6 }
 0x11d   :  { %v21_v7 = vpop.xlane.xlu0 %20 }
 0x11e   :  { %v22_v8 = vmul.f32 0.06666667, %v21_v7 }
 0x120   :  { %46 = vrsqrt.f32 %v22_v8  ;;  %vm25_vm2 = vcmp.eq.f32.partialorder %v22_v8, inf  ;;  %v28_v11 = vand.u32 2147483648, %v22_v8  ;;  %vm27_vm4 = vcmp.eq.f32.partialorder %v22_v8, 0.0 }
 0x12d   :  { %v47_v9 = vpop.eup %46 }
 0x12e   :  { %v24_v10 = vmul.f32 %v47_v9, %v22_v8 }
 0x130   :  { %v26_v12 = vsel %vm25_vm2, %v22_v8, %v24_v10 }
 0x131   :  { %v29_v13 = vsel %vm27_vm4, %v28_v11, %v26_v12 }
 0x132   :  { %v30_v14 = vadd.f32 0.0001, %v29_v13  ;;  %v35_v15 = vsel %vm34_vm1, %v16_v3, %v29_v13 }
 0x133   :  { %37 = vst.msk [vmem:[%s78_s2] sm:$0xff] %vm36_vm3, %v35_v15 }
 0x134   :  { %48 = vrcp.f32 %v30_v14 }
 0x141   :  { %v49_v16 = vpop.eup %48 }
 0x142   :  { %v32_v17 = vmul.f32 %v49_v16, %v17_v4 }
 0x144   :  { %33 = vst.msk [vmem:[%s79_s1] sm:$0xff] %vm11_vm0, %v32_v17 }

// kernel: model_forward.6
= control target key start
LH: loop header
LB: loop body
LE: loop exit
PB: predicated region body
PF: predicated region fallthrough
CT: control target
= control target key end

     0   :  { %s708_s21 = smov 0   ;;  %s710_s22 = smov 0   ;;  %s781_s0 = inlined_call_operand.vmem [shape: f32[8,4,4], index: 0, kind: input, shape index: {}]   ;;  %s782_s1 = inlined_call_operand.vmem [shape: f32[8,4,8], index: 1, kind: input, shape index: {}]   ;;  %s783_s2 = inlined_call_operand.vmem [shape: bf16[4,8], index: 2, kind: input, shape index: {}]   ;;  %s784_s3 = inlined_call_operand.vmem [shape: bf16[8,8], index: 3, kind: input, shape index: {}]   ;;  %s785_s4 = inlined_call_operand.vmem [shape: f32[4,8], index: 4, kind: input, shape index: {}]   ;;  %s786_s5 = inlined_call_operand.vmem [shape: f32[4,8], index: 5, kind: input, shape index: {}]   ;;  %s787_s6 = inlined_call_operand.vmem [shape: bf16[2,8,4,8], index: 6, kind: output, shape index: {}]  }
   0x1   :  { %s712_s23 = smov 0  }
   0x2 LB: > { %s721_s24 = sadd.s32 4294967295, %s669_s23   ;;  %s723_s25 = sadd.s32 1, %s669_s23   ;;  %s669_s23 = sphi %s712_s23, %s791_s23   ;;  %s665_s22 = sphi %s710_s22, %s790_s22   ;;  %s661_s21 = sphi %s708_s21, %s789_s21  }
   0x3   : > { %s156_s26 = ssub.s32 %s669_s23, %s723_s25  ;;  %s159_s27 = sadd.s32 1, %s665_s22 }
   0x4   : > { %p157_p0 = scmp.eq.s32.totalorder %s156_s26, 0  ;;  %p169_p1 = scmp.ne.s32.totalorder %s665_s22, %s661_s21 }
   0x5   : > { %p170_p2 = scmp.eq.s32.totalorder %s721_s24, 1  ;;  %p583_p3 = scmp.ge.s32.totalorder %s669_s23, 1 }
   0x6   : > { %s731_s28 = scalar_select %p157_p0, %s665_s22, %s159_s27  }
   0x7   : > { %p733_p4 = por %p170_p2, %p169_p1  ;;  %p224_p5 = scmp.lt.s32.totalorder %s669_s23, 3 }
   0x9   : > { %p225_p6 = pnand %p583_p3, %p224_p5 }
   0xa   : > { %s585_s10 = sshll.u32 (!%p225_p6), %s721_s24, 2  ;;  %s255_s18 = sand.u32 (!%p225_p6), 1, %s661_s21  }
   0xb   : > { %228 = sbr.rel (%p225_p6) target bundleno = 236 (0xec), region = 44  ;;  %p259_p7 = scmp.lt.s32.totalorder (!%p225_p6), %s585_s10, 7 }
   0xc   : > { %s584_s23 = sshll.u32 (!%p225_p6), %s255_s18, 4 }
   0xd   : > { %s257_s21 = scalar_lea.vmem (!%p225_p6), [#allocation2], %s584_s23 }
  0x10   : > { %v298_v0 = vld [vmem:[%s783_s2] sm:$0x3]  ;;  %vm303_vm0 = vcmask 1041408   ;;  %v671_v2 = vmov 0.0   ;;  %vm364_vm1 = vcmask 1043456   ;;  %vm672_vm2 = vmmov 0  }
  0x11   : > { %v359_v1 = vld [vmem:[%s784_s3] sm:$0xf]  ;;  %605 = vmatprep.subr.bf16.mxu0 %v671_v2  ;;  %611 = vmatprep.subr.bf16.mxu1 %v671_v2  ;;  %v305_v3 = vsel %vm303_vm0, %v298_v0, 0  ;;  %s793_s10 = smov (!%p259_p7, %s585_s10), 7  ;;  %vm299_vm3 = vcmask 31744   ;;  %vm360_vm4 = vcmask 64512  }
  0x12   : > { %606 = vmatpush3.bf16.msra.mxu0 %v305_v3  ;;  %v366_v4 = vsel %vm364_vm1, %v359_v1, 0  ;;  %607 = vmatprep.mubr.msk.bf16.mxu0 %vm672_vm2, %v671_v2  ;;  %s586_s11 = sshll.u32 %s793_s10, 2  ;;  %v354_v11 = vld [vmem:[%s785_s4] sm:$0xf]  ;;  %vm424_vm5 = vcmask 58368   ;;  %s600_s30 = sshll.u32 (%p733_p4), %s721_s24, 3 }
  0x13   : > { %612 = vmatpush3.bf16.msra.mxu1 %v366_v4  ;;  %613 = vmatprep.mubr.msk.bf16.mxu1 %vm672_vm2, %v671_v2  ;;  %s262_s14 = scalar_lea.vmem %s781_s0, %s586_s11  ;;  %s268_s17 = scalar_lea.vmem %s782_s1, %s586_s11  ;;  %v415_v13 = vld [vmem:[%s786_s5] sm:$0xf] }
  0x14   : > { %v643_v5 = vld [vmem:[%s262_s14] sm:$0xff]   ;;  %v644_v6 = vld [vmem:[%s262_s14 + $0x8] sm:$0xff]   ;;  %s447_s9 = scalar_lea.vmem (%p733_p4), %s787_s6, %s600_s30 }
  0x15   : > { %v284_v7 = vpack.c.bf16 %v644_v6, %v643_v5  ;;  %v645_v8 = vld [vmem:[%s268_s17] sm:$0xff]   ;;  %v646_v9 = vld [vmem:[%s268_s17 + $0x8] sm:$0xff]  }
  0x16   : > { %v297_v10 = vpack.c.bf16 %v646_v9, %v645_v8 }
  0x17   : > { %608 = vmatmul.mubr.msk.bf16.vlgmr.msra.gmra.mxu0 %vm299_vm3, %v284_v7 }
  0x18   : > { %614 = vmatmul.mubr.msk.bf16.vlgmr.msra.gmra.mxu1 %vm360_vm4, %v297_v10 }
  0xd7   : > { %v341_v12 = vpop.f32.mrf.mxu0 }
  0xd8   : > { %v350_v14 = vcombine.high %v341_v12, %v341_v12  ;;  %v355_v15 = vadd.f32 %v354_v11, %v341_v12  ;;  %v402_v16 = vpop.f32.mrf.mxu1 }
  0xd9   : > { %v609_v17 = vpop.f32.mrf.mxu0  ;;  %v411_v20 = vcombine.high %v402_v16, %v402_v16  ;;  %v416_v21 = vadd.f32 %v415_v13, %v402_v16 }
  0xda   : > { %v356_v18 = vadd.f32 %v354_v11, %v350_v14  ;;  %v420_v19 = vpack.c.bf16 %v355_v15, %v355_v15  ;;  %v615_v22 = vpop.f32.mrf.mxu1 }
  0xdb   : > { %v344_v23 = vpop.f32.mrf.mxu0  ;;  %v417_v25 = vadd.f32 %v415_v13, %v411_v20  ;;  %v429_v26 = vpack.c.bf16 %v416_v21, %v416_v21 }
  0xdc   : > { %v421_v24 = vpack.c.bf16 %v356_v18, %v356_v18  ;;  %425 = vst.msk [vmem:[%s257_s21] sm:$0x3] %vm424_vm5, %v420_v19  ;;  %v351_v27 = vcombine.high %v344_v23, %v344_v23  ;;  %v357_v28 = vadd.f32 %v354_v11, %v344_v23  ;;  %v405_v29 = vpop.f32.mrf.mxu1 }
  0xdd   : > { %v610_v30 = vpop.f32.mrf.mxu0  ;;  %v430_v31 = vpack.c.bf16 %v417_v25, %v417_v25  ;;  %591 = vst.msk [vmem:[%s257_s21 + $0x8] sm:$0x3] %vm424_vm5, %v429_v26  ;;  %v412_v33 = vcombine.high %v405_v29, %v405_v29  ;;  %v418_v34 = vadd.f32 %v415_v13, %v405_v29 }
  0xde   : > { %426 = vst.msk [vmem:[%s257_s21 + $0x2] sm:$0x3] %vm424_vm5, %v421_v24  ;;  %v358_v32 = vadd.f32 %v354_v11, %v351_v27  ;;  %v422_v35 = vpack.c.bf16 %v357_v28, %v357_v28  ;;  %v616_v36 = vpop.f32.mrf.mxu1 }
  0xdf   : > { %592 = vst.msk [vmem:[%s257_s21 + $0xa] sm:$0x3] %vm424_vm5, %v430_v31  ;;  %v419_v38 = vadd.f32 %v415_v13, %v412_v33  ;;  %v431_v39 = vpack.c.bf16 %v418_v34, %v418_v34  ;;  %444 = sbr.rel (!%p733_p4) target bundleno = 236 (0xec), region = 48 }
  0xe0   : > { %v423_v37 = vpack.c.bf16 %v358_v32, %v358_v32  ;;  %427 = vst.msk [vmem:[%s257_s21 + $0x4] sm:$0x3] %vm424_vm5, %v422_v35 }
  0xe1   : > { %v432_v40 = vpack.c.bf16 %v419_v38, %v419_v38  ;;  %593 = vst.msk [vmem:[%s257_s21 + $0xc] sm:$0x3] %vm424_vm5, %v431_v39 }
  0xe2   : > { %428 = vst.msk [vmem:[%s257_s21 + $0x6] sm:$0x3] %vm424_vm5, %v423_v37 }
  0xe3   : > { %594 = vst.msk [vmem:[%s257_s21 + $0xe] sm:$0x3] %vm424_vm5, %v432_v40 }
  0xe9   : > { %v464_v41 = vld [vmem:[%s257_s21] sm:$0xff]  }
  0xea   : > { %v472_v42 = vld [vmem:[%s257_s21 + $0x8] sm:$0xff]   ;;  %465 = vst [vmem:[%s447_s9] sm:$0xff] %v464_v41  }
  0xeb   : > { %473 = vst [vmem:[%s447_s9 + $0x10] sm:$0xff] %v472_v42  }
  0xec PF: > { %p13_p8 = scmp.ge.s32.totalorder %s723_s25, 4   ;;  %s789_s21 = smov %s665_s22 }
  0xed   : > { %s790_s22 = smov %s731_s28  ;;  %s791_s23 = smov %s723_s25 }
  0xee   :  { %15 = sbr.rel (!%p13_p8) target bundleno = 2 (0x2), region = 119 }

// kernel: model_forward.8
= control target key start
LH: loop header
LB: loop body
LE: loop exit
PB: predicated region body
PF: predicated region fallthrough
CT: control target
= control target key end

     0   :  { %v415_v0 = vmov 0.0   ;;  %vm416_vm0 = vmmov 0   ;;  %vm58_vm1 = vcmask 261120   ;;  %vm333_vm2 = vcmask 130048   ;;  %s529_s1 = inlined_call_operand.vmem [shape: bf16[32,32], index: 1, kind: input, shape index: {}]   ;;  %s530_s0 = inlined_call_operand.vmem [shape: bf16[8,32], index: 0, kind: input, shape index: {}]   ;;  %s531_s3 = inlined_call_operand.vmem [shape: bf16[32,32], index: 3, kind: input, shape index: {}]   ;;  %s532_s2 = inlined_call_operand.vmem [shape: f32[1,32], index: 2, kind: input, shape index: {}]   ;;  %s533_s5 = inlined_call_operand.vmem [shape: bf16[32,32], index: 5, kind: input, shape index: {}]   ;;  %s534_s4 = inlined_call_operand.vmem [shape: f32[1,32], index: 4, kind: input, shape index: {}]   ;;  %s535_s7 = inlined_call_operand.vmem [shape: bf16[32,16], index: 7, kind: input, shape index: {}]   ;;  %s536_s6 = inlined_call_operand.vmem [shape: f32[1,32], index: 6, kind: input, shape index: {}]   ;;  %s537_s8 = inlined_call_operand.vmem [shape: f32[1,16], index: 8, kind: input, shape index: {}]   ;;  %s538_s9 = inlined_call_operand.vmem [shape: f32[8,16], index: 9, kind: output, shape index: {}]  }
   0x1   :  { %367 = vmatprep.subr.bf16.mxu0 %v415_v0  ;;  %v401_v1 = vld [vmem:[%s529_s1 + $0x8] sm:$0xff]   ;;  %371 = vmatprep.mubr.msk.bf16.mxu0 %vm416_vm0, %v415_v0  ;;  %v402_v2 = vld [vmem:[%s529_s1] sm:$0xff]  }
   0x2   :  { %375 = vmatprep.subr.bf16.mxu1 %v415_v0  ;;  %379 = vmatprep.mubr.msk.bf16.mxu1 %vm416_vm0, %v415_v0  ;;  %v33_v3 = vld [vmem:[%s530_s0] sm:$0xf]  ;;  %v403_v4 = vld [vmem:[%s531_s3 + $0x8] sm:$0xff]  }
   0x3   :  { %368 = vmatpush3.bf16.msra.mxu0 %v401_v1  ;;  %376 = vmatpush3.bf16.msra.mxu1 %v403_v4  ;;  %v404_v5 = vld [vmem:[%s531_s3] sm:$0xff]   ;;  %v34_v18 = vunpack.c.l.bf16 %v33_v3  ;;  %v405_v24 = vld [vmem:[%s533_s5 + $0x8] sm:$0xff]  }
   0x4   :  { %369 = vmatprep.subr.bf16.mxu0 %v415_v0  ;;  %377 = vmatprep.subr.bf16.mxu1 %v415_v0  ;;  %v339_v6 = vld [vmem:[%s532_s2] ss:$0 sm:$0xff]  ;;  %v407_v43 = vld [vmem:[%s535_s7 + $0x8] sm:$0xff]  }
   0x5   :  { %v406_v25 = vld [vmem:[%s533_s5] sm:$0xff]  }
   0x6   :  { %v343_v26 = vld [vmem:[%s534_s4] ss:$0 sm:$0xff] }
   0x7   :  { %370 = vmatpush3.bf16.msra.mxu0 %v402_v2  ;;  %378 = vmatpush3.bf16.msra.mxu1 %v404_v5  ;;  %v408_v44 = vld [vmem:[%s535_s7] sm:$0xff]  }
   0x8   :  { %383 = vmatprep.subr.bf16.mxu0 %v415_v0  ;;  %391 = vmatprep.subr.bf16.mxu1 %v415_v0  ;;  %v347_v45 = vld [vmem:[%s536_s6] ss:$0 sm:$0xff] }
   0x9   :  { %v351_v62 = vld [vmem:[%s537_s8] ss:$0 sm:$0xff] }
   0xa   :  { %372 = vmatmul.mubr.msk.bf16.vlgmr.msra.gmra.mxu0 %vm58_vm1, %v33_v3 }
   0xb   :  { %387 = vmatprep.mubr.msk.bf16.mxu0 %vm416_vm0, %v415_v0  ;;  %384 = vmatpush3.bf16.msra.mxu0 %v405_v24 }
   0xc   :  { %385 = vmatprep.subr.bf16.mxu0 %v415_v0 }
   0xf   :  { %386 = vmatpush3.bf16.msra.mxu0 %v406_v25 }
  0xca   :  { %v96_v7 = vpop.f32.mrf.mxu0 }
  0xcb   :  { %v97_v8 = vadd.f32 %v339_v6, %v96_v7 }
  0xcc   :  { %v373_v9 = vpop.f32.mrf.mxu0 }
  0xcd   :  { %v103_v10 = vmul.f32 0.044715, %v97_v8  ;;  %v102_v19 = vmul.f32 0.5, %v97_v8 }
  0xce   :  { %v99_v11 = vpop.f32.mrf.mxu0 }
  0xcf   :  { %v104_v12 = vmul.f32 %v103_v10, %v97_v8 }
  0xd0   :  { %v374_v13 = vpop.f32.mrf.mxu0 }
  0xd1   :  { %v105_v14 = vmul.f32 %v104_v12, %v97_v8 }
  0xd3   :  { %v106_v15 = vadd.f32 %v105_v14, %v97_v8 }
  0xd5   :  { %v107_v16 = vmul.f32 0.7978846, %v106_v15 }
  0xd7   :  { %409 = vtanh.f32 %v107_v16 }
  0xe4   :  { %v410_v17 = vpop.eup %409 }
  0xe5   :  { %v109_v20 = vadd.f32 1.0, %v410_v17 }
  0xe7   :  { %v110_v21 = vmul.f32 %v109_v20, %v102_v19 }
  0xe9   :  { %v111_v22 = vadd.f32 %v110_v21, %v34_v18 }
  0xeb   :  { %v112_v23 = vpack.c.bf16 %v111_v22, %v111_v22 }
  0xed   :  { %380 = vmatmul.mubr.msk.bf16.vlgmr.msra.gmra.mxu1 %vm58_vm1, %v112_v23 }
  0xee   :  { %395 = vmatprep.mubr.msk.bf16.mxu1 %vm416_vm0, %v415_v0  ;;  %392 = vmatpush3.bf16.msra.mxu1 %v407_v43 }
  0xef   :  { %393 = vmatprep.subr.bf16.mxu1 %v415_v0 }
  0xf2   :  { %394 = vmatpush3.bf16.msra.mxu1 %v408_v44 }
 0x1ad   :  { %v173_v27 = vpop.f32.mrf.mxu1 }
 0x1ae   :  { %v174_v28 = vadd.f32 %v343_v26, %v173_v27 }
 0x1af   :  { %v381_v29 = vpop.f32.mrf.mxu1 }
 0x1b0   :  { %v180_v30 = vmul.f32 0.044715, %v174_v28  ;;  %v179_v38 = vmul.f32 0.5, %v174_v28 }
 0x1b1   :  { %v176_v31 = vpop.f32.mrf.mxu1 }
 0x1b2   :  { %v181_v32 = vmul.f32 %v180_v30, %v174_v28 }
 0x1b3   :  { %v382_v33 = vpop.f32.mrf.mxu1 }
 0x1b4   :  { %v182_v34 = vmul.f32 %v181_v32, %v174_v28 }
 0x1b6   :  { %v183_v35 = vadd.f32 %v182_v34, %v174_v28 }
 0x1b8   :  { %v184_v36 = vmul.f32 0.7978846, %v183_v35 }
 0x1ba   :  { %411 = vtanh.f32 %v184_v36 }
 0x1c7   :  { %v412_v37 = vpop.eup %411 }
 0x1c8   :  { %v186_v39 = vadd.f32 1.0, %v412_v37 }
 0x1ca   :  { %v187_v40 = vmul.f32 %v186_v39, %v179_v38 }
 0x1cc   :  { %v188_v41 = vadd.f32 %v187_v40, %v111_v22 }
 0x1ce   :  { %v189_v42 = vpack.c.bf16 %v188_v41, %v188_v41 }
 0x1d0   :  { %388 = vmatmul.mubr.msk.bf16.vlgmr.msra.gmra.mxu0 %vm58_vm1, %v189_v42 }
 0x290   :  { %v250_v46 = vpop.f32.mrf.mxu0 }
 0x291   :  { %v251_v47 = vadd.f32 %v347_v45, %v250_v46 }
 0x292   :  { %v389_v48 = vpop.f32.mrf.mxu0 }
 0x293   :  { %v257_v49 = vmul.f32 0.044715, %v251_v47  ;;  %v256_v57 = vmul.f32 0.5, %v251_v47 }
 0x294   :  { %v253_v50 = vpop.f32.mrf.mxu0 }
 0x295   :  { %v258_v51 = vmul.f32 %v257_v49, %v251_v47 }
 0x296   :  { %v390_v52 = vpop.f32.mrf.mxu0 }
 0x297   :  { %v259_v53 = vmul.f32 %v258_v51, %v251_v47 }
 0x299   :  { %v260_v54 = vadd.f32 %v259_v53, %v251_v47 }
 0x29b   :  { %v261_v55 = vmul.f32 0.7978846, %v260_v54 }
 0x29d   :  { %413 = vtanh.f32 %v261_v55 }
 0x2aa   :  { %v414_v56 = vpop.eup %413 }
 0x2ab   :  { %v263_v58 = vadd.f32 1.0, %v414_v56 }
 0x2ad   :  { %v264_v59 = vmul.f32 %v263_v58, %v256_v57 }
 0x2af   :  { %v265_v60 = vadd.f32 %v264_v59, %v188_v41 }
 0x2b1   :  { %v266_v61 = vpack.c.bf16 %v265_v60, %v265_v60 }
 0x2b3   :  { %396 = vmatmul.mubr.msk.bf16.vlgmr.msra.gmra.mxu1 %vm58_vm1, %v266_v61 }
 0x373   :  { %v327_v63 = vpop.f32.mrf.mxu1 }
 0x374   :  { %v328_v0 = vadd.f32 %v351_v62, %v327_v63 }
 0x375   :  { %v397_v1 = vpop.f32.mrf.mxu1 }
 0x376   :  { %334 = vst.msk [vmem:[%s538_s9] sm:$0xff] %vm333_vm2, %v328_v0 }
 0x377   :  { %v330_v2 = vpop.f32.mrf.mxu1 }
 0x379   :  { %v398_v3 = vpop.f32.mrf.mxu1 }

// kernel: model_forward.9
= control target key start
LH: loop header
LB: loop body
LE: loop exit
PB: predicated region body
PF: predicated region fallthrough
CT: control target
= control target key end

     0   :  { %v398_v1 = vmov 0.0   ;;  %vm399_vm0 = vmmov 0   ;;  %s499_s0 = inlined_call_operand.vmem [shape: bf16[8,32], index: 0, kind: input, shape index: {}]   ;;  %s500_s1 = inlined_call_operand.vmem [shape: f32[8,32], index: 1, kind: input, shape index: {}]   ;;  %s501_s2 = inlined_call_operand.vmem [shape: f32[8,2], index: 2, kind: input, shape index: {}]   ;;  %s502_s3 = inlined_call_operand.vmem [shape: bf16[32,16], index: 3, kind: input, shape index: {}]   ;;  %s503_s4 = inlined_call_operand.vmem [shape: f32[1,16], index: 4, kind: input, shape index: {}]   ;;  %s504_s5 = inlined_call_operand.vmem [shape: bf16[32,16], index: 5, kind: input, shape index: {}]   ;;  %s505_s6 = inlined_call_operand.vmem [shape: f32[1,16], index: 6, kind: input, shape index: {}]   ;;  %s506_s7 = inlined_call_operand.vmem [shape: bf16[16,8], index: 7, kind: input, shape index: {}]   ;;  %s507_s8 = inlined_call_operand.vmem [shape: f32[1,8], index: 8, kind: input, shape index: {}]   ;;  %s508_s9 = inlined_call_operand.hbm [shape: f32[8,8], index: 9, kind: output, shape index: {}]  }
   0x1   :  { %v371_v0 = vld [vmem:[%s504_s5 + $0x8] sm:$0xff]   ;;  %340 = vmatprep.subr.bf16.mxu1 %v398_v1  ;;  %v372_v2 = vld [vmem:[%s504_s5] sm:$0xff]   ;;  %332 = vmatprep.subr.bf16.mxu0 %v398_v1 }
   0x2   :  { %341 = vmatpush3.bf16.msra.mxu1 %v371_v0  ;;  %344 = vmatprep.mubr.msk.bf16.mxu1 %vm399_vm0, %v398_v1  ;;  %v107_v3 = vld [vmem:[%s500_s1] sm:$0xff]  ;;  %v373_v4 = vld [vmem:[%s502_s3 + $0x8] sm:$0xff]  }
   0x3   :  { %342 = vmatprep.subr.bf16.mxu1 %v398_v1  ;;  %336 = vmatprep.mubr.msk.bf16.mxu0 %vm399_vm0, %v398_v1  ;;  %v374_v5 = vld [vmem:[%s502_s3] sm:$0xff]   ;;  %v108_v6 = vpack.c.bf16 %v107_v3, %v107_v3 }
   0x4   :  { %333 = vmatpush3.bf16.msra.mxu0 %v373_v4 }
   0x5   :  { %14 = vsyncpa [#allocation3], 0  ;;  %vm63_vm1 = vcmask 261120   ;;  %334 = vmatprep.subr.bf16.mxu0 %v398_v1  ;;  %v39_v7 = vld [vmem:[%s499_s0] sm:$0xf]  ;;  %s400_s0 = smov 16  }
   0x6   :  { %343 = vmatpush3.bf16.msra.mxu1 %v372_v2  ;;  %v375_v8 = vld [vmem:[%s506_s7] sm:$0xff]   ;;  %vm174_vm2 = vcmask 130048   ;;  %v401_v25 = vmov 1   ;;  %v402_v27 = vmov 0   ;;  %vm293_vm3 = vcmask 64512  }
   0x7   :  { %356 = vmatprep.subr.bf16.mxu1 %v398_v1  ;;  %v313_v9 = vld [vmem:[%s505_s6] ss:$0 sm:$0xff]  ;;  %368 = vset.pattern.permute.xlu0 %v401_v25 }
   0x8   :  { %335 = vmatpush3.bf16.msra.mxu0 %v374_v5  ;;  %v309_v19 = vld [vmem:[%s503_s4] ss:$0 sm:$0xff]  ;;  %369 = vset.pattern.permute.xlu1 %v402_v27 }
   0x9   :  { %345 = vmatmul.mubr.msk.bf16.vlgmr.msra.gmra.mxu1 %vm63_vm1, %v108_v6  ;;  %348 = vmatprep.subr.bf16.mxu0 %v398_v1  ;;  %v279_v24 = vld [vmem:[%s501_s2] sm:$0xff]  ;;  %s403_s2 = smov [#allocation2]  }
   0xa   :  { %358 = vmatprep.mubr.msk.bf16.mxu1 %vm399_vm0, %v398_v1  ;;  %357 = vmatpush3.bf16.msra.mxu1 %v375_v8  ;;  %v280_v26 = vadd.f32 0.0001, %v279_v24  ;;  %v318_v34 = vld [vmem:[%s507_s8] ss:$0 sm:$0xff]  ;;  %s301_s25 = sshll.u32 %s403_s2, 4  ;;  %s302_s25 = int_to_ptr.vmem [resolvable:$true] %s301_s25 }
   0xb   :  { %337 = vmatmul.mubr.msk.bf16.vlgmr.msra.gmra.mxu0 %vm63_vm1, %v39_v7  ;;  %289 = vperm.xlu1 %369, %v279_v24   ;;  %s376_s26 = scalar_lea.vmem %s302_s25, 128  ;;  %p381_p1 = scmp.lt.s32.totalorder %s302_s25, %s302_s25 }
   0xc   :  { %349 = vmatpush3.bf16.msra.mxu0 %v371_v0  ;;  %352 = vmatprep.mubr.msk.bf16.mxu0 %vm399_vm0, %v398_v1  ;;  %p377_p0 = scmp.ne.s32.totalorder %s302_s25, %s376_s26  ;;  %p382_p2 = scmp.lt.s32.totalorder %s376_s26, %s376_s26 }
   0xd   :  { %350 = vmatprep.subr.bf16.mxu0 %v398_v1 }
   0xe   :  { %p383_p3 = por %p382_p2, %p381_p1 }
  0x10   :  { %351 = vmatpush3.bf16.msra.mxu0 %v372_v2  ;;  %p384_p4 = pnand %p383_p3, %p377_p0 }
  0x86   :  { %v290_v39 = vpop.permute.xlu1 %289 }
  0xc9   :  { %v164_v10 = vpop.f32.mrf.mxu1 }
  0xca   :  { %v165_v11 = vadd.f32 %v313_v9, %v164_v10 }
  0xcb   :  { %v346_v12 = vpop.f32.mrf.mxu1  ;;  %v101_v13 = vpop.f32.mrf.mxu0 }
  0xcc   :  { %171 = vrot.lane.b32.xlu0 %v165_v11, %s400_s0  ;;  %v102_v20 = vadd.f32 %v309_v19, %v101_v13 }
  0xcd   :  { %v167_v14 = vpop.f32.mrf.mxu1  ;;  %v338_v15 = vpop.f32.mrf.mxu0 }
  0xcf   :  { %v347_v16 = vpop.f32.mrf.mxu1  ;;  %v104_v17 = vpop.f32.mrf.mxu0 }
  0xd0   :  { %283 = vperm.xlu0 %368, %v280_v26  }
  0xd1   :  { %v339_v18 = vpop.f32.mrf.mxu0 }
  0xd4   :  { %370 = vset.pattern.permute.xlu0 %v402_v27 }
 0x13e   :  { %v172_v21 = vpop.permute.xlu0 %171 }
 0x13f   :  { %v175_v22 = vsel %vm174_vm2, %v102_v20, %v172_v21 }
 0x140   :  { %v176_v23 = vpack.c.bf16 %v175_v22, %v175_v22 }
 0x142   :  { %353 = vmatmul.mubr.msk.bf16.vlgmr.msra.gmra.mxu0 %vm63_vm1, %v176_v23 }
 0x14b   :  { %v284_v36 = vpop.permute.xlu0 %283 }
 0x202   :  { %v214_v28 = vpop.f32.mrf.mxu0 }
 0x203   :  { %v215_v29 = vadd.f32 %v313_v9, %v214_v28 }
 0x204   :  { %v354_v30 = vpop.f32.mrf.mxu0 }
 0x205   :  { %v220_v31 = vpack.c.bf16 %v215_v29, %v215_v29 }
 0x206   :  { %v217_v32 = vpop.f32.mrf.mxu0 }
 0x207   :  { %359 = vmatmul.mubr.msk.bf16.vlgmr.msra.gmra.mxu1 %vm174_vm2, %v220_v31 }
 0x208   :  { %v355_v33 = vpop.f32.mrf.mxu0 }
 0x2c7   :  { %v273_v35 = vpop.f32.mrf.mxu1 }
 0x2c8   :  { %v274_v37 = vadd.f32 %v318_v34, %v273_v35 }
 0x2c9   :  { %v360_v38 = vpop.f32.mrf.mxu1 }
 0x2ca   :  { %v286_v40 = vmul.f32 %v284_v36, %v274_v37 }
 0x2cb   :  { %v276_v41 = vpop.f32.mrf.mxu1 }
 0x2cc   :  { %v292_v42 = vadd.f32 %v290_v39, %v286_v40 }
 0x2cd   :  { %v361_v43 = vpop.f32.mrf.mxu1 }
 0x2ce   :  { %294 = vst.msk [vmem:[#allocation2] sm:$0xff] %vm293_vm3, %v292_v42 }
 0x2cf   :  { %387 = shalt.err (!%p384_p4)
}
 0x2d0   :  { %304 = dma.vmem_to_hbm [thread:$0]  %s302_s25, 128, %s508_s9, [#allocation3]  }
 0x2d1   :  { %396 = dma.done.wait [#allocation3], 128  }
 0x2d2   :  { %397 = vsyncadd [#allocation3], 4294967168 }
 0x2d3   :  { %308 = vsyncpa [#allocation3], 1 }

// kernel: model_forward.7
= control target key start
LH: loop header
LB: loop body
LE: loop exit
PB: predicated region body
PF: predicated region fallthrough
CT: control target
= control target key end

     0   :  { %s4670_s18 = smov 0   ;;  %s5878_s0 = inlined_call_operand.vmem [shape: bf16[4,4,4,8], index: 0, kind: input, shape index: {}]   ;;  %s5879_s1 = inlined_call_operand.vmem [shape: f32[4,4,8], index: 1, kind: input, shape index: {}]   ;;  %s5880_s2 = inlined_call_operand.vmem [shape: f32[4,8], index: 2, kind: input, shape index: {}]   ;;  %s5881_s3 = inlined_call_operand.vmem [shape: f32[4,4,8], index: 3, kind: input, shape index: {}]   ;;  %s5882_s4 = inlined_call_operand.vmem [shape: f32[4,8], index: 4, kind: input, shape index: {}]   ;;  %s5883_s5 = inlined_call_operand.vmem [shape: bf16[4,8,8], index: 5, kind: input, shape index: {}]   ;;  %s5884_s6 = inlined_call_operand.vmem [shape: f32[4,1,8], index: 6, kind: input, shape index: {}]   ;;  %s5885_s7 = inlined_call_operand.vmem [shape: bf16[4,8,8], index: 7, kind: input, shape index: {}]   ;;  %s5886_s8 = inlined_call_operand.vmem [shape: f32[4,1,8], index: 8, kind: input, shape index: {}]   ;;  %s5887_s9 = inlined_call_operand.vmem [shape: bf16[4,8,8], index: 9, kind: input, shape index: {}]   ;;  %s5888_s10 = inlined_call_operand.vmem [shape: f32[4,1,8], index: 10, kind: input, shape index: {}]   ;;  %s5889_s11 = inlined_call_operand.vmem [shape: bf16[4,8,8], index: 11, kind: input, shape index: {}]   ;;  %s5890_s12 = inlined_call_operand.vmem [shape: f32[4,1,8], index: 12, kind: input, shape index: {}]   ;;  %s5891_s13 = inlined_call_operand.vmem [shape: bf16[8,8], index: 13, kind: input, shape index: {}]   ;;  %s5892_s14 = inlined_call_operand.vmem [shape: f32[1,8], index: 14, kind: input, shape index: {}]   ;;  %s5893_s15 = inlined_call_operand.vmem [shape: bf16[4,4,4,8], index: 15, kind: output, shape index: {}]  }
   0x1 LB: > { %s4676_s19 = sadd.s32 4294967295, %s4561_s18   ;;  %p4207_p0 = scmp.ge.s32.totalorder %s4561_s18, 1  ;;  %s4561_s18 = sphi %s4670_s18, %s25_s18  }
   0x2   : > { %p439_p1 = scmp.lt.s32.totalorder %s4561_s18, 3 }
   0x4   : > { %p440_p2 = pnand %p4207_p0, %p439_p1 }
   0x5   : > { %s4208_s22 = sshll.u32 (!%p440_p2), %s4676_s19, 1  ;;  %p4252_p4 = scmp.lt.s32.totalorder (!%p440_p2), %s4676_s19, 1 }
   0x6   : > { %443 = sbr.rel (%p440_p2) target bundleno = 3295 (0xcdf), region = 80  ;;  %p490_p3 = scmp.lt.s32.totalorder (!%p440_p2), %s4208_s22, 3 }
   0xb   : > { %v1000_v0 = vld [vmem:[%s5883_s5] sm:$0xf]  ;;  %vm1012_vm0 = vcmask 1043456   ;;  %v526_v1 = vlaneseq  ;;  %v4563_v2 = vmov 0.0   ;;  %vm4564_vm1 = vmmov 0   ;;  %s5911_s22 = smov (!%p490_p3, %s4208_s22), 3 }
   0xc   : > { %4368 = vmatprep.subr.bf16.mxu0 %v4563_v2  ;;  %v1014_v3 = vsel %vm1012_vm0, %v1000_v0, 0  ;;  %4370 = vmatprep.mubr.msk.bf16.mxu0 %vm4564_vm1, %v4563_v2  ;;  %s4326_s23 = sshll.u32 %s5911_s22, 3  ;;  %v4728_v16 = vld [vmem:[%s5879_s1] sm:$0xf]  ;;  %v4733_v17 = vld [vmem:[%s5879_s1 + $0x4] sm:$0xf] }
   0xd   : > { %4369 = vmatpush3.bf16.msra.mxu0 %v1014_v3  ;;  %4374 = vmatprep.subr.bf16.mxu1 %v4563_v2  ;;  %v4692_v4 = vshrl.u32 %v526_v1, 7  ;;  %s4702_s26 = scalar_lea.vmem %s5878_s0, %s4326_s23  ;;  %v4744_v21 = vld [vmem:[%s5879_s1 + $0x8] sm:$0xf]  ;;  %v4749_v22 = vld [vmem:[%s5879_s1 + $0xc] sm:$0xf]  ;;  %vm1008_vm2 = vcmask 64512   ;;  %s5130_s16 = scalar_lea.vmem %s5893_s15, %s4326_s23 }
   0xe   : > { %4380 = vmatprep.subr.bf16.mxu0 %v4563_v2  ;;  %4376 = vmatprep.mubr.msk.bf16.mxu1 %vm4564_vm1, %v4563_v2  ;;  %v505_v7 = vld [vmem:[%s4702_s26] sm:$0x3]  ;;  %v509_v8 = vld [vmem:[%s4702_s26 + $0x8] sm:$0x3]  ;;  %v506_v13 = vld [vmem:[%s4702_s26 + $0x2] sm:$0x3] }
   0xf   : > { %v4705_v5 = vsub.s32 0, %v4692_v4  ;;  %v4708_v6 = vsub.s32 1, %v4692_v4  ;;  %v4713_v9 = vsub.s32 2, %v4692_v4  ;;  %v4716_v10 = vsub.s32 3, %v4692_v4  ;;  %v510_v14 = vld [vmem:[%s4702_s26 + $0xa] sm:$0x3] }
  0x10   : > { %v4718_v11 = vunpack.c.l.bf16 %v505_v7  ;;  %v4720_v12 = vunpack.c.l.bf16 %v509_v8  ;;  %v507_v15 = vld [vmem:[%s4702_s26 + $0x4] sm:$0x3]  ;;  %v4735_v18 = vunpack.c.l.bf16 %v506_v13  ;;  %v4737_v19 = vunpack.c.l.bf16 %v510_v14  ;;  %v511_v51 = vld [vmem:[%s4702_s26 + $0xc] sm:$0x3]  ;;  %v4793_v52 = vld [vmem:[%s5880_s2] sm:$0xf] }
  0x11   : > { %v4739_v20 = vunpack.c.l.bf16 %v507_v15  ;;  %v4803_v63 = vunpack.c.l.bf16 %v511_v51  ;;  %vm1126_vm3 = vcmask 58368   ;;  %vm1634_vm4 = vcmask 1041409  }
  0x12   : > { %v529_v23 = vrot.slane %v4718_v11, %v4705_v5  ;;  %v545_v24 = vrot.slane %v4720_v12, %v4705_v5  ;;  %v569_v25 = vrot.slane %v4718_v11, %v4708_v6  ;;  %v585_v26 = vrot.slane %v4720_v12, %v4708_v6 }
  0x13   : > { %v617_v27 = vrot.slane %v4718_v11, %v4713_v9  ;;  %v633_v28 = vrot.slane %v4720_v12, %v4713_v9  ;;  %v665_v29 = vrot.slane %v4718_v11, %v4716_v10  ;;  %v681_v30 = vrot.slane %v4720_v12, %v4716_v10 }
  0x14   : > { %v558_v31 = vmul.f32 %v529_v23, %v4728_v16  ;;  %v562_v32 = vmul.f32 %v545_v24, %v4728_v16  ;;  %v598_v33 = vmul.f32 %v569_v25, %v4733_v17  ;;  %v602_v34 = vmul.f32 %v585_v26, %v4733_v17 }
  0x15   : > { %v646_v35 = vmul.f32 %v617_v27, %v4744_v21  ;;  %v650_v36 = vmul.f32 %v633_v28, %v4744_v21  ;;  %v694_v37 = vmul.f32 %v665_v29, %v4749_v22  ;;  %v698_v38 = vmul.f32 %v681_v30, %v4749_v22 }
  0x16   : > { %v606_v39 = vadd.f32 %v598_v33, %v558_v31  ;;  %v610_v40 = vadd.f32 %v602_v34, %v562_v32  ;;  %v533_v41 = vrot.slane %v4735_v18, %v4705_v5  ;;  %v549_v42 = vrot.slane %v4737_v19, %v4705_v5 }
  0x17   : > { %v573_v43 = vrot.slane %v4735_v18, %v4708_v6  ;;  %v589_v44 = vrot.slane %v4737_v19, %v4708_v6  ;;  %v621_v45 = vrot.slane %v4735_v18, %v4713_v9  ;;  %v637_v46 = vrot.slane %v4737_v19, %v4713_v9 }
  0x18   : > { %v654_v47 = vadd.f32 %v646_v35, %v606_v39  ;;  %v658_v48 = vadd.f32 %v650_v36, %v610_v40  ;;  %v559_v49 = vmul.f32 %v533_v41, %v4728_v16  ;;  %v563_v50 = vmul.f32 %v549_v42, %v4728_v16 }
  0x19   : > { %v599_v53 = vmul.f32 %v573_v43, %v4733_v17  ;;  %v603_v54 = vmul.f32 %v589_v44, %v4733_v17  ;;  %v647_v55 = vmul.f32 %v621_v45, %v4744_v21  ;;  %v651_v56 = vmul.f32 %v637_v46, %v4744_v21 }
  0x1a   : > { %v702_v57 = vadd.f32 %v694_v37, %v654_v47  ;;  %v706_v58 = vadd.f32 %v698_v38, %v658_v48  ;;  %v669_v59 = vrot.slane %v4735_v18, %v4716_v10  ;;  %v685_v60 = vrot.slane %v4737_v19, %v4716_v10 }
  0x1b   : > { %v607_v61 = vadd.f32 %v599_v53, %v559_v49  ;;  %v611_v62 = vadd.f32 %v603_v54, %v563_v50  ;;  %v537_v0 = vrot.slane %v4739_v20, %v4705_v5  ;;  %v553_v15 = vrot.slane %v4803_v63, %v4705_v5  ;;  %v508_v53 = vld [vmem:[%s4702_s26 + $0x6] sm:$0x3] }
  0x1c   : > { %v4808_v1 = vadd.f32 %v702_v57, %v4793_v52  ;;  %v4811_v3 = vadd.f32 %v706_v58, %v4793_v52  ;;  %v695_v7 = vmul.f32 %v669_v59, %v4749_v22  ;;  %v699_v8 = vmul.f32 %v685_v60, %v4749_v22 }
  0x1d   : > { %v655_v13 = vadd.f32 %v647_v55, %v607_v61  ;;  %v659_v14 = vadd.f32 %v651_v56, %v611_v62  ;;  %v560_v25 = vmul.f32 %v537_v0, %v4728_v16  ;;  %v564_v28 = vmul.f32 %v553_v15, %v4728_v16  ;;  %v512_v62 = vld [vmem:[%s4702_s26 + $0xe] sm:$0x3] }
  0x1e   : > { %v726_v23 = vmul.f32 0.044715, %v4808_v1  ;;  %v730_v24 = vmul.f32 0.044715, %v4811_v3  ;;  %v577_v29 = vrot.slane %v4739_v20, %v4708_v6  ;;  %v593_v32 = vrot.slane %v4803_v63, %v4708_v6 }
  0x1f   : > { %v703_v26 = vadd.f32 %v695_v7, %v655_v13  ;;  %v707_v27 = vadd.f32 %v699_v8, %v659_v14  ;;  %v625_v33 = vrot.slane %v4739_v20, %v4713_v9  ;;  %v641_v37 = vrot.slane %v4803_v63, %v4713_v9 }
  0x20   : > { %v734_v30 = vmul.f32 %v726_v23, %v4808_v1  ;;  %v738_v31 = vmul.f32 %v730_v24, %v4811_v3  ;;  %v600_v36 = vmul.f32 %v577_v29, %v4733_v17  ;;  %v604_v40 = vmul.f32 %v593_v32, %v4733_v17 }
  0x21   : > { %v4830_v34 = vadd.f32 %v703_v26, %v4793_v52  ;;  %v4833_v35 = vadd.f32 %v707_v27, %v4793_v52  ;;  %v648_v41 = vmul.f32 %v625_v33, %v4744_v21  ;;  %v652_v50 = vmul.f32 %v641_v37, %v4744_v21 }
  0x22   : > { %v742_v38 = vmul.f32 %v734_v30, %v4808_v1  ;;  %v746_v39 = vmul.f32 %v738_v31, %v4811_v3  ;;  %v608_v46 = vadd.f32 %v600_v36, %v560_v25  ;;  %v612_v47 = vadd.f32 %v604_v40, %v564_v28 }
  0x23   : > { %v727_v42 = vmul.f32 0.044715, %v4830_v34  ;;  %v731_v43 = vmul.f32 0.044715, %v4833_v35  ;;  %v673_v51 = vrot.slane %v4739_v20, %v4716_v10  ;;  %v689_v57 = vrot.slane %v4803_v63, %v4716_v10 }
  0x24   : > { %v750_v44 = vadd.f32 %v742_v38, %v4808_v1  ;;  %v754_v45 = vadd.f32 %v746_v39, %v4811_v3  ;;  %v656_v56 = vadd.f32 %v648_v41, %v608_v46  ;;  %v660_v60 = vadd.f32 %v652_v50, %v612_v47 }
  0x25   : > { %v735_v48 = vmul.f32 %v727_v42, %v4830_v34  ;;  %v739_v49 = vmul.f32 %v731_v43, %v4833_v35  ;;  %v696_v61 = vmul.f32 %v673_v51, %v4749_v22  ;;  %v700_v0 = vmul.f32 %v689_v57, %v4749_v22 }
  0x26   : > { %v758_v54 = vmul.f32 0.7978846, %v750_v44  ;;  %v762_v55 = vmul.f32 0.7978846, %v754_v45  ;;  %v4859_v7 = vunpack.c.l.bf16 %v508_v53  ;;  %v4863_v23 = vunpack.c.l.bf16 %v512_v62 }
  0x27   : > { %v743_v58 = vmul.f32 %v735_v48, %v4830_v34  ;;  %v747_v59 = vmul.f32 %v739_v49, %v4833_v35  ;;  %v704_v14 = vadd.f32 %v696_v61, %v656_v56  ;;  %v708_v15 = vadd.f32 %v700_v0, %v660_v60 }
  0x28   : > { %4523 = vtanh.f32 %v758_v54  ;;  %v541_v24 = vrot.slane %v4859_v7, %v4705_v5  ;;  %v581_v25 = vrot.slane %v4859_v7, %v4708_v6  ;;  %v629_v29 = vrot.slane %v4859_v7, %v4713_v9 }
  0x29   : > { %4525 = vtanh.f32 %v762_v55  ;;  %v751_v8 = vadd.f32 %v743_v58, %v4830_v34  ;;  %v755_v13 = vadd.f32 %v747_v59, %v4833_v35  ;;  %v4870_v28 = vadd.f32 %v704_v14, %v4793_v52 }
  0x2a   : > { %v4875_v30 = vadd.f32 %v708_v15, %v4793_v52  ;;  %v557_v31 = vrot.slane %v4863_v23, %v4705_v5  ;;  %v561_v32 = vmul.f32 %v541_v24, %v4728_v16  ;;  %v597_v33 = vrot.slane %v4863_v23, %v4708_v6  ;;  %v4914_v15 = vld [vmem:[%s5881_s3] sm:$0xf]  ;;  %v4924_v24 = vld [vmem:[%s5881_s3 + $0x8] sm:$0xf] }
  0x2b   : > { %v759_v26 = vmul.f32 0.7978846, %v751_v8  ;;  %v763_v27 = vmul.f32 0.7978846, %v755_v13  ;;  %v728_v36 = vmul.f32 0.044715, %v4870_v28  ;;  %v601_v37 = vmul.f32 %v581_v25, %v4733_v17 }
  0x2c   : > { %v732_v38 = vmul.f32 0.044715, %v4875_v30  ;;  %v565_v39 = vmul.f32 %v557_v31, %v4728_v16  ;;  %v605_v41 = vmul.f32 %v597_v33, %v4733_v17  ;;  %v645_v43 = vrot.slane %v4863_v23, %v4713_v9  ;;  %v4932_v31 = vld [vmem:[%s5881_s3 + $0xc] sm:$0xf] }
  0x2d   : > { %4527 = vtanh.f32 %v759_v26  ;;  %v736_v40 = vmul.f32 %v728_v36, %v4870_v28  ;;  %v609_v42 = vadd.f32 %v601_v37, %v561_v32  ;;  %v649_v45 = vmul.f32 %v629_v29, %v4744_v21 }
  0x2e   : > { %4529 = vtanh.f32 %v763_v27  ;;  %v740_v44 = vmul.f32 %v732_v38, %v4875_v30  ;;  %v677_v46 = vrot.slane %v4859_v7, %v4716_v10  ;;  %v693_v47 = vrot.slane %v4863_v23, %v4716_v10 }
  0x2f   : > { %v744_v16 = vmul.f32 %v736_v40, %v4870_v28  ;;  %v613_v48 = vadd.f32 %v605_v41, %v565_v39  ;;  %v653_v49 = vmul.f32 %v645_v43, %v4744_v21  ;;  %v657_v50 = vadd.f32 %v649_v45, %v609_v42 }
  0x30   : > { %v748_v17 = vmul.f32 %v740_v44, %v4875_v30  ;;  %v697_v51 = vmul.f32 %v677_v46, %v4749_v22  ;;  %v701_v53 = vmul.f32 %v693_v47, %v4749_v22  ;;  %v718_v56 = vmul.f32 0.5, %v4808_v1 }
  0x31   : > { %v752_v54 = vadd.f32 %v744_v16, %v4870_v28  ;;  %v661_v55 = vadd.f32 %v653_v49, %v613_v48  ;;  %v722_v60 = vmul.f32 0.5, %v4811_v3  ;;  %v4919_v3 = vld [vmem:[%s5881_s3 + $0x4] sm:$0xf]  ;;  %v723_v45 = vmul.f32 0.5, %v4833_v35 }
  0x32   : > { %v756_v57 = vadd.f32 %v748_v17, %v4875_v30  ;;  %v705_v58 = vadd.f32 %v697_v51, %v657_v50  ;;  %vm1637_vm5 = vcmask 1042434   ;;  %vm1640_vm6 = vcmask 1043459  }
  0x33   : > { %v760_v61 = vmul.f32 0.7978846, %v752_v54  ;;  %v709_v21 = vadd.f32 %v701_v53, %v661_v55  ;;  %vm1643_vm7 = vcmask 1044484   ;;  %vm1646_vm8 = vcmask 1045509  }
  0x34   : > { %v764_v8 = vmul.f32 0.7978846, %v756_v57  ;;  %v4906_v13 = vadd.f32 %v705_v58, %v4793_v52  ;;  %v720_v58 = vmul.f32 0.5, %v4870_v28  ;;  %vm1649_vm9 = vcmask 1046534  }
  0x35   : > { %v4524_v59 = vpop.eup %4523  ;;  %4531 = vtanh.f32 %v760_v61  ;;  %v4909_v14 = vadd.f32 %v709_v21, %v4793_v52  ;;  %v719_v52 = vmul.f32 0.5, %v4830_v34  ;;  %v724_v61 = vmul.f32 0.5, %v4875_v30 }
  0x36   : > { %v4526_v62 = vpop.eup %4525  ;;  %v774_v0 = vadd.f32 1.0, %v4524_v59  ;;  %4533 = vtanh.f32 %v764_v8  ;;  %v729_v26 = vmul.f32 0.044715, %v4906_v13  ;;  %v4957_v59 = vld [vmem:[%s5882_s4] sm:$0xf]  ;;  %vm1652_vm10 = vcmask 1047559  }
  0x37   : > { %v778_v22 = vadd.f32 1.0, %v4526_v62  ;;  %v733_v27 = vmul.f32 0.044715, %v4909_v14 }
  0x38   : > { %v782_v1 = vmul.f32 %v774_v0, %v718_v56  ;;  %v737_v51 = vmul.f32 %v729_v26, %v4906_v13 }
  0x39   : > { %v786_v25 = vmul.f32 %v778_v22, %v722_v60  ;;  %v741_v55 = vmul.f32 %v733_v27, %v4909_v14 }
  0x3a   : > { %v4528_v29 = vpop.eup %4527  ;;  %v798_v32 = vrot.slane %v782_v1, %v4705_v5  ;;  %v838_v33 = vrot.slane %v782_v1, %v4708_v6  ;;  %v886_v36 = vrot.slane %v782_v1, %v4713_v9  ;;  %v934_v37 = vrot.slane %v782_v1, %v4716_v10 }
  0x3b   : > { %v4530_v38 = vpop.eup %4529  ;;  %v814_v34 = vrot.slane %v786_v25, %v4705_v5  ;;  %v854_v39 = vrot.slane %v786_v25, %v4708_v6  ;;  %v902_v40 = vrot.slane %v786_v25, %v4713_v9  ;;  %v950_v41 = vrot.slane %v786_v25, %v4716_v10 }
  0x3c   : > { %v827_v42 = vmul.f32 %v798_v32, %v4914_v15  ;;  %v867_v43 = vmul.f32 %v838_v33, %v4919_v3  ;;  %v915_v44 = vmul.f32 %v886_v36, %v4924_v24  ;;  %v963_v48 = vmul.f32 %v934_v37, %v4932_v31 }
  0x3d   : > { %v831_v46 = vmul.f32 %v814_v34, %v4914_v15  ;;  %v871_v47 = vmul.f32 %v854_v39, %v4919_v3  ;;  %v919_v16 = vmul.f32 %v902_v40, %v4924_v24  ;;  %v775_v17 = vadd.f32 1.0, %v4528_v29 }
  0x3e   : > { %v875_v49 = vadd.f32 %v867_v43, %v827_v42  ;;  %v779_v50 = vadd.f32 1.0, %v4530_v38  ;;  %v967_v54 = vmul.f32 %v950_v41, %v4932_v31  ;;  %v745_v21 = vmul.f32 %v737_v51, %v4906_v13 }
  0x3f   : > { %v879_v53 = vadd.f32 %v871_v47, %v831_v46  ;;  %v783_v35 = vmul.f32 %v775_v17, %v719_v52  ;;  %v749_v62 = vmul.f32 %v741_v55, %v4909_v14 }
  0x40   : > { %v923_v56 = vadd.f32 %v915_v44, %v875_v49  ;;  %v787_v57 = vmul.f32 %v779_v50, %v723_v45  ;;  %v4218_v45 = vld [vmem:[%s5883_s5 + $0x4] sm:$0xf] }
  0x41   : > { %v927_v60 = vadd.f32 %v919_v16, %v879_v53  ;;  %v802_v8 = vrot.slane %v783_v35, %v4705_v5  ;;  %v842_v28 = vrot.slane %v783_v35, %v4708_v6  ;;  %v890_v52 = vrot.slane %v783_v35, %v4713_v9 }
  0x42   : > { %v971_v0 = vadd.f32 %v963_v48, %v923_v56  ;;  %v818_v22 = vrot.slane %v787_v57, %v4705_v5  ;;  %v858_v25 = vrot.slane %v787_v57, %v4708_v6  ;;  %v906_v26 = vrot.slane %v787_v57, %v4713_v9  ;;  %v4532_v30 = vpop.eup %4531 }
  0x43   : > { %v975_v1 = vadd.f32 %v967_v54, %v927_v60  ;;  %v828_v29 = vmul.f32 %v802_v8, %v4914_v15  ;;  %v868_v33 = vmul.f32 %v842_v28, %v4919_v3  ;;  %v4534_v36 = vpop.eup %4533  ;;  %v916_v34 = vmul.f32 %v890_v52, %v4924_v24 }
  0x44   : > { %v979_v27 = vadd.f32 %v971_v0, %v4957_v59  ;;  %v832_v32 = vmul.f32 %v818_v22, %v4914_v15  ;;  %v872_v38 = vmul.f32 %v858_v25, %v4919_v3  ;;  %v920_v39 = vmul.f32 %v906_v26, %v4924_v24 }
  0x45   : > { %v983_v37 = vadd.f32 %v975_v1, %v4957_v59  ;;  %v876_v41 = vadd.f32 %v868_v33, %v828_v29  ;;  %v938_v42 = vrot.slane %v783_v35, %v4716_v10  ;;  %v954_v43 = vrot.slane %v787_v57, %v4716_v10 }
  0x46   : > { %v987_v40 = vadd.f32 %v979_v27, %v4718_v11  ;;  %v880_v46 = vadd.f32 %v872_v38, %v832_v32  ;;  %v776_v47 = vadd.f32 1.0, %v4532_v30  ;;  %v780_v16 = vadd.f32 1.0, %v4534_v36 }
  0x47   : > { %v991_v44 = vadd.f32 %v983_v37, %v4720_v12  ;;  %v924_v48 = vadd.f32 %v916_v34, %v876_v41  ;;  %v964_v49 = vmul.f32 %v938_v42, %v4932_v31  ;;  %v968_v17 = vmul.f32 %v954_v43, %v4932_v31  ;;  %v4228_v37 = vld [vmem:[%s5883_s5 + $0x8] sm:$0xf] }
  0x48   : > { %v753_v11 = vadd.f32 %v745_v21, %v4906_v13  ;;  %v928_v51 = vadd.f32 %v920_v39, %v880_v46  ;;  %v784_v53 = vmul.f32 %v776_v47, %v720_v58  ;;  %v788_v54 = vmul.f32 %v780_v16, %v724_v61 }
  0x49   : > { %v4986_v50 = vcombine.low %v987_v40, %v991_v44  ;;  %v1148_v12 = vsel %vm1012_vm0, %v4218_v45, 0  ;;  %v972_v55 = vadd.f32 %v964_v49, %v924_v48  ;;  %v757_v56 = vadd.f32 %v749_v62, %v4909_v14 }
  0x4a   : > { %v761_v35 = vmul.f32 0.7978846, %v753_v11  ;;  %v976_v60 = vadd.f32 %v968_v17, %v928_v51  ;;  %v806_v0 = vrot.slane %v784_v53, %v4705_v5  ;;  %v822_v8 = vrot.slane %v788_v54, %v4705_v5  ;;  %v4238_v17 = vld [vmem:[%s5883_s5 + $0xc] sm:$0xf] }
  0x4b   : > { %v999_v57 = vpack.c.bf16 %v4986_v50, %v4986_v50  ;;  %v980_v21 = vadd.f32 %v972_v55, %v4957_v59  ;;  %v846_v22 = vrot.slane %v784_v53, %v4708_v6  ;;  %v862_v58 = vrot.slane %v788_v54, %v4708_v6 }
  0x4c   : > { %v894_v61 = vrot.slane %v784_v53, %v4713_v9  ;;  %v984_v62 = vadd.f32 %v976_v60, %v4957_v59  ;;  %v829_v28 = vmul.f32 %v806_v0, %v4914_v15  ;;  %v833_v1 = vmul.f32 %v822_v8, %v4914_v15 }
  0x4d   : > { %4371 = vmatmul.mubr.msk.bf16.vlgmr.msra.gmra.mxu0 %vm1008_vm2, %v999_v57  ;;  %v910_v25 = vrot.slane %v788_v54, %v4713_v9  ;;  %v988_v52 = vadd.f32 %v980_v21, %v4735_v18  ;;  %v869_v26 = vmul.f32 %v846_v22, %v4919_v3  ;;  %v873_v30 = vmul.f32 %v862_v58, %v4919_v3 }
  0x4e   : > { %4381 = vmatpush3.bf16.msra.mxu0 %v1148_v12  ;;  %4382 = vmatprep.mubr.msk.bf16.mxu0 %vm4564_vm1, %v4563_v2  ;;  %v765_v27 = vmul.f32 0.7978846, %v757_v56  ;;  %v992_v29 = vadd.f32 %v984_v62, %v4737_v19  ;;  %v917_v32 = vmul.f32 %v894_v61, %v4924_v24  ;;  %v942_v36 = vrot.slane %v784_v53, %v4716_v10 }
  0x4f   : > { %4392 = vmatprep.subr.bf16.mxu0 %v4563_v2  ;;  %v921_v33 = vmul.f32 %v910_v25, %v4924_v24  ;;  %v877_v18 = vadd.f32 %v869_v26, %v829_v28  ;;  %v881_v38 = vadd.f32 %v873_v30, %v833_v1  ;;  %v958_v34 = vrot.slane %v788_v54, %v4716_v10 }
  0x50   : > { %4535 = vtanh.f32 %v761_v35  ;;  %v5017_v39 = vcombine.low %v988_v52, %v992_v29  ;;  %v965_v40 = vmul.f32 %v942_v36, %v4932_v31  ;;  %v1284_v44 = vsel %vm1012_vm0, %v4228_v37, 0 }
  0x51   : > { %4537 = vtanh.f32 %v765_v27  ;;  %v925_v19 = vadd.f32 %v917_v32, %v877_v18  ;;  %v929_v41 = vadd.f32 %v921_v33, %v881_v38  ;;  %v969_v42 = vmul.f32 %v958_v34, %v4932_v31 }
  0x52   : > { %v1133_v43 = vpack.c.bf16 %v5017_v39, %v5017_v39  ;;  %v1420_v53 = vsel %vm1012_vm0, %v4238_v17, 0  ;;  %v721_v54 = vmul.f32 0.5, %v4906_v13  ;;  %v725_v55 = vmul.f32 0.5, %v4909_v14 }
  0x53   : > { %v973_v45 = vadd.f32 %v965_v40, %v925_v19  ;;  %v977_v46 = vadd.f32 %v969_v42, %v929_v41 }
  0x55   : > { %4383 = vmatmul.mubr.msk.bf16.vlgmr.msra.gmra.mxu0 %vm1008_vm2, %v1133_v43  ;;  %v981_v47 = vadd.f32 %v973_v45, %v4957_v59  ;;  %v985_v16 = vadd.f32 %v977_v46, %v4957_v59  ;;  %v4220_v45 = vld [vmem:[%s5884_s6 + $0x1] ss:$0 sm:$0xff] }
  0x56   : > { %4393 = vmatpush3.bf16.msra.mxu0 %v1284_v44  ;;  %4394 = vmatprep.mubr.msk.bf16.mxu0 %vm4564_vm1, %v4563_v2 }
  0x57   : > { %4404 = vmatprep.subr.bf16.mxu0 %v4563_v2  ;;  %v989_v48 = vadd.f32 %v981_v47, %v4739_v20  ;;  %v993_v49 = vadd.f32 %v985_v16, %v4803_v63 }
  0x59   : > { %v5035_v11 = vcombine.low %v989_v48, %v993_v49 }
  0x5b   : > { %v1269_v51 = vpack.c.bf16 %v5035_v11, %v5035_v11 }
  0x5d   : > { %v4536_v12 = vpop.eup %4535  ;;  %4395 = vmatmul.mubr.msk.bf16.vlgmr.msra.gmra.mxu0 %vm1008_vm2, %v1269_v51 }
  0x5e   : > { %v4538_v56 = vpop.eup %4537  ;;  %v777_v20 = vadd.f32 1.0, %v4536_v12  ;;  %4405 = vmatpush3.bf16.msra.mxu0 %v1420_v53  ;;  %4406 = vmatprep.mubr.msk.bf16.mxu0 %vm4564_vm1, %v4563_v2 }
  0x5f   : > { %v781_v63 = vadd.f32 1.0, %v4538_v56  ;;  %4416 = vmatprep.subr.bf16.mxu0 %v4563_v2  ;;  %v4230_v56 = vld [vmem:[%s5884_s6 + $0x2] ss:$0 sm:$0xff] }
  0x60   : > { %v785_v35 = vmul.f32 %v777_v20, %v721_v54 }
  0x61   : > { %v789_v57 = vmul.f32 %v781_v63, %v725_v55 }
  0x62   : > { %v810_v60 = vrot.slane %v785_v35, %v4705_v5  ;;  %v850_v13 = vrot.slane %v785_v35, %v4708_v6  ;;  %v898_v0 = vrot.slane %v785_v35, %v4713_v9  ;;  %v946_v14 = vrot.slane %v785_v35, %v4716_v10 }
  0x63   : > { %v826_v8 = vrot.slane %v789_v57, %v4705_v5  ;;  %v866_v21 = vrot.slane %v789_v57, %v4708_v6  ;;  %v914_v22 = vrot.slane %v789_v57, %v4713_v9  ;;  %v962_v58 = vrot.slane %v789_v57, %v4716_v10 }
  0x64   : > { %v830_v61 = vmul.f32 %v810_v60, %v4914_v15  ;;  %v870_v62 = vmul.f32 %v850_v13, %v4919_v3  ;;  %v918_v28 = vmul.f32 %v898_v0, %v4924_v24  ;;  %v966_v30 = vmul.f32 %v946_v14, %v4932_v31 }
  0x65   : > { %v834_v1 = vmul.f32 %v826_v8, %v4914_v15  ;;  %v874_v25 = vmul.f32 %v866_v21, %v4919_v3  ;;  %v922_v52 = vmul.f32 %v914_v22, %v4924_v24  ;;  %v970_v29 = vmul.f32 %v962_v58, %v4932_v31  ;;  %v1066_v31 = vld [vmem:[%s5885_s7] sm:$0xf] }
  0x66   : > { %v878_v26 = vadd.f32 %v870_v62, %v830_v61 }
  0x67   : > { %v882_v27 = vadd.f32 %v874_v25, %v834_v1  ;;  %v4222_v1 = vld [vmem:[%s5885_s7 + $0x4] sm:$0xf] }
  0x68   : > { %v926_v32 = vadd.f32 %v918_v28, %v878_v26  ;;  %v1214_v26 = vsel %vm1012_vm0, %v4222_v1, 0 }
  0x69   : > { %v930_v33 = vadd.f32 %v922_v52, %v882_v27 }
  0x6a   : > { %v974_v36 = vadd.f32 %v966_v30, %v926_v32  ;;  %v4232_v32 = vld [vmem:[%s5885_s7 + $0x8] sm:$0xf] }
  0x6b   : > { %v978_v37 = vadd.f32 %v970_v29, %v930_v33 }
  0x6c   : > { %v982_v18 = vadd.f32 %v974_v36, %v4957_v59  ;;  %v4240_v36 = vld [vmem:[%s5884_s6 + $0x3] ss:$0 sm:$0xff] }
  0x6d   : > { %v986_v38 = vadd.f32 %v978_v37, %v4957_v59  ;;  %v1078_v59 = vsel %vm1012_vm0, %v1066_v31, 0 }
  0x6e   : > { %v990_v15 = vadd.f32 %v982_v18, %v4859_v7  ;;  %4375 = vmatpush3.bf16.msra.mxu1 %v1078_v59  ;;  %v4214_v7 = vld [vmem:[%s5884_s6] ss:$0 sm:$0xff]  ;;  %v1350_v18 = vsel %vm1012_vm0, %v4232_v32, 0 }
  0x6f   : > { %v994_v3 = vadd.f32 %v986_v38, %v4863_v23  ;;  %4386 = vmatprep.subr.bf16.mxu1 %v4563_v2 }
  0x71   : > { %v5066_v34 = vcombine.low %v990_v15, %v994_v3 }
  0x73   : > { %v1405_v24 = vpack.c.bf16 %v5066_v34, %v5066_v34 }
  0x75   : > { %4407 = vmatmul.mubr.msk.bf16.vlgmr.msra.gmra.mxu0 %vm1008_vm2, %v1405_v24 }
  0x76   : > { %4418 = vmatprep.mubr.msk.bf16.mxu0 %vm4564_vm1, %v4563_v2 }
 0x10d   : > { %v1050_v23 = vpop.f32.mrf.mxu0 }
 0x10e   : > { %v1051_v40 = vadd.f32 %v4214_v7, %v1050_v23 }
 0x10f   : > { %v4372_v19 = vpop.f32.mrf.mxu0 }
 0x110   : > { %v1057_v41 = vmul.f32 0.044715, %v1051_v40  ;;  %v1056_v61 = vmul.f32 0.5, %v1051_v40  ;;  %v4242_v19 = vld [vmem:[%s5885_s7 + $0xc] sm:$0xf] }
 0x111   : > { %v1053_v42 = vpop.f32.mrf.mxu0 }
 0x112   : > { %v1058_v43 = vmul.f32 %v1057_v41, %v1051_v40 }
 0x113   : > { %v4373_v44 = vpop.f32.mrf.mxu0 }
 0x114   : > { %v1059_v46 = vmul.f32 %v1058_v43, %v1051_v40 }
 0x115   : > { %v1184_v47 = vpop.f32.mrf.mxu0 }
 0x116   : > { %v1060_v16 = vadd.f32 %v1059_v46, %v1051_v40  ;;  %v1185_v48 = vadd.f32 %v4220_v45, %v1184_v47  ;;  %v1486_v45 = vsel %vm1012_vm0, %v4242_v19, 0  ;;  %v4565_v19 = vmov 1983009808  }
 0x117   : > { %v4384_v49 = vpop.f32.mrf.mxu0 }
 0x118   : > { %v1061_v17 = vmul.f32 0.7978846, %v1060_v16  ;;  %v1191_v51 = vmul.f32 0.044715, %v1185_v48  ;;  %v1190_v27 = vmul.f32 0.5, %v1185_v48 }
 0x119   : > { %v1187_v53 = vpop.f32.mrf.mxu0 }
 0x11a   : > { %v1192_v54 = vmul.f32 %v1191_v51, %v1185_v48  ;;  %4539 = vtanh.f32 %v1061_v17  ;;  %v1553_v53 = vld [vmem:[%s5887_s9] sm:$0xf] }
 0x11b   : > { %v4385_v12 = vpop.f32.mrf.mxu0 }
 0x11c   : > { %v1193_v55 = vmul.f32 %v1192_v54, %v1185_v48  ;;  %v1659_v54 = vsel %vm1012_vm0, %v1553_v53, 0  ;;  %v4216_v12 = vld [vmem:[%s5886_s8] ss:$0 sm:$0xff] }
 0x11d   : > { %v1320_v63 = vpop.f32.mrf.mxu0  ;;  %4417 = vmatpush3.bf16.msra.mxu0 %v1659_v54 }
 0x11e   : > { %v1194_v20 = vadd.f32 %v1193_v55, %v1185_v48  ;;  %v1321_v35 = vadd.f32 %v4230_v56, %v1320_v63 }
 0x11f   : > { %v4396_v60 = vpop.f32.mrf.mxu0 }
 0x120   : > { %v1195_v57 = vmul.f32 0.7978846, %v1194_v20  ;;  %v1327_v13 = vmul.f32 0.044715, %v1321_v35  ;;  %v1326_v59 = vmul.f32 0.5, %v1321_v35 }
 0x121   : > { %v1323_v0 = vpop.f32.mrf.mxu0 }
 0x122   : > { %4541 = vtanh.f32 %v1195_v57  ;;  %v1328_v14 = vmul.f32 %v1327_v13, %v1321_v35  ;;  %v4224_v0 = vld [vmem:[%s5886_s8 + $0x1] ss:$0 sm:$0xff] }
 0x123   : > { %v4397_v8 = vpop.f32.mrf.mxu0 }
 0x124   : > { %v1329_v21 = vmul.f32 %v1328_v14, %v1321_v35 }
 0x126   : > { %v1330_v58 = vadd.f32 %v1329_v21, %v1321_v35 }
 0x127   : > { %v4540_v22 = vpop.eup %4539 }
 0x128   : > { %v1063_v62 = vadd.f32 1.0, %v4540_v22  ;;  %v1331_v28 = vmul.f32 0.7978846, %v1330_v58 }
 0x12a   : > { %v1064_v25 = vmul.f32 %v1063_v62, %v1056_v61  ;;  %4543 = vtanh.f32 %v1331_v28 }
 0x12c   : > { %v1065_v52 = vpack.c.bf16 %v1064_v25, %v1064_v25  ;;  %v4234_v25 = vld [vmem:[%s5886_s8 + $0x2] ss:$0 sm:$0xff] }
 0x12e   : > { %4377 = vmatmul.mubr.msk.bf16.vlgmr.msra.gmra.mxu1 %vm1008_vm2, %v1065_v52 }
 0x12f   : > { %v4542_v30 = vpop.eup %4541  ;;  %4387 = vmatpush3.bf16.msra.mxu1 %v1214_v26  ;;  %4388 = vmatprep.mubr.msk.bf16.mxu1 %vm4564_vm1, %v4563_v2 }
 0x130   : > { %4398 = vmatprep.subr.bf16.mxu1 %v4563_v2  ;;  %v1197_v29 = vadd.f32 1.0, %v4542_v30 }
 0x132   : > { %v1198_v33 = vmul.f32 %v1197_v29, %v1190_v27 }
 0x134   : > { %v1199_v37 = vpack.c.bf16 %v1198_v33, %v1198_v33 }
 0x135   : > { %v1456_v38 = vpop.f32.mrf.mxu0 }
 0x136   : > { %v1457_v15 = vadd.f32 %v4240_v36, %v1456_v38  ;;  %4389 = vmatmul.mubr.msk.bf16.vlgmr.msra.gmra.mxu1 %vm1008_vm2, %v1199_v37 }
 0x137   : > { %v4408_v3 = vpop.f32.mrf.mxu0  ;;  %4399 = vmatpush3.bf16.msra.mxu1 %v1350_v18  ;;  %4400 = vmatprep.mubr.msk.bf16.mxu1 %vm4564_vm1, %v4563_v2  ;;  %v4544_v24 = vpop.eup %4543 }
 0x138   : > { %v1463_v31 = vmul.f32 0.044715, %v1457_v15  ;;  %4410 = vmatprep.subr.bf16.mxu1 %v4563_v2  ;;  %v1333_v23 = vadd.f32 1.0, %v4544_v24  ;;  %v1462_v48 = vmul.f32 0.5, %v1457_v15 }
 0x139   : > { %v1459_v7 = vpop.f32.mrf.mxu0 }
 0x13a   : > { %v1464_v40 = vmul.f32 %v1463_v31, %v1457_v15  ;;  %v1334_v42 = vmul.f32 %v1333_v23, %v1326_v59  ;;  %v4244_v23 = vld [vmem:[%s5886_s8 + $0x3] ss:$0 sm:$0xff] }
 0x13b   : > { %v4409_v41 = vpop.f32.mrf.mxu0 }
 0x13c   : > { %v1465_v43 = vmul.f32 %v1464_v40, %v1457_v15  ;;  %v1335_v44 = vpack.c.bf16 %v1334_v42, %v1334_v42  ;;  %v1570_v41 = vunpack.c.l.s4 %v4565_v19 }
 0x13e   : > { %v1466_v46 = vadd.f32 %v1465_v43, %v1457_v15  ;;  %4401 = vmatmul.mubr.msk.bf16.vlgmr.msra.gmra.mxu1 %vm1008_vm2, %v1335_v44 }
 0x13f   : > { %4411 = vmatpush3.bf16.msra.mxu1 %v1486_v45  ;;  %4412 = vmatprep.mubr.msk.bf16.mxu1 %vm4564_vm1, %v4563_v2 }
 0x140   : > { %v1467_v47 = vmul.f32 0.7978846, %v1466_v46  ;;  %4422 = vmatprep.subr.bf16.mxu1 %v4563_v2  ;;  %v1571_v46 = vunpack.c.0.s8 %v1570_v41 }
 0x142   : > { %4545 = vtanh.f32 %v1467_v47 }
 0x14f   : > { %v4546_v16 = vpop.eup %4545 }
 0x150   : > { %v1469_v49 = vadd.f32 1.0, %v4546_v16 }
 0x152   : > { %v1470_v17 = vmul.f32 %v1469_v49, %v1462_v48 }
 0x154   : > { %v1471_v51 = vpack.c.bf16 %v1470_v17, %v1470_v17 }
 0x156   : > { %4413 = vmatmul.mubr.msk.bf16.vlgmr.msra.gmra.mxu1 %vm1008_vm2, %v1471_v51  ;;  %v5167_v51 = vsub.s32 %v1571_v46, %v4692_v4 }
 0x157   : > { %4424 = vmatprep.mubr.msk.bf16.mxu1 %vm4564_vm1, %v4563_v2 }
 0x1ee   : > { %v1114_v55 = vpop.f32.mrf.mxu1 }
 0x1ef   : > { %v1115_v56 = vadd.f32 %v4216_v12, %v1114_v55 }
 0x1f0   : > { %v4378_v20 = vpop.f32.mrf.mxu1 }
 0x1f1   : > { %v1120_v63 = vadd.f32 %v1115_v56, %v4986_v50 }
 0x1f2   : > { %v1117_v35 = vpop.f32.mrf.mxu1 }
 0x1f3   : > { %v1122_v57 = vcombine.high %v1120_v63, %v1120_v63  ;;  %v1124_v60 = vpack.c.bf16 %v1120_v63, %v1120_v63 }
 0x1f4   : > { %v4379_v13 = vpop.f32.mrf.mxu1 }
 0x1f5   : > { %v1125_v50 = vpack.c.bf16 %v1122_v57, %v1122_v57  ;;  %1127 = vst.msk [vmem:[%s5130_s16] sm:$0x3] %vm1126_vm3, %v1124_v60 }
 0x1f6   : > { %v1250_v14 = vpop.f32.mrf.mxu1 }
 0x1f7   : > { %1128 = vst.msk [vmem:[%s5130_s16 + $0x8] sm:$0x3] %vm1126_vm3, %v1125_v50  ;;  %v1251_v8 = vadd.f32 %v4224_v0, %v1250_v14 }
 0x1f8   : > { %v4390_v21 = vpop.f32.mrf.mxu1 }
 0x1f9   : > { %v1256_v22 = vadd.f32 %v1251_v8, %v5017_v39 }
 0x1fa   : > { %v1253_v58 = vpop.f32.mrf.mxu1 }
 0x1fb   : > { %v1258_v61 = vcombine.high %v1256_v22, %v1256_v22  ;;  %v1260_v62 = vpack.c.bf16 %v1256_v22, %v1256_v22 }
 0x1fc   : > { %v4391_v28 = vpop.f32.mrf.mxu1  ;;  %v1537_v27 = vld [vmem:[%s5130_s16] sm:$0x1] }
 0x1fd   : > { %v1261_v1 = vpack.c.bf16 %v1258_v61, %v1258_v61  ;;  %4226 = vst.msk [vmem:[%s5130_s16 + $0x2] sm:$0x3] %vm1126_vm3, %v1260_v62  ;;  %v1545_v37 = vunpack.c.l.bf16 %v1537_v27  ;;  %v1575_v20 = vrot.slane %v1537_v27, %v5167_v51 }
 0x1fe   : > { %v1386_v52 = vpop.f32.mrf.mxu1 }
 0x1ff   : > { %4227 = vst.msk [vmem:[%s5130_s16 + $0xa] sm:$0x3] %vm1126_vm3, %v1261_v1  ;;  %v1387_v26 = vadd.f32 %v4234_v25, %v1386_v52  ;;  %v1776_v3 = vrot.slane %v1545_v37, %v4705_v5  ;;  %v1625_v61 = vunpack.c.l.b16 %v1575_v20 }
 0x200   : > { %v4402_v30 = vpop.f32.mrf.mxu1 }
 0x201   : > { %v1392_v39 = vadd.f32 %v1387_v26, %v5035_v11 }
 0x202   : > { %v1389_v29 = vpop.f32.mrf.mxu1 }
 0x203   : > { %v1394_v32 = vcombine.high %v1392_v39, %v1392_v39  ;;  %v1396_v33 = vpack.c.bf16 %v1392_v39, %v1392_v39 }
 0x204   : > { %v4403_v36 = vpop.f32.mrf.mxu1  ;;  %v1538_v38 = vld [vmem:[%s5130_s16 + $0x2] sm:$0x1] }
 0x205   : > { %v1397_v18 = vpack.c.bf16 %v1394_v32, %v1394_v32  ;;  %4236 = vst.msk [vmem:[%s5130_s16 + $0x4] sm:$0x3] %vm1126_vm3, %v1396_v33  ;;  %v1546_v15 = vunpack.c.l.bf16 %v1538_v38  ;;  %v1582_v53 = vrot.slane %v1538_v38, %v5167_v51 }
 0x206   : > { %v1542_v12 = vld [vmem:[%s5130_s16 + $0xa] sm:$0x1] }
 0x207   : > { %4237 = vst.msk [vmem:[%s5130_s16 + $0xc] sm:$0x3] %vm1126_vm3, %v1397_v18  ;;  %v1780_v24 = vrot.slane %v1546_v15, %v4705_v5  ;;  %v1626_v56 = vunpack.c.l.b16 %v1582_v53  ;;  %v1610_v57 = vrot.slane %v1542_v12, %v5167_v51  ;;  %v1550_v14 = vunpack.c.l.bf16 %v1542_v12 }
 0x209   : > { %v1805_v11 = vsel %vm1634_vm4, %v1780_v24, %v1776_v3  ;;  %v1633_v22 = vrot.slane %v1626_v56, 7  ;;  %v1630_v52 = vunpack.c.l.b16 %v1610_v57  ;;  %v1796_v29 = vrot.slane %v1550_v14, %v4705_v5 }
 0x20b   : > { %v1635_v33 = vsel %vm1634_vm4, %v1633_v22, %v1625_v61 }
 0x20c   : > { %v1539_v31 = vld [vmem:[%s5130_s16 + $0x4] sm:$0x1] }
 0x20d   : > { %v1547_v59 = vunpack.c.l.bf16 %v1539_v31  ;;  %v1589_v54 = vrot.slane %v1539_v31, %v5167_v51 }
 0x20e   : > { %v1543_v55 = vld [vmem:[%s5130_s16 + $0xc] sm:$0x1] }
 0x20f   : > { %v1784_v7 = vrot.slane %v1547_v59, %v4705_v5  ;;  %v1627_v35 = vunpack.c.l.b16 %v1589_v54  ;;  %v1617_v0 = vrot.slane %v1543_v55, %v5167_v51  ;;  %v1551_v1 = vunpack.c.l.bf16 %v1543_v55 }
 0x211   : > { %v1806_v40 = vsel %vm1637_vm5, %v1784_v7, %v1805_v11  ;;  %v1636_v28 = vrot.slane %v1627_v35, 6  ;;  %v1631_v39 = vunpack.c.l.b16 %v1617_v0  ;;  %v1800_v15 = vrot.slane %v1551_v1, %v4705_v5 }
 0x212   : > { %v1645_v11 = vrot.slane %v1630_v52, 3 }
 0x213   : > { %v1638_v18 = vsel %vm1637_vm5, %v1636_v28, %v1635_v33 }
 0x216   : > { %v1522_v42 = vpop.f32.mrf.mxu1 }
 0x217   : > { %v1523_v43 = vadd.f32 %v4244_v23, %v1522_v42  ;;  %v1648_v23 = vrot.slane %v1631_v39, 2 }
 0x218   : > { %v4414_v44 = vpop.f32.mrf.mxu1 }
 0x219   : > { %v1528_v45 = vadd.f32 %v1523_v43, %v5066_v34  ;;  %v1541_v34 = vld [vmem:[%s5130_s16 + $0x8] sm:$0x1] }
 0x21a   : > { %v1525_v47 = vpop.f32.mrf.mxu1  ;;  %v1603_v63 = vrot.slane %v1541_v34, %v5167_v51  ;;  %v1549_v50 = vunpack.c.l.bf16 %v1541_v34 }
 0x21b   : > { %v1530_v16 = vcombine.high %v1528_v45, %v1528_v45  ;;  %v1532_v48 = vpack.c.bf16 %v1528_v45, %v1528_v45  ;;  %v4248_v47 = vld [vmem:[%s5888_s10] ss:$0 sm:$0xff] }
 0x21c   : > { %v4415_v49 = vpop.f32.mrf.mxu1  ;;  %v1629_v62 = vunpack.c.l.b16 %v1603_v63  ;;  %v1792_v27 = vrot.slane %v1549_v50, %v4705_v5 }
 0x21d   : > { %v1533_v17 = vpack.c.bf16 %v1530_v16, %v1530_v16  ;;  %4246 = vst.msk [vmem:[%s5130_s16 + $0x6] sm:$0x3] %vm1126_vm3, %v1532_v48 }
 0x21e   : > { %v1642_v38 = vrot.slane %v1629_v62, 4 }
 0x21f   : > { %4247 = vst.msk [vmem:[%s5130_s16 + $0xe] sm:$0x3] %vm1126_vm3, %v1533_v17 }
 0x224   : > { %v1540_v60 = vld [vmem:[%s5130_s16 + $0x6] sm:$0x1] }
 0x225   : > { %v1596_v8 = vrot.slane %v1540_v60, %v5167_v51  ;;  %v1548_v58 = vunpack.c.l.bf16 %v1540_v60 }
 0x226   : > { %v1544_v13 = vld [vmem:[%s5130_s16 + $0xe] sm:$0x1] }
 0x227   : > { %v1624_v21 = vrot.slane %v1544_v13, %v5167_v51  ;;  %v1628_v25 = vunpack.c.l.b16 %v1596_v8  ;;  %v1552_v26 = vunpack.c.l.bf16 %v1544_v13  ;;  %v1788_v30 = vrot.slane %v1548_v58, %v4705_v5  ;;  %v4250_v13 = vld [vmem:[%s5890_s12] ss:$0 sm:$0xff] }
 0x229   : > { %v1632_v32 = vunpack.c.l.b16 %v1624_v21  ;;  %v1639_v36 = vrot.slane %v1628_v25, 5  ;;  %v1807_v37 = vsel %vm1640_vm6, %v1788_v30, %v1806_v40  ;;  %v1804_v31 = vrot.slane %v1552_v26, %v4705_v5  ;;  %v1711_v5 = vld [vmem:[%s5889_s11] sm:$0xf] }
 0x22a   : > { %v1808_v3 = vsel %vm1643_vm7, %v1792_v27, %v1807_v37  ;;  %v1723_v46 = vsel %vm1012_vm0, %v1711_v5, 0 }
 0x22b   : > { %v1641_v24 = vsel %vm1640_vm6, %v1639_v36, %v1638_v18  ;;  %v1809_v59 = vsel %vm1646_vm8, %v1796_v29, %v1808_v3  ;;  %v1651_v41 = vrot.slane %v1632_v32, 1  ;;  %4423 = vmatpush3.bf16.msra.mxu1 %v1723_v46 }
 0x22c   : > { %v1644_v7 = vsel %vm1643_vm7, %v1642_v38, %v1641_v24  ;;  %v1810_v19 = vsel %vm1649_vm9, %v1800_v15, %v1809_v59 }
 0x22d   : > { %v1647_v40 = vsel %vm1646_vm8, %v1645_v11, %v1644_v7  ;;  %v1811_v42 = vsel %vm1652_vm10, %v1804_v31, %v1810_v19 }
 0x22e   : > { %v1650_v43 = vsel %vm1649_vm9, %v1648_v23, %v1647_v40 }
 0x22f   : > { %v1653_v44 = vsel %vm1652_vm10, %v1651_v41, %v1650_v43 }
 0x230   : > { %v1654_v45 = vpack.c.b16 %v1653_v44, %v1653_v44 }
 0x232   : > { %4419 = vmatmul.mubr.msk.bf16.vlgmr.msra.gmra.mxu0 %vm1008_vm2, %v1654_v45 }
 0x2f2   : > { %v1695_v16 = vpop.f32.mrf.mxu0 }
 0x2f3   : > { %v1696_v48 = vadd.f32 %v4248_v47, %v1695_v16 }
 0x2f4   : > { %v4420_v49 = vpop.f32.mrf.mxu0 }
 0x2f5   : > { %v1702_v17 = vmul.f32 0.044715, %v1696_v48  ;;  %v1701_v63 = vmul.f32 0.5, %v1696_v48 }
 0x2f6   : > { %v1698_v53 = vpop.f32.mrf.mxu0 }
 0x2f7   : > { %v1703_v54 = vmul.f32 %v1702_v17, %v1696_v48 }
 0x2f8   : > { %v4421_v34 = vpop.f32.mrf.mxu0 }
 0x2f9   : > { %v1704_v12 = vmul.f32 %v1703_v54, %v1696_v48 }
 0x2fb   : > { %v1705_v55 = vadd.f32 %v1704_v12, %v1696_v48 }
 0x2fd   : > { %v1706_v56 = vmul.f32 0.7978846, %v1705_v55 }
 0x2ff   : > { %4547 = vtanh.f32 %v1706_v56 }
 0x30c   : > { %v4548_v20 = vpop.eup %4547 }
 0x30d   : > { %v1708_v35 = vadd.f32 1.0, %v4548_v20 }
 0x30f   : > { %v1709_v57 = vmul.f32 %v1708_v35, %v1701_v63 }
 0x311   : > { %v1710_v60 = vpack.c.bf16 %v1709_v57, %v1709_v57 }
 0x313   : > { %4425 = vmatmul.mubr.msk.bf16.vlgmr.msra.gmra.mxu1 %vm1008_vm2, %v1710_v60 }
 0x3d3   : > { %v1759_v0 = vpop.f32.mrf.mxu1 }
 0x3d4   : > { %v1760_v50 = vadd.f32 %v4250_v13, %v1759_v0 }
 0x3d5   : > { %v4426_v14 = vpop.f32.mrf.mxu1  ;;  %1816 = sbr.rel (%p4252_p4) target bundleno = 1204 (0x4b4), region = 84 }
 0x3d6   : > { %v5213_v8 = vadd.f32 %v1811_v42, %v1760_v50 }
 0x3d7   : > { %v1762_v21 = vpop.f32.mrf.mxu1 }
 0x3d9   : > { %v4427_v22 = vpop.f32.mrf.mxu1 }
 0x3da   : > { %v1818_v58 = vld [vmem:[%s5891_s13] sm:$0xf]  ;;  %v4566_v61 = vmov 0.0   ;;  %vm4567_vm11 = vmmov 0   ;;  %v1817_v28 = vpack.c.bf16 %v5213_v8, %v5213_v8  ;;  %v4568_v1 = vmov 1966171168  }
 0x3db   : > { %4428 = vmatprep.subr.bf16.mxu0 %v4566_v61  ;;  %v1830_v62 = vsel %vm1012_vm0, %v1818_v58, 0  ;;  %4430 = vmatprep.mubr.msk.bf16.mxu0 %vm4567_vm11, %v4566_v61  ;;  %v1880_v25 = vunpack.c.l.s4 %v4568_v1  ;;  %v4253_v26 = vld [vmem:[%s5892_s14] ss:$0 sm:$0xff]  ;;  %v4569_v39 = vmov 857870592   ;;  %vm2003_vm12 = vcmask 57344  }
 0x3dc   : > { %4429 = vmatpush3.bf16.msra.mxu0 %v1830_v62  ;;  %v1940_v27 = vunpack.c.l.s4 %v4569_v39  ;;  %vm2004_vm13 = vsmask.f32 256  ;;  %v2006_v5 = vld [vmem:[%s5130_s16] sm:$0x1]  ;;  %v2009_v49 = vld [vmem:[%s5130_s16 + $0x2] sm:$0x1] }
 0x3dd   : > { %v1881_v52 = vunpack.c.0.s8 %v1880_v25  ;;  %vm5230_vm14 = vmand %vm2003_vm12, %vm2004_vm13  ;;  %v2012_v17 = vld [vmem:[%s5130_s16 + $0x4] sm:$0x1]  ;;  %v2015_v12 = vld [vmem:[%s5130_s16 + $0x6] sm:$0x1] }
 0x3de   : > { %v1941_v18 = vunpack.c.0.s8 %v1940_v27  ;;  %v2018_v21 = vld [vmem:[%s5130_s16 + $0x8] sm:$0x1]  ;;  %v2024_v1 = vld [vmem:[%s5130_s16 + $0xc] sm:$0x1] }
 0x3df   : > { %4431 = vmatmul.mubr.msk.bf16.vlgmr.msra.gmra.mxu0 %vm1008_vm2, %v1817_v28  ;;  %v1884_v32 = vsub.s32 %v1881_v52, %v4692_v4  ;;  %v2021_v28 = vld [vmem:[%s5130_s16 + $0xa] sm:$0x1] }
 0x3e0   : > { %v1944_v7 = vsub.s32 %v1941_v18, %v4692_v4 }
 0x49f   : > { %v1866_v30 = vpop.f32.mrf.mxu0 }
 0x4a0   : > { %v1867_v29 = vadd.f32 %v4253_v26, %v1866_v30  ;;  %v2027_v26 = vld [vmem:[%s5130_s16 + $0xe] sm:$0x1] }
 0x4a1   : > { %v4432_v33 = vpop.f32.mrf.mxu0 }
 0x4a2   : > { %v1873_v36 = vcombine.high %v1867_v29, %v1867_v29  ;;  %v1875_v37 = vpack.c.bf16 %v1867_v29, %v1867_v29 }
 0x4a3   : > { %v1869_v38 = vpop.f32.mrf.mxu0 }
 0x4a4   : > { %v1876_v15 = vpack.c.bf16 %v1873_v36, %v1873_v36  ;;  %v1885_v3 = vrot.slane %v1875_v37, %v1884_v32 }
 0x4a5   : > { %v4433_v24 = vpop.f32.mrf.mxu0 }
 0x4a6   : > { %v1886_v11 = vcombine.high %v1885_v3, %v1885_v3  ;;  %v1893_v31 = vrot.slane %v1885_v3, %v1884_v32  ;;  %v1907_v59 = vrot.slane %v1876_v15, %v1884_v32 }
 0x4a8   : > { %v1900_v23 = vrot.slane %v1886_v11, %v1884_v32  ;;  %v1908_v19 = vcombine.high %v1907_v59, %v1907_v59  ;;  %v1924_v40 = vunpack.i.h.s16 %v1893_v31  ;;  %v4255_v41 = vpack.i.b16 %v1893_v31, %v1893_v31 }
 0x4a9   : > { %v1915_v42 = vrot.slane %v1907_v59, %v1884_v32 }
 0x4aa   : > { %v1926_v43 = vunpack.i.h.s16 %v1900_v23  ;;  %v1932_v44 = vpack.i.b16 %v1924_v40, %v1924_v40  ;;  %v1922_v46 = vrot.slane %v1908_v19, %v1884_v32  ;;  %v4256_v47 = vpack.i.b16 %v1900_v23, %v1900_v23 }
 0x4ab   : > { %v1945_v16 = vrot.slane %v4255_v41, %v1944_v7  ;;  %v1928_v55 = vunpack.i.h.s16 %v1915_v42  ;;  %v4257_v57 = vpack.i.b16 %v1915_v42, %v1915_v42 }
 0x4ac   : > { %v1934_v48 = vpack.i.b16 %v1926_v43, %v1926_v43  ;;  %v1952_v53 = vrot.slane %v1932_v44, %v1944_v7  ;;  %v1959_v54 = vrot.slane %v4256_v47, %v1944_v7  ;;  %v1930_v20 = vunpack.i.h.s16 %v1922_v46 }
 0x4ad   : > { %v2007_v34 = vsel %vm5230_vm14, %v1945_v16, %v2006_v5  ;;  %v1936_v13 = vpack.i.b16 %v1928_v55, %v1928_v55  ;;  %v4258_v0 = vpack.i.b16 %v1922_v46, %v1922_v46  ;;  %v1973_v14 = vrot.slane %v4257_v57, %v1944_v7 }
 0x4ae   : > { %v1966_v56 = vrot.slane %v1934_v48, %v1944_v7  ;;  %2008 = vst [vmem:[%s5130_s16] sm:$0x1] %v2007_v34  ;;  %v2010_v63 = vsel %vm5230_vm14, %v1952_v53, %v2009_v49  ;;  %v2013_v35 = vsel %vm5230_vm14, %v1959_v54, %v2012_v17  ;;  %v1938_v50 = vpack.i.b16 %v1930_v20, %v1930_v20 }
 0x4af   : > { %2011 = vst [vmem:[%s5130_s16 + $0x2] sm:$0x1] %v2010_v63  ;;  %2014 = vst [vmem:[%s5130_s16 + $0x4] sm:$0x1] %v2013_v35  ;;  %v1980_v22 = vrot.slane %v1936_v13, %v1944_v7  ;;  %v1987_v58 = vrot.slane %v4258_v0, %v1944_v7  ;;  %v2019_v61 = vsel %vm5230_vm14, %v1973_v14, %v2018_v21 }
 0x4b0   : > { %v2016_v60 = vsel %vm5230_vm14, %v1966_v56, %v2015_v12  ;;  %v1994_v62 = vrot.slane %v1938_v50, %v1944_v7  ;;  %2020 = vst [vmem:[%s5130_s16 + $0x8] sm:$0x1] %v2019_v61 }
 0x4b1   : > { %2017 = vst [vmem:[%s5130_s16 + $0x6] sm:$0x1] %v2016_v60  ;;  %v2022_v25 = vsel %vm5230_vm14, %v1980_v22, %v2021_v28  ;;  %v2025_v52 = vsel %vm5230_vm14, %v1987_v58, %v2024_v1 }
 0x4b2   : > { %2023 = vst [vmem:[%s5130_s16 + $0xa] sm:$0x1] %v2022_v25  ;;  %2026 = vst [vmem:[%s5130_s16 + $0xc] sm:$0x1] %v2025_v52  ;;  %v2028_v30 = vsel %vm5230_vm14, %v1994_v62, %v2027_v26 }
 0x4b3   : > { %2029 = vst [vmem:[%s5130_s16 + $0xe] sm:$0x1] %v2028_v30 }
 0x4b4 PF: > { %p4259_p5 = scmp.ge.s32.totalorder %s4676_s19, 1 }
 0x4b6   : > { %2033 = sbr.rel (%p4259_p5) target bundleno = 1233 (0x4d1), region = 88 }
 0x4bb   : > { %v4570_v39 = vmov 1966171168   ;;  %v4571_v29 = vmov 857870592   ;;  %v2035_v33 = vcombine.high %v5213_v8, %v5213_v8  ;;  %v2037_v36 = vpack.c.bf16 %v5213_v8, %v5213_v8  ;;  %v2168_v42 = vld [vmem:[%s5130_s16] sm:$0x1] }
 0x4bc   : > { %v2042_v27 = vunpack.c.l.s4 %v4570_v39  ;;  %v2102_v32 = vunpack.c.l.s4 %v4571_v29  ;;  %vm2165_vm15 = vcmask 57344   ;;  %vm2166_vm3 = vsmask.f32 256  ;;  %v2171_v47 = vld [vmem:[%s5130_s16 + $0x2] sm:$0x1] }
 0x4bd   : > { %v2038_v18 = vpack.c.bf16 %v2035_v33, %v2035_v33  ;;  %vm5275_vm11 = vmand %vm2165_vm15, %vm2166_vm3  ;;  %v2174_v16 = vld [vmem:[%s5130_s16 + $0x4] sm:$0x1]  ;;  %v2177_v34 = vld [vmem:[%s5130_s16 + $0x6] sm:$0x1] }
 0x4be   : > { %v2043_v37 = vunpack.c.0.s8 %v2042_v27  ;;  %v2103_v15 = vunpack.c.0.s8 %v2102_v32  ;;  %v2180_v21 = vld [vmem:[%s5130_s16 + $0x8] sm:$0x1]  ;;  %v2183_v61 = vld [vmem:[%s5130_s16 + $0xa] sm:$0x1]  ;;  %v2186_v62 = vld [vmem:[%s5130_s16 + $0xc] sm:$0x1] }
 0x4bf   : > { %v2189_v25 = vld [vmem:[%s5130_s16 + $0xe] sm:$0x1] }
 0x4c0   : > { %v2046_v38 = vsub.s32 %v2043_v37, %v4692_v4  ;;  %v2106_v31 = vsub.s32 %v2103_v15, %v4692_v4 }
 0x4c2   : > { %v2047_v3 = vrot.slane %v2037_v36, %v2046_v38  ;;  %v2069_v24 = vrot.slane %v2038_v18, %v2046_v38 }
 0x4c4   : > { %v2055_v11 = vrot.slane %v2047_v3, %v2046_v38  ;;  %v2048_v59 = vcombine.high %v2047_v3, %v2047_v3  ;;  %v2070_v7 = vcombine.high %v2069_v24, %v2069_v24  ;;  %v2077_v23 = vrot.slane %v2069_v24, %v2046_v38 }
 0x4c6   : > { %v4260_v19 = vpack.i.b16 %v2055_v11, %v2055_v11  ;;  %v2086_v8 = vunpack.i.h.s16 %v2055_v11  ;;  %v2062_v40 = vrot.slane %v2048_v59, %v2046_v38  ;;  %v2084_v43 = vrot.slane %v2070_v7, %v2046_v38 }
 0x4c7   : > { %v2090_v48 = vunpack.i.h.s16 %v2077_v23  ;;  %v4262_v12 = vpack.i.b16 %v2077_v23, %v2077_v23 }
 0x4c8   : > { %v2107_v44 = vrot.slane %v4260_v19, %v2106_v31  ;;  %v2094_v45 = vpack.i.b16 %v2086_v8, %v2086_v8  ;;  %v4261_v5 = vpack.i.b16 %v2062_v40, %v2062_v40  ;;  %v2088_v46 = vunpack.i.h.s16 %v2062_v40 }
 0x4c9   : > { %v2092_v55 = vunpack.i.h.s16 %v2084_v43  ;;  %v2098_v35 = vpack.i.b16 %v2090_v48, %v2090_v48  ;;  %v4263_v57 = vpack.i.b16 %v2084_v43, %v2084_v43  ;;  %v2135_v13 = vrot.slane %v4262_v12, %v2106_v31 }
 0x4ca   : > { %v2169_v49 = vsel %vm5275_vm11, %v2107_v44, %v2168_v42  ;;  %v2114_v17 = vrot.slane %v2094_v45, %v2106_v31  ;;  %v2121_v53 = vrot.slane %v4261_v5, %v2106_v31  ;;  %v2096_v54 = vpack.i.b16 %v2088_v46, %v2088_v46 }
 0x4cb   : > { %2170 = vst [vmem:[%s5130_s16] sm:$0x1] %v2169_v49  ;;  %v2100_v0 = vpack.i.b16 %v2092_v55, %v2092_v55  ;;  %v2142_v50 = vrot.slane %v2098_v35, %v2106_v31  ;;  %v2149_v14 = vrot.slane %v4263_v57, %v2106_v31  ;;  %v2181_v22 = vsel %vm5275_vm11, %v2135_v13, %v2180_v21 }
 0x4cc   : > { %v2172_v56 = vsel %vm5275_vm11, %v2114_v17, %v2171_v47  ;;  %v2175_v20 = vsel %vm5275_vm11, %v2121_v53, %v2174_v16  ;;  %v2128_v63 = vrot.slane %v2096_v54, %v2106_v31  ;;  %2182 = vst [vmem:[%s5130_s16 + $0x8] sm:$0x1] %v2181_v22 }
 0x4cd   : > { %2173 = vst [vmem:[%s5130_s16 + $0x2] sm:$0x1] %v2172_v56  ;;  %2176 = vst [vmem:[%s5130_s16 + $0x4] sm:$0x1] %v2175_v20  ;;  %v2156_v58 = vrot.slane %v2100_v0, %v2106_v31  ;;  %v2184_v28 = vsel %vm5275_vm11, %v2142_v50, %v2183_v61  ;;  %v2187_v1 = vsel %vm5275_vm11, %v2149_v14, %v2186_v62 }
 0x4ce   : > { %v2178_v60 = vsel %vm5275_vm11, %v2128_v63, %v2177_v34  ;;  %2185 = vst [vmem:[%s5130_s16 + $0xa] sm:$0x1] %v2184_v28  ;;  %2188 = vst [vmem:[%s5130_s16 + $0xc] sm:$0x1] %v2187_v1 }
 0x4cf   : > { %2179 = vst [vmem:[%s5130_s16 + $0x6] sm:$0x1] %v2178_v60  ;;  %v2190_v52 = vsel %vm5275_vm11, %v2156_v58, %v2189_v25 }
 0x4d0   : > { %2191 = vst [vmem:[%s5130_s16 + $0xe] sm:$0x1] %v2190_v52 }
 0x4d1 PF: > { %4434 = vmatprep.subr.bf16.mxu0 %v4563_v2  ;;  %v4264_v26 = vld [vmem:[%s5887_s9 + $0x4] sm:$0xf]  ;;  %4436 = vmatprep.mubr.msk.bf16.mxu0 %vm4564_vm1, %v4563_v2  ;;  %v4266_v57 = vld [vmem:[%s5888_s10 + $0x1] ss:$0 sm:$0xff] }
 0x4d2   : > { %v5318_v30 = vld [vmem:[%s5130_s16] sm:$0x1]  ;;  %v2309_v27 = vsel %vm1012_vm0, %v4264_v26, 0  ;;  %4440 = vmatprep.subr.bf16.mxu1 %v4563_v2  ;;  %4442 = vmatprep.mubr.msk.bf16.mxu1 %vm4564_vm1, %v4563_v2  ;;  %v4268_v63 = vld [vmem:[%s5889_s11 + $0x4] sm:$0xf] }
 0x4d3   : > { %v2232_v33 = vrot.slane %v5318_v30, %v5167_v51  ;;  %4435 = vmatpush3.bf16.msra.mxu0 %v2309_v27  ;;  %v5338_v37 = vld [vmem:[%s5130_s16 + $0x8] sm:$0x1]  ;;  %v2375_v35 = vsel %vm1012_vm0, %v4268_v63, 0  ;;  %v2200_v27 = vunpack.c.l.bf16 %v5318_v30 }
 0x4d4   : > { %v5321_v39 = vld [vmem:[%s5130_s16 + $0x2] sm:$0x1]  ;;  %v5325_v29 = vld [vmem:[%s5130_s16 + $0x4] sm:$0x1]  ;;  %v2260_v11 = vrot.slane %v5338_v37, %v5167_v51  ;;  %4441 = vmatpush3.bf16.msra.mxu1 %v2375_v35 }
 0x4d5   : > { %v2239_v36 = vrot.slane %v5321_v39, %v5167_v51  ;;  %v5341_v18 = vld [vmem:[%s5130_s16 + $0xa] sm:$0x1]  ;;  %v5344_v38 = vld [vmem:[%s5130_s16 + $0xc] sm:$0x1]  ;;  %v2246_v15 = vrot.slane %v5325_v29, %v5167_v51  ;;  %v2282_v7 = vunpack.c.l.b16 %v2232_v33  ;;  %v2201_v33 = vunpack.c.l.bf16 %v5321_v39 }
 0x4d6   : > { %v5328_v32 = vld [vmem:[%s5130_s16 + $0x6] sm:$0x1]  ;;  %v2267_v31 = vrot.slane %v5341_v18, %v5167_v51  ;;  %v2274_v59 = vrot.slane %v5344_v38, %v5167_v51  ;;  %v2286_v41 = vunpack.c.l.b16 %v2260_v11  ;;  %v2205_v39 = vunpack.c.l.bf16 %v5341_v18 }
 0x4d7   : > { %v2253_v3 = vrot.slane %v5328_v32, %v5167_v51  ;;  %v5351_v24 = vld [vmem:[%s5130_s16 + $0xe] sm:$0x1]  ;;  %v2283_v19 = vunpack.c.l.b16 %v2239_v36  ;;  %v2284_v8 = vunpack.c.l.b16 %v2246_v15  ;;  %v2290_v44 = vrot.slane %v2282_v7, 1 }
 0x4d8   : > { %v2281_v23 = vrot.slane %v5351_v24, %v5167_v51  ;;  %v2287_v42 = vunpack.c.l.b16 %v2267_v31  ;;  %v2288_v43 = vunpack.c.l.b16 %v2274_v59  ;;  %v2296_v16 = vrot.slane %v2286_v41, 5 }
 0x4d9   : > { %v2285_v40 = vunpack.c.l.b16 %v2253_v3  ;;  %v2292_v5 = vrot.slane %v2284_v8, 7  ;;  %v2291_v47 = vsel %vm1634_vm4, %v2283_v19, %v2290_v44  ;;  %v2202_v36 = vunpack.c.l.bf16 %v5325_v29  ;;  %v4270_v44 = vld [vmem:[%s5890_s12 + $0x1] ss:$0 sm:$0xff] }
 0x4da   : > { %v2289_v45 = vunpack.c.l.b16 %v2281_v23  ;;  %v2298_v48 = vrot.slane %v2287_v42, 4  ;;  %v2300_v17 = vrot.slane %v2288_v43, 3  ;;  %v2428_v15 = vrot.slane %v2200_v27, %v4708_v6 }
 0x4db   : > { %v2294_v46 = vrot.slane %v2285_v40, 6  ;;  %v2293_v49 = vsel %vm1637_vm5, %v2292_v5, %v2291_v47  ;;  %v2432_v3 = vrot.slane %v2201_v33, %v4708_v6  ;;  %v2203_v11 = vunpack.c.l.bf16 %v5328_v32 }
 0x4dc   : > { %v2302_v54 = vrot.slane %v2289_v45, 2  ;;  %v2436_v31 = vrot.slane %v2202_v36, %v4708_v6  ;;  %v2204_v7 = vunpack.c.l.bf16 %v5338_v37  ;;  %v2206_v8 = vunpack.c.l.bf16 %v5344_v38 }
 0x4dd   : > { %v2295_v53 = vsel %vm1640_vm6, %v2294_v46, %v2293_v49  ;;  %v2457_v59 = vsel %vm1634_vm4, %v2432_v3, %v2428_v15  ;;  %v2440_v23 = vrot.slane %v2203_v11, %v4708_v6  ;;  %v2448_v32 = vrot.slane %v2205_v39, %v4708_v6 }
 0x4de   : > { %v2297_v34 = vsel %vm1643_vm7, %v2296_v16, %v2295_v53  ;;  %v2458_v30 = vsel %vm1637_vm5, %v2436_v31, %v2457_v59  ;;  %v2444_v29 = vrot.slane %v2204_v7, %v4708_v6  ;;  %v2207_v41 = vunpack.c.l.bf16 %v5351_v24 }
 0x4df   : > { %v2299_v12 = vsel %vm1646_vm8, %v2298_v48, %v2297_v34  ;;  %v2459_v19 = vsel %vm1640_vm6, %v2440_v23, %v2458_v30  ;;  %v2452_v37 = vrot.slane %v2206_v8, %v4708_v6 }
 0x4e0   : > { %v2301_v55 = vsel %vm1649_vm9, %v2300_v17, %v2299_v12  ;;  %v2460_v40 = vsel %vm1643_vm7, %v2444_v29, %v2459_v19  ;;  %v2456_v43 = vrot.slane %v2207_v41, %v4708_v6 }
 0x4e1   : > { %v2303_v56 = vsel %vm1652_vm10, %v2302_v54, %v2301_v55  ;;  %v2461_v42 = vsel %vm1646_vm8, %v2448_v32, %v2460_v40 }
 0x4e2   : > { %v2304_v20 = vpack.c.b16 %v2303_v56, %v2303_v56  ;;  %v2462_v18 = vsel %vm1649_vm9, %v2452_v37, %v2461_v42 }
 0x4e3   : > { %v2463_v38 = vsel %vm1652_vm10, %v2456_v43, %v2462_v18 }
 0x4e4   : > { %4437 = vmatmul.mubr.msk.bf16.vlgmr.msra.gmra.mxu0 %vm1008_vm2, %v2304_v20 }
 0x5a4   : > { %v2345_v60 = vpop.f32.mrf.mxu0 }
 0x5a5   : > { %v2346_v13 = vadd.f32 %v4266_v57, %v2345_v60 }
 0x5a6   : > { %v4438_v0 = vpop.f32.mrf.mxu0 }
 0x5a7   : > { %v2352_v50 = vmul.f32 0.044715, %v2346_v13  ;;  %v2351_v1 = vmul.f32 0.5, %v2346_v13 }
 0x5a8   : > { %v2348_v14 = vpop.f32.mrf.mxu0 }
 0x5a9   : > { %v2353_v21 = vmul.f32 %v2352_v50, %v2346_v13 }
 0x5aa   : > { %v4439_v22 = vpop.f32.mrf.mxu0 }
 0x5ab   : > { %v2354_v58 = vmul.f32 %v2353_v21, %v2346_v13 }
 0x5ad   : > { %v2355_v61 = vadd.f32 %v2354_v58, %v2346_v13 }
 0x5af   : > { %v2356_v62 = vmul.f32 0.7978846, %v2355_v61 }
 0x5b1   : > { %4549 = vtanh.f32 %v2356_v62 }
 0x5be   : > { %v4550_v28 = vpop.eup %4549 }
 0x5bf   : > { %v2358_v25 = vadd.f32 1.0, %v4550_v28 }
 0x5c1   : > { %v2359_v52 = vmul.f32 %v2358_v25, %v2351_v1 }
 0x5c3   : > { %v2360_v26 = vpack.c.bf16 %v2359_v52, %v2359_v52 }
 0x5c5   : > { %4443 = vmatmul.mubr.msk.bf16.vlgmr.msra.gmra.mxu1 %vm1008_vm2, %v2360_v26 }
 0x685   : > { %v2411_v45 = vpop.f32.mrf.mxu1 }
 0x686   : > { %v2412_v5 = vadd.f32 %v4270_v44, %v2411_v45 }
 0x687   : > { %v4444_v46 = vpop.f32.mrf.mxu1  ;;  %2468 = sbr.rel (%p4252_p4) target bundleno = 1894 (0x766), region = 92 }
 0x688   : > { %v5403_v47 = vadd.f32 %v2463_v38, %v2412_v5 }
 0x689   : > { %v2414_v24 = vpop.f32.mrf.mxu1 }
 0x68b   : > { %v4445_v16 = vpop.f32.mrf.mxu1 }
 0x68c   : > { %v2470_v6 = vld [vmem:[%s5891_s13] sm:$0xf]  ;;  %v4572_v48 = vmov 0.0   ;;  %vm4573_vm12 = vmmov 0   ;;  %v2469_v17 = vpack.c.bf16 %v5403_v47, %v5403_v47  ;;  %v4574_v53 = vmov 1966171168  }
 0x68d   : > { %4446 = vmatprep.subr.bf16.mxu0 %v4572_v48  ;;  %v2482_v49 = vsel %vm1012_vm0, %v2470_v6, 0  ;;  %4448 = vmatprep.mubr.msk.bf16.mxu0 %vm4573_vm12, %v4572_v48  ;;  %v2532_v54 = vunpack.c.l.s4 %v4574_v53  ;;  %v4273_v12 = vld [vmem:[%s5892_s14] ss:$0 sm:$0xff]  ;;  %v4575_v56 = vmov 857870592   ;;  %vm2655_vm13 = vcmask 57344  }
 0x68e   : > { %4447 = vmatpush3.bf16.msra.mxu0 %v2482_v49  ;;  %v2592_v20 = vunpack.c.l.s4 %v4575_v56  ;;  %vm2656_vm14 = vsmask.f32 7938  ;;  %v2658_v3 = vld [vmem:[%s5130_s16] sm:$0x1]  ;;  %v2661_v23 = vld [vmem:[%s5130_s16 + $0x2] sm:$0x1] }
 0x68f   : > { %v2533_v34 = vunpack.c.0.s8 %v2532_v54  ;;  %vm5419_vm15 = vmand %vm2655_vm13, %vm2656_vm14  ;;  %v2664_v30 = vld [vmem:[%s5130_s16 + $0x4] sm:$0x1]  ;;  %v2667_v8 = vld [vmem:[%s5130_s16 + $0x6] sm:$0x1] }
 0x690   : > { %v2593_v0 = vunpack.c.0.s8 %v2592_v20  ;;  %v2670_v46 = vld [vmem:[%s5130_s16 + $0x8] sm:$0x1]  ;;  %v2673_v49 = vld [vmem:[%s5130_s16 + $0xa] sm:$0x1] }
 0x691   : > { %4449 = vmatmul.mubr.msk.bf16.vlgmr.msra.gmra.mxu0 %vm1008_vm2, %v2469_v17  ;;  %v2536_v35 = vsub.s32 %v2533_v34, %v4692_v4  ;;  %v2676_v17 = vld [vmem:[%s5130_s16 + $0xc] sm:$0x1]  ;;  %v2679_v34 = vld [vmem:[%s5130_s16 + $0xe] sm:$0x1] }
 0x692   : > { %v2596_v28 = vsub.s32 %v2593_v0, %v4692_v4 }
 0x751   : > { %v2518_v55 = vpop.f32.mrf.mxu0 }
 0x752   : > { %v2519_v63 = vadd.f32 %v4273_v12, %v2518_v55 }
 0x753   : > { %v4450_v57 = vpop.f32.mrf.mxu0 }
 0x754   : > { %v2525_v60 = vcombine.high %v2519_v63, %v2519_v63  ;;  %v2527_v13 = vpack.c.bf16 %v2519_v63, %v2519_v63 }
 0x755   : > { %v2521_v50 = vpop.f32.mrf.mxu0 }
 0x756   : > { %v2528_v14 = vpack.c.bf16 %v2525_v60, %v2525_v60  ;;  %v2537_v21 = vrot.slane %v2527_v13, %v2536_v35 }
 0x757   : > { %v4451_v22 = vpop.f32.mrf.mxu0 }
 0x758   : > { %v2538_v58 = vcombine.high %v2537_v21, %v2537_v21  ;;  %v2545_v61 = vrot.slane %v2537_v21, %v2536_v35  ;;  %v2559_v62 = vrot.slane %v2528_v14, %v2536_v35 }
 0x75a   : > { %v2552_v1 = vrot.slane %v2538_v58, %v2536_v35  ;;  %v2560_v25 = vcombine.high %v2559_v62, %v2559_v62  ;;  %v2576_v52 = vunpack.i.h.s16 %v2545_v61  ;;  %v4275_v26 = vpack.i.b16 %v2545_v61, %v2545_v61 }
 0x75b   : > { %v2567_v27 = vrot.slane %v2559_v62, %v2536_v35 }
 0x75c   : > { %v2578_v33 = vunpack.i.h.s16 %v2552_v1  ;;  %v2584_v36 = vpack.i.b16 %v2576_v52, %v2576_v52  ;;  %v2574_v11 = vrot.slane %v2560_v25, %v2536_v35  ;;  %v4276_v31 = vpack.i.b16 %v2552_v1, %v2552_v1 }
 0x75d   : > { %v2597_v59 = vrot.slane %v4275_v26, %v2596_v28  ;;  %v2580_v32 = vunpack.i.h.s16 %v2567_v27  ;;  %v4277_v43 = vpack.i.b16 %v2567_v27, %v2567_v27 }
 0x75e   : > { %v2586_v7 = vpack.i.b16 %v2578_v33, %v2578_v33  ;;  %v2604_v39 = vrot.slane %v2584_v36, %v2596_v28  ;;  %v2611_v29 = vrot.slane %v4276_v31, %v2596_v28  ;;  %v2582_v41 = vunpack.i.h.s16 %v2574_v11 }
 0x75f   : > { %v2659_v19 = vsel %vm5419_vm15, %v2597_v59, %v2658_v3  ;;  %v2588_v44 = vpack.i.b16 %v2580_v32, %v2580_v32  ;;  %v4278_v45 = vpack.i.b16 %v2574_v11, %v2574_v11  ;;  %v2625_v5 = vrot.slane %v4277_v43, %v2596_v28 }
 0x760   : > { %v2618_v40 = vrot.slane %v2586_v7, %v2596_v28  ;;  %2660 = vst [vmem:[%s5130_s16] sm:$0x1] %v2659_v19  ;;  %v2662_v37 = vsel %vm5419_vm15, %v2604_v39, %v2661_v23  ;;  %v2665_v42 = vsel %vm5419_vm15, %v2611_v29, %v2664_v30  ;;  %v2590_v38 = vpack.i.b16 %v2582_v41, %v2582_v41 }
 0x761   : > { %2663 = vst [vmem:[%s5130_s16 + $0x2] sm:$0x1] %v2662_v37  ;;  %2666 = vst [vmem:[%s5130_s16 + $0x4] sm:$0x1] %v2665_v42  ;;  %v2632_v24 = vrot.slane %v2588_v44, %v2596_v28  ;;  %v2639_v16 = vrot.slane %v4278_v45, %v2596_v28  ;;  %v2671_v6 = vsel %vm5419_vm15, %v2625_v5, %v2670_v46 }
 0x762   : > { %v2668_v18 = vsel %vm5419_vm15, %v2618_v40, %v2667_v8  ;;  %v2646_v48 = vrot.slane %v2590_v38, %v2596_v28  ;;  %2672 = vst [vmem:[%s5130_s16 + $0x8] sm:$0x1] %v2671_v6 }
 0x763   : > { %2669 = vst [vmem:[%s5130_s16 + $0x6] sm:$0x1] %v2668_v18  ;;  %v2674_v53 = vsel %vm5419_vm15, %v2632_v24, %v2673_v49  ;;  %v2677_v54 = vsel %vm5419_vm15, %v2639_v16, %v2676_v17 }
 0x764   : > { %2675 = vst [vmem:[%s5130_s16 + $0xa] sm:$0x1] %v2674_v53  ;;  %2678 = vst [vmem:[%s5130_s16 + $0xc] sm:$0x1] %v2677_v54  ;;  %v2680_v12 = vsel %vm5419_vm15, %v2646_v48, %v2679_v34 }
 0x765   : > { %2681 = vst [vmem:[%s5130_s16 + $0xe] sm:$0x1] %v2680_v12 }
 0x766 PF: > { %2684 = sbr.rel (%p4259_p5) target bundleno = 1921 (0x781), region = 96 }
 0x76b   : > { %v4576_v55 = vmov 1966171168   ;;  %v4577_v20 = vmov 857870592   ;;  %v2686_v35 = vcombine.high %v5403_v47, %v5403_v47  ;;  %v2688_v57 = vpack.c.bf16 %v5403_v47, %v5403_v47  ;;  %v2819_v26 = vld [vmem:[%s5130_s16] sm:$0x1] }
 0x76c   : > { %v2693_v56 = vunpack.c.l.s4 %v4576_v55  ;;  %v2753_v63 = vunpack.c.l.s4 %v4577_v20  ;;  %vm2816_vm3 = vcmask 57344   ;;  %vm2817_vm11 = vsmask.f32 7938  ;;  %v2822_v11 = vld [vmem:[%s5130_s16 + $0x2] sm:$0x1] }
 0x76d   : > { %v2689_v13 = vpack.c.bf16 %v2686_v35, %v2686_v35  ;;  %vm5463_vm12 = vmand %vm2816_vm3, %vm2817_vm11  ;;  %v2825_v31 = vld [vmem:[%s5130_s16 + $0x4] sm:$0x1]  ;;  %v2828_v29 = vld [vmem:[%s5130_s16 + $0x6] sm:$0x1] }
 0x76e   : > { %v2694_v60 = vunpack.c.0.s8 %v2693_v56  ;;  %v2754_v50 = vunpack.c.0.s8 %v2753_v63  ;;  %v2831_v5 = vld [vmem:[%s5130_s16 + $0x8] sm:$0x1]  ;;  %v2834_v16 = vld [vmem:[%s5130_s16 + $0xa] sm:$0x1]  ;;  %v2837_v6 = vld [vmem:[%s5130_s16 + $0xc] sm:$0x1] }
 0x76f   : > { %v2840_v17 = vld [vmem:[%s5130_s16 + $0xe] sm:$0x1] }
 0x770   : > { %v2697_v0 = vsub.s32 %v2694_v60, %v4692_v4  ;;  %v2757_v58 = vsub.s32 %v2754_v50, %v4692_v4 }
 0x772   : > { %v2698_v14 = vrot.slane %v2688_v57, %v2697_v0  ;;  %v2720_v21 = vrot.slane %v2689_v13, %v2697_v0 }
 0x774   : > { %v2706_v22 = vrot.slane %v2698_v14, %v2697_v0  ;;  %v2699_v61 = vcombine.high %v2698_v14, %v2698_v14  ;;  %v2721_v62 = vcombine.high %v2720_v21, %v2720_v21  ;;  %v2728_v28 = vrot.slane %v2720_v21, %v2697_v0 }
 0x776   : > { %v4280_v1 = vpack.i.b16 %v2706_v22, %v2706_v22  ;;  %v2737_v47 = vunpack.i.h.s16 %v2706_v22  ;;  %v2713_v25 = vrot.slane %v2699_v61, %v2697_v0  ;;  %v2735_v27 = vrot.slane %v2721_v62, %v2697_v0 }
 0x777   : > { %v2741_v59 = vunpack.i.h.s16 %v2728_v28  ;;  %v4282_v19 = vpack.i.b16 %v2728_v28, %v2728_v28 }
 0x778   : > { %v2758_v33 = vrot.slane %v4280_v1, %v2757_v58  ;;  %v2745_v36 = vpack.i.b16 %v2737_v47, %v2737_v47  ;;  %v4281_v15 = vpack.i.b16 %v2713_v25, %v2713_v25  ;;  %v2739_v3 = vunpack.i.h.s16 %v2713_v25 }
 0x779   : > { %v2743_v8 = vunpack.i.h.s16 %v2735_v27  ;;  %v2749_v37 = vpack.i.b16 %v2741_v59, %v2741_v59  ;;  %v4283_v42 = vpack.i.b16 %v2735_v27, %v2735_v27  ;;  %v2786_v18 = vrot.slane %v4282_v19, %v2757_v58 }
 0x77a   : > { %v2820_v7 = vsel %vm5463_vm12, %v2758_v33, %v2819_v26  ;;  %v2765_v23 = vrot.slane %v2745_v36, %v2757_v58  ;;  %v2772_v30 = vrot.slane %v4281_v15, %v2757_v58  ;;  %v2747_v39 = vpack.i.b16 %v2739_v3, %v2739_v3 }
 0x77b   : > { %2821 = vst [vmem:[%s5130_s16] sm:$0x1] %v2820_v7  ;;  %v2751_v44 = vpack.i.b16 %v2743_v8, %v2743_v8  ;;  %v2793_v45 = vrot.slane %v2749_v37, %v2757_v58  ;;  %v2800_v38 = vrot.slane %v4283_v42, %v2757_v58  ;;  %v2832_v46 = vsel %vm5463_vm12, %v2786_v18, %v2831_v5 }
 0x77c   : > { %v2823_v32 = vsel %vm5463_vm12, %v2765_v23, %v2822_v11  ;;  %v2826_v40 = vsel %vm5463_vm12, %v2772_v30, %v2825_v31  ;;  %v2779_v41 = vrot.slane %v2747_v39, %v2757_v58  ;;  %2833 = vst [vmem:[%s5130_s16 + $0x8] sm:$0x1] %v2832_v46 }
 0x77d   : > { %2824 = vst [vmem:[%s5130_s16 + $0x2] sm:$0x1] %v2823_v32  ;;  %2827 = vst [vmem:[%s5130_s16 + $0x4] sm:$0x1] %v2826_v40  ;;  %v2807_v24 = vrot.slane %v2751_v44, %v2757_v58  ;;  %v2835_v48 = vsel %vm5463_vm12, %v2793_v45, %v2834_v16  ;;  %v2838_v49 = vsel %vm5463_vm12, %v2800_v38, %v2837_v6 }
 0x77e   : > { %v2829_v43 = vsel %vm5463_vm12, %v2779_v41, %v2828_v29  ;;  %2836 = vst [vmem:[%s5130_s16 + $0xa] sm:$0x1] %v2835_v48  ;;  %2839 = vst [vmem:[%s5130_s16 + $0xc] sm:$0x1] %v2838_v49 }
 0x77f   : > { %2830 = vst [vmem:[%s5130_s16 + $0x6] sm:$0x1] %v2829_v43  ;;  %v2841_v53 = vsel %vm5463_vm12, %v2807_v24, %v2840_v17 }
 0x780   : > { %2842 = vst [vmem:[%s5130_s16 + $0xe] sm:$0x1] %v2841_v53 }
 0x781 PF: > { %4452 = vmatprep.subr.bf16.mxu0 %v4563_v2  ;;  %v4284_v54 = vld [vmem:[%s5887_s9 + $0x8] sm:$0xf]  ;;  %4454 = vmatprep.mubr.msk.bf16.mxu0 %vm4564_vm1, %v4563_v2  ;;  %v5506_v34 = vld [vmem:[%s5130_s16] sm:$0x2]  ;;  %v5509_v12 = vld [vmem:[%s5130_s16 + $0x2] sm:$0x2] }
 0x782   : > { %v2960_v55 = vsel %vm1012_vm0, %v4284_v54, 0  ;;  %v5513_v56 = vld [vmem:[%s5130_s16 + $0x4] sm:$0x2]  ;;  %v5516_v20 = vld [vmem:[%s5130_s16 + $0x6] sm:$0x2]  ;;  %v2883_v63 = vrot.slane %v5506_v34, %v5167_v51  ;;  %v2890_v35 = vrot.slane %v5509_v12, %v5167_v51  ;;  %4458 = vmatprep.subr.bf16.mxu1 %v4563_v2  ;;  %4460 = vmatprep.mubr.msk.bf16.mxu1 %vm4564_vm1, %v4563_v2  ;;  %v2851_v54 = vunpack.c.l.bf16 %v5506_v34 }
 0x783   : > { %4453 = vmatpush3.bf16.msra.mxu0 %v2960_v55  ;;  %v5526_v57 = vld [vmem:[%s5130_s16 + $0x8] sm:$0x2]  ;;  %v5529_v60 = vld [vmem:[%s5130_s16 + $0xa] sm:$0x2]  ;;  %v5532_v13 = vld [vmem:[%s5130_s16 + $0xc] sm:$0x2]  ;;  %v2897_v0 = vrot.slane %v5513_v56, %v5167_v51  ;;  %v2904_v50 = vrot.slane %v5516_v20, %v5167_v51  ;;  %v2852_v55 = vunpack.c.l.bf16 %v5509_v12 }
 0x784   : > { %v5539_v14 = vld [vmem:[%s5130_s16 + $0xe] sm:$0x2]  ;;  %v2911_v21 = vrot.slane %v5526_v57, %v5167_v51  ;;  %v2918_v22 = vrot.slane %v5529_v60, %v5167_v51  ;;  %v2925_v58 = vrot.slane %v5532_v13, %v5167_v51  ;;  %v2933_v61 = vunpack.c.l.b16 %v2883_v63  ;;  %v4288_v40 = vld [vmem:[%s5889_s11 + $0x8] sm:$0xf]  ;;  %v4286_v37 = vld [vmem:[%s5888_s10 + $0x2] ss:$0 sm:$0xff] }
 0x785   : > { %v2932_v62 = vrot.slane %v5539_v14, %v5167_v51  ;;  %v2934_v28 = vunpack.c.l.b16 %v2890_v35  ;;  %v2935_v1 = vunpack.c.l.b16 %v2897_v0  ;;  %v2936_v47 = vunpack.c.l.b16 %v2904_v50 }
 0x786   : > { %v2937_v25 = vunpack.c.l.b16 %v2911_v21  ;;  %v2938_v52 = vunpack.c.l.b16 %v2918_v22  ;;  %v2939_v26 = vunpack.c.l.b16 %v2925_v58  ;;  %v2941_v27 = vrot.slane %v2933_v61, 2 }
 0x787   : > { %v2940_v33 = vunpack.c.l.b16 %v2932_v62  ;;  %v2942_v36 = vrot.slane %v2934_v28, 1  ;;  %v2945_v15 = vrot.slane %v2936_v47, 7  ;;  %v3026_v41 = vsel %vm1012_vm0, %v4288_v40, 0 }
 0x788   : > { %v2947_v3 = vrot.slane %v2937_v25, 6  ;;  %v2949_v31 = vrot.slane %v2938_v52, 5  ;;  %v2951_v7 = vrot.slane %v2939_v26, 4  ;;  %4459 = vmatpush3.bf16.msra.mxu1 %v3026_v41  ;;  %v2853_v63 = vunpack.c.l.bf16 %v5513_v56  ;;  %v4290_v26 = vld [vmem:[%s5890_s12 + $0x2] ss:$0 sm:$0xff] }
 0x789   : > { %v2943_v11 = vsel %vm1634_vm4, %v2942_v36, %v2941_v27  ;;  %v2953_v30 = vrot.slane %v2940_v33, 3  ;;  %v3079_v35 = vrot.slane %v2851_v54, %v4713_v9  ;;  %v3083_v0 = vrot.slane %v2852_v55, %v4713_v9 }
 0x78a   : > { %v2944_v59 = vsel %vm1637_vm5, %v2935_v1, %v2943_v11  ;;  %v2854_v50 = vunpack.c.l.bf16 %v5516_v20  ;;  %v3087_v21 = vrot.slane %v2853_v63, %v4713_v9  ;;  %v2855_v58 = vunpack.c.l.bf16 %v5526_v57 }
 0x78b   : > { %v2946_v23 = vsel %vm1640_vm6, %v2945_v15, %v2944_v59  ;;  %v3108_v22 = vsel %vm1634_vm4, %v3083_v0, %v3079_v35  ;;  %v2856_v12 = vunpack.c.l.bf16 %v5529_v60  ;;  %v2857_v28 = vunpack.c.l.bf16 %v5532_v13 }
 0x78c   : > { %v2948_v39 = vsel %vm1643_vm7, %v2947_v3, %v2946_v23  ;;  %v3091_v61 = vrot.slane %v2854_v50, %v4713_v9  ;;  %v3109_v34 = vsel %vm1637_vm5, %v3087_v21, %v3108_v22  ;;  %v3095_v56 = vrot.slane %v2855_v58, %v4713_v9 }
 0x78d   : > { %v2950_v29 = vsel %vm1646_vm8, %v2949_v31, %v2948_v39  ;;  %v3099_v20 = vrot.slane %v2856_v12, %v4713_v9  ;;  %v2858_v47 = vunpack.c.l.bf16 %v5539_v14  ;;  %v3103_v57 = vrot.slane %v2857_v28, %v4713_v9 }
 0x78e   : > { %v2952_v19 = vsel %vm1649_vm9, %v2951_v7, %v2950_v29  ;;  %v3110_v62 = vsel %vm1640_vm6, %v3091_v61, %v3109_v34 }
 0x78f   : > { %v2954_v8 = vsel %vm1652_vm10, %v2953_v30, %v2952_v19  ;;  %v3111_v1 = vsel %vm1643_vm7, %v3095_v56, %v3110_v62  ;;  %v3107_v52 = vrot.slane %v2858_v47, %v4713_v9 }
 0x790   : > { %v2955_v32 = vpack.c.b16 %v2954_v8, %v2954_v8  ;;  %v3112_v25 = vsel %vm1646_vm8, %v3099_v20, %v3111_v1 }
 0x791   : > { %v3113_v60 = vsel %vm1649_vm9, %v3103_v57, %v3112_v25 }
 0x792   : > { %4455 = vmatmul.mubr.msk.bf16.vlgmr.msra.gmra.mxu0 %vm1008_vm2, %v2955_v32  ;;  %v3114_v13 = vsel %vm1652_vm10, %v3107_v52, %v3113_v60 }
 0x852   : > { %v2996_v42 = vpop.f32.mrf.mxu0 }
 0x853   : > { %v2997_v43 = vadd.f32 %v4286_v37, %v2996_v42 }
 0x854   : > { %v4456_v18 = vpop.f32.mrf.mxu0 }
 0x855   : > { %v3003_v44 = vmul.f32 0.044715, %v2997_v43  ;;  %v3002_v48 = vmul.f32 0.5, %v2997_v43 }
 0x856   : > { %v2999_v45 = vpop.f32.mrf.mxu0 }
 0x857   : > { %v3004_v38 = vmul.f32 %v3003_v44, %v2997_v43 }
 0x858   : > { %v4457_v5 = vpop.f32.mrf.mxu0 }
 0x859   : > { %v3005_v46 = vmul.f32 %v3004_v38, %v2997_v43 }
 0x85b   : > { %v3006_v24 = vadd.f32 %v3005_v46, %v2997_v43 }
 0x85d   : > { %v3007_v16 = vmul.f32 0.7978846, %v3006_v24 }
 0x85f   : > { %4551 = vtanh.f32 %v3007_v16 }
 0x86c   : > { %v4552_v6 = vpop.eup %4551 }
 0x86d   : > { %v3009_v49 = vadd.f32 1.0, %v4552_v6 }
 0x86f   : > { %v3010_v17 = vmul.f32 %v3009_v49, %v3002_v48 }
 0x871   : > { %v3011_v53 = vpack.c.bf16 %v3010_v17, %v3010_v17 }
 0x873   : > { %4461 = vmatmul.mubr.msk.bf16.vlgmr.msra.gmra.mxu1 %vm1008_vm2, %v3011_v53 }
 0x933   : > { %v3062_v27 = vpop.f32.mrf.mxu1 }
 0x934   : > { %v3063_v33 = vadd.f32 %v4290_v26, %v3062_v27 }
 0x935   : > { %v4462_v36 = vpop.f32.mrf.mxu1  ;;  %3119 = sbr.rel (%p4252_p4) target bundleno = 2580 (0xa14), region = 100 }
 0x936   : > { %v5591_v15 = vadd.f32 %v3114_v13, %v3063_v33 }
 0x937   : > { %v3065_v14 = vpop.f32.mrf.mxu1 }
 0x939   : > { %v4463_v3 = vpop.f32.mrf.mxu1 }
 0x93a   : > { %v3121_v9 = vld [vmem:[%s5891_s13] sm:$0xf]  ;;  %v4578_v11 = vmov 0.0   ;;  %vm4579_vm13 = vmmov 0   ;;  %v3120_v59 = vpack.c.bf16 %v5591_v15, %v5591_v15  ;;  %v4580_v7 = vmov 1966171168  }
 0x93b   : > { %4464 = vmatprep.subr.bf16.mxu0 %v4578_v11  ;;  %v3133_v31 = vsel %vm1012_vm0, %v3121_v9, 0  ;;  %4466 = vmatprep.mubr.msk.bf16.mxu0 %vm4579_vm13, %v4578_v11  ;;  %v3183_v23 = vunpack.c.l.s4 %v4580_v7  ;;  %v4293_v39 = vld [vmem:[%s5892_s14] ss:$0 sm:$0xff]  ;;  %v4581_v19 = vmov 857870592   ;;  %vm3306_vm14 = vcmask 58369  }
 0x93c   : > { %4465 = vmatpush3.bf16.msra.mxu0 %v3133_v31  ;;  %v3243_v8 = vunpack.c.l.s4 %v4581_v19  ;;  %vm3307_vm15 = vsmask.f32 1280  ;;  %v3309_v35 = vld [vmem:[%s5130_s16] sm:$0x2]  ;;  %v3312_v58 = vld [vmem:[%s5130_s16 + $0x2] sm:$0x2] }
 0x93d   : > { %v3184_v30 = vunpack.c.0.s8 %v3183_v23  ;;  %vm5607_vm3 = vmand %vm3306_vm14, %vm3307_vm15  ;;  %v3315_v61 = vld [vmem:[%s5130_s16 + $0x4] sm:$0x2]  ;;  %v3318_v62 = vld [vmem:[%s5130_s16 + $0x6] sm:$0x2] }
 0x93e   : > { %v3244_v43 = vunpack.c.0.s8 %v3243_v8  ;;  %v3321_v33 = vld [vmem:[%s5130_s16 + $0x8] sm:$0x2]  ;;  %v3324_v11 = vld [vmem:[%s5130_s16 + $0xa] sm:$0x2]  ;;  %v3327_v31 = vld [vmem:[%s5130_s16 + $0xc] sm:$0x2] }
 0x93f   : > { %4467 = vmatmul.mubr.msk.bf16.vlgmr.msra.gmra.mxu0 %vm1008_vm2, %v3120_v59  ;;  %v3187_v40 = vsub.s32 %v3184_v30, %v4692_v4  ;;  %v3330_v23 = vld [vmem:[%s5130_s16 + $0xe] sm:$0x2] }
 0x940   : > { %v3247_v16 = vsub.s32 %v3244_v43, %v4692_v4 }
 0x9ff   : > { %v3169_v29 = vpop.f32.mrf.mxu0 }
 0xa00   : > { %v3170_v32 = vadd.f32 %v4293_v39, %v3169_v29 }
 0xa01   : > { %v4468_v41 = vpop.f32.mrf.mxu0 }
 0xa02   : > { %v3176_v37 = vcombine.high %v3170_v32, %v3170_v32  ;;  %v3178_v42 = vpack.c.bf16 %v3170_v32, %v3170_v32 }
 0xa03   : > { %v3172_v18 = vpop.f32.mrf.mxu0 }
 0xa04   : > { %v3179_v44 = vpack.c.bf16 %v3176_v37, %v3176_v37  ;;  %v3188_v45 = vrot.slane %v3178_v42, %v3187_v40 }
 0xa05   : > { %v4469_v38 = vpop.f32.mrf.mxu0 }
 0xa06   : > { %v3189_v5 = vcombine.high %v3188_v45, %v3188_v45  ;;  %v3196_v46 = vrot.slane %v3188_v45, %v3187_v40  ;;  %v3210_v24 = vrot.slane %v3179_v44, %v3187_v40 }
 0xa08   : > { %v3203_v6 = vrot.slane %v3189_v5, %v3187_v40  ;;  %v3211_v48 = vcombine.high %v3210_v24, %v3210_v24  ;;  %v3227_v49 = vunpack.i.h.s16 %v3196_v46  ;;  %v4295_v17 = vpack.i.b16 %v3196_v46, %v3196_v46 }
 0xa09   : > { %v3218_v53 = vrot.slane %v3210_v24, %v3187_v40 }
 0xa0a   : > { %v3229_v54 = vunpack.i.h.s16 %v3203_v6  ;;  %v3235_v55 = vpack.i.b16 %v3227_v49, %v3227_v49  ;;  %v3225_v0 = vrot.slane %v3211_v48, %v3187_v40  ;;  %v4296_v50 = vpack.i.b16 %v3203_v6, %v3203_v6 }
 0xa0b   : > { %v3248_v21 = vrot.slane %v4295_v17, %v3247_v16  ;;  %v3231_v28 = vunpack.i.h.s16 %v3218_v53  ;;  %v4297_v25 = vpack.i.b16 %v3218_v53, %v3218_v53 }
 0xa0c   : > { %v3237_v22 = vpack.i.b16 %v3229_v54, %v3229_v54  ;;  %v3255_v34 = vrot.slane %v3235_v55, %v3247_v16  ;;  %v3262_v12 = vrot.slane %v4296_v50, %v3247_v16  ;;  %v3233_v1 = vunpack.i.h.s16 %v3225_v0 }
 0xa0d   : > { %v3310_v56 = vsel %vm5607_vm3, %v3248_v21, %v3309_v35  ;;  %v3239_v60 = vpack.i.b16 %v3231_v28, %v3231_v28  ;;  %v4298_v26 = vpack.i.b16 %v3225_v0, %v3225_v0  ;;  %v3276_v13 = vrot.slane %v4297_v25, %v3247_v16 }
 0xa0e   : > { %v3269_v20 = vrot.slane %v3237_v22, %v3247_v16  ;;  %3311 = vst [vmem:[%s5130_s16] sm:$0x2] %v3310_v56  ;;  %v3313_v47 = vsel %vm5607_vm3, %v3255_v34, %v3312_v58  ;;  %v3316_v57 = vsel %vm5607_vm3, %v3262_v12, %v3315_v61  ;;  %v3241_v27 = vpack.i.b16 %v3233_v1, %v3233_v1 }
 0xa0f   : > { %3314 = vst [vmem:[%s5130_s16 + $0x2] sm:$0x2] %v3313_v47  ;;  %3317 = vst [vmem:[%s5130_s16 + $0x4] sm:$0x2] %v3316_v57  ;;  %v3283_v36 = vrot.slane %v3239_v60, %v3247_v16  ;;  %v3290_v14 = vrot.slane %v4298_v26, %v3247_v16  ;;  %v3322_v3 = vsel %vm5607_vm3, %v3276_v13, %v3321_v33 }
 0xa10   : > { %v3319_v52 = vsel %vm5607_vm3, %v3269_v20, %v3318_v62  ;;  %v3297_v9 = vrot.slane %v3241_v27, %v3247_v16  ;;  %3323 = vst [vmem:[%s5130_s16 + $0x8] sm:$0x2] %v3322_v3 }
 0xa11   : > { %3320 = vst [vmem:[%s5130_s16 + $0x6] sm:$0x2] %v3319_v52  ;;  %v3325_v59 = vsel %vm5607_vm3, %v3283_v36, %v3324_v11  ;;  %v3328_v7 = vsel %vm5607_vm3, %v3290_v14, %v3327_v31 }
 0xa12   : > { %3326 = vst [vmem:[%s5130_s16 + $0xa] sm:$0x2] %v3325_v59  ;;  %3329 = vst [vmem:[%s5130_s16 + $0xc] sm:$0x2] %v3328_v7  ;;  %v3331_v30 = vsel %vm5607_vm3, %v3297_v9, %v3330_v23 }
 0xa13   : > { %3332 = vst [vmem:[%s5130_s16 + $0xe] sm:$0x2] %v3331_v30 }
 0xa14 PF: > { %3335 = sbr.rel (%p4259_p5) target bundleno = 2607 (0xa2f), region = 104 }
 0xa19   : > { %v4582_v39 = vmov 1966171168   ;;  %v4583_v19 = vmov 857870592   ;;  %v3337_v32 = vcombine.high %v5591_v15, %v5591_v15  ;;  %v3339_v40 = vpack.c.bf16 %v5591_v15, %v5591_v15  ;;  %v3470_v49 = vld [vmem:[%s5130_s16] sm:$0x2] }
 0xa1a   : > { %v3344_v29 = vunpack.c.l.s4 %v4582_v39  ;;  %v3404_v8 = vunpack.c.l.s4 %v4583_v19  ;;  %vm3467_vm11 = vcmask 58369   ;;  %vm3468_vm12 = vsmask.f32 1280  ;;  %v3473_v35 = vld [vmem:[%s5130_s16 + $0x2] sm:$0x2] }
 0xa1b   : > { %v3340_v37 = vpack.c.bf16 %v3337_v32, %v3337_v32  ;;  %vm5651_vm13 = vmand %vm3467_vm11, %vm3468_vm12  ;;  %v3476_v0 = vld [vmem:[%s5130_s16 + $0x4] sm:$0x2]  ;;  %v3479_v34 = vld [vmem:[%s5130_s16 + $0x6] sm:$0x2] }
 0xa1c   : > { %v3345_v41 = vunpack.c.0.s8 %v3344_v29  ;;  %v3405_v43 = vunpack.c.0.s8 %v3404_v8  ;;  %v3482_v27 = vld [vmem:[%s5130_s16 + $0x8] sm:$0x2]  ;;  %v3485_v36 = vld [vmem:[%s5130_s16 + $0xa] sm:$0x2]  ;;  %v3488_v14 = vld [vmem:[%s5130_s16 + $0xc] sm:$0x2] }
 0xa1d   : > { %v3491_v11 = vld [vmem:[%s5130_s16 + $0xe] sm:$0x2] }
 0xa1e   : > { %v3348_v42 = vsub.s32 %v3345_v41, %v4692_v4  ;;  %v3408_v38 = vsub.s32 %v3405_v43, %v4692_v4 }
 0xa20   : > { %v3349_v18 = vrot.slane %v3339_v40, %v3348_v42  ;;  %v3371_v44 = vrot.slane %v3340_v37, %v3348_v42 }
 0xa22   : > { %v3357_v45 = vrot.slane %v3349_v18, %v3348_v42  ;;  %v3350_v5 = vcombine.high %v3349_v18, %v3349_v18  ;;  %v3372_v46 = vcombine.high %v3371_v44, %v3371_v44  ;;  %v3379_v24 = vrot.slane %v3371_v44, %v3348_v42 }
 0xa24   : > { %v4300_v16 = vpack.i.b16 %v3357_v45, %v3357_v45  ;;  %v3388_v15 = vunpack.i.h.s16 %v3357_v45  ;;  %v3364_v6 = vrot.slane %v3350_v5, %v3348_v42  ;;  %v3386_v17 = vrot.slane %v3372_v46, %v3348_v42 }
 0xa25   : > { %v3392_v50 = vunpack.i.h.s16 %v3379_v24  ;;  %v4302_v12 = vpack.i.b16 %v3379_v24, %v3379_v24 }
 0xa26   : > { %v3409_v53 = vrot.slane %v4300_v16, %v3408_v38  ;;  %v3396_v54 = vpack.i.b16 %v3388_v15, %v3388_v15  ;;  %v4301_v55 = vpack.i.b16 %v3364_v6, %v3364_v6  ;;  %v3390_v63 = vunpack.i.h.s16 %v3364_v6 }
 0xa27   : > { %v3394_v56 = vunpack.i.h.s16 %v3386_v17  ;;  %v3400_v1 = vpack.i.b16 %v3392_v50, %v3392_v50  ;;  %v4303_v47 = vpack.i.b16 %v3386_v17, %v3386_v17  ;;  %v3437_v25 = vrot.slane %v4302_v12, %v3408_v38 }
 0xa28   : > { %v3471_v21 = vsel %vm5651_vm13, %v3409_v53, %v3470_v49  ;;  %v3416_v22 = vrot.slane %v3396_v54, %v3408_v38  ;;  %v3423_v58 = vrot.slane %v4301_v55, %v3408_v38  ;;  %v3398_v61 = vpack.i.b16 %v3390_v63, %v3390_v63 }
 0xa29   : > { %3472 = vst [vmem:[%s5130_s16] sm:$0x2] %v3471_v21  ;;  %v3402_v52 = vpack.i.b16 %v3394_v56, %v3394_v56  ;;  %v3444_v60 = vrot.slane %v3400_v1, %v3408_v38  ;;  %v3451_v26 = vrot.slane %v4303_v47, %v3408_v38  ;;  %v3483_v13 = vsel %vm5651_vm13, %v3437_v25, %v3482_v27 }
 0xa2a   : > { %v3474_v62 = vsel %vm5651_vm13, %v3416_v22, %v3473_v35  ;;  %v3477_v28 = vsel %vm5651_vm13, %v3423_v58, %v3476_v0  ;;  %v3430_v20 = vrot.slane %v3398_v61, %v3408_v38  ;;  %3484 = vst [vmem:[%s5130_s16 + $0x8] sm:$0x2] %v3483_v13 }
 0xa2b   : > { %3475 = vst [vmem:[%s5130_s16 + $0x2] sm:$0x2] %v3474_v62  ;;  %3478 = vst [vmem:[%s5130_s16 + $0x4] sm:$0x2] %v3477_v28  ;;  %v3458_v33 = vrot.slane %v3402_v52, %v3408_v38  ;;  %v3486_v3 = vsel %vm5651_vm13, %v3444_v60, %v3485_v36  ;;  %v3489_v9 = vsel %vm5651_vm13, %v3451_v26, %v3488_v14 }
 0xa2c   : > { %v3480_v57 = vsel %vm5651_vm13, %v3430_v20, %v3479_v34  ;;  %3487 = vst [vmem:[%s5130_s16 + $0xa] sm:$0x2] %v3486_v3  ;;  %3490 = vst [vmem:[%s5130_s16 + $0xc] sm:$0x2] %v3489_v9 }
 0xa2d   : > { %3481 = vst [vmem:[%s5130_s16 + $0x6] sm:$0x2] %v3480_v57  ;;  %v3492_v31 = vsel %vm5651_vm13, %v3458_v33, %v3491_v11 }
 0xa2e   : > { %3493 = vst [vmem:[%s5130_s16 + $0xe] sm:$0x2] %v3492_v31 }
 0xa2f PF: > { %4470 = vmatprep.subr.bf16.mxu0 %v4563_v2  ;;  %v4304_v59 = vld [vmem:[%s5887_s9 + $0xc] sm:$0xf]  ;;  %4472 = vmatprep.mubr.msk.bf16.mxu0 %vm4564_vm1, %v4563_v2  ;;  %v4306_v62 = vld [vmem:[%s5888_s10 + $0x3] ss:$0 sm:$0xff] }
 0xa30   : > { %v5694_v7 = vld [vmem:[%s5130_s16] sm:$0x2]  ;;  %v3611_v30 = vsel %vm1012_vm0, %v4304_v59, 0  ;;  %4476 = vmatprep.subr.bf16.mxu1 %v4563_v2  ;;  %4478 = vmatprep.mubr.msk.bf16.mxu1 %vm4564_vm1, %v4563_v2  ;;  %v4308_v12 = vld [vmem:[%s5889_s11 + $0xc] sm:$0xf] }
 0xa31   : > { %v3534_v19 = vrot.slane %v5694_v7, %v5167_v51  ;;  %4471 = vmatpush3.bf16.msra.mxu0 %v3611_v30  ;;  %v5714_v32 = vld [vmem:[%s5130_s16 + $0x8] sm:$0x2]  ;;  %v3677_v56 = vsel %vm1012_vm0, %v4308_v12, 0  ;;  %v3502_v9 = vunpack.c.l.bf16 %v5694_v7 }
 0xa32   : > { %v5697_v23 = vld [vmem:[%s5130_s16 + $0x2] sm:$0x2]  ;;  %v5701_v39 = vld [vmem:[%s5130_s16 + $0x4] sm:$0x2]  ;;  %v3562_v18 = vrot.slane %v5714_v32, %v5167_v51  ;;  %4477 = vmatpush3.bf16.msra.mxu1 %v3677_v56 }
 0xa33   : > { %v3541_v8 = vrot.slane %v5697_v23, %v5167_v51  ;;  %v5717_v40 = vld [vmem:[%s5130_s16 + $0xa] sm:$0x2]  ;;  %v5720_v41 = vld [vmem:[%s5130_s16 + $0xc] sm:$0x2]  ;;  %v3548_v37 = vrot.slane %v5701_v39, %v5167_v51  ;;  %v3584_v45 = vunpack.c.l.b16 %v3534_v19  ;;  %v3503_v11 = vunpack.c.l.bf16 %v5697_v23 }
 0xa34   : > { %v5704_v29 = vld [vmem:[%s5130_s16 + $0x6] sm:$0x2]  ;;  %v3569_v2 = vrot.slane %v5717_v40, %v5167_v51  ;;  %v3576_v44 = vrot.slane %v5720_v41, %v5167_v51  ;;  %v3588_v24 = vunpack.c.l.b16 %v3562_v18  ;;  %v3504_v31 = vunpack.c.l.bf16 %v5701_v39 }
 0xa35   : > { %v3555_v42 = vrot.slane %v5704_v29, %v5167_v51  ;;  %v5727_v43 = vld [vmem:[%s5130_s16 + $0xe] sm:$0x2]  ;;  %v3585_v5 = vunpack.c.l.b16 %v3541_v8  ;;  %v3586_v46 = vunpack.c.l.b16 %v3548_v37  ;;  %v3592_v6 = vrot.slane %v3584_v45, 3 }
 0xa36   : > { %v3583_v38 = vrot.slane %v5727_v43, %v5167_v51  ;;  %v3589_v16 = vunpack.c.l.b16 %v3569_v2  ;;  %v3590_v15 = vunpack.c.l.b16 %v3576_v44  ;;  %v3598_v54 = vrot.slane %v3588_v24, 7  ;;  %v4310_v24 = vld [vmem:[%s5890_s12 + $0x3] ss:$0 sm:$0xff] }
 0xa37   : > { %v3587_v48 = vunpack.c.l.b16 %v3555_v42  ;;  %v3593_v17 = vrot.slane %v3585_v5, 2  ;;  %v3595_v53 = vrot.slane %v3586_v46, 1  ;;  %v3730_v59 = vrot.slane %v3502_v9, %v4716_v10 }
 0xa38   : > { %v3591_v49 = vunpack.c.l.b16 %v3583_v38  ;;  %v3600_v63 = vrot.slane %v3589_v16, 6  ;;  %v3602_v0 = vrot.slane %v3590_v15, 5  ;;  %v3734_v30 = vrot.slane %v3503_v11, %v4716_v10 }
 0xa39   : > { %v3594_v55 = vsel %vm1634_vm4, %v3593_v17, %v3592_v6  ;;  %v3505_v19 = vunpack.c.l.bf16 %v5704_v29  ;;  %v3738_v8 = vrot.slane %v3504_v31, %v4716_v10  ;;  %v3506_v42 = vunpack.c.l.bf16 %v5714_v32 }
 0xa3a   : > { %v3596_v35 = vsel %vm1637_vm5, %v3595_v53, %v3594_v55  ;;  %v3604_v51 = vrot.slane %v3591_v49, 4  ;;  %v3759_v37 = vsel %vm1634_vm4, %v3734_v30, %v3730_v59  ;;  %v3507_v23 = vunpack.c.l.bf16 %v5717_v40 }
 0xa3b   : > { %v3597_v50 = vsel %vm1640_vm6, %v3587_v48, %v3596_v35  ;;  %v3742_v18 = vrot.slane %v3505_v19, %v4716_v10  ;;  %v3760_v7 = vsel %vm1637_vm5, %v3738_v8, %v3759_v37  ;;  %v3746_v39 = vrot.slane %v3506_v42, %v4716_v10 }
 0xa3c   : > { %v3599_v21 = vsel %vm1643_vm7, %v3598_v54, %v3597_v50  ;;  %v3508_v44 = vunpack.c.l.bf16 %v5720_v41  ;;  %v3750_v29 = vrot.slane %v3507_v23, %v4716_v10  ;;  %v3509_v38 = vunpack.c.l.bf16 %v5727_v43 }
 0xa3d   : > { %v3601_v22 = vsel %vm1646_vm8, %v3600_v63, %v3599_v21  ;;  %v3761_v2 = vsel %vm1640_vm6, %v3742_v18, %v3760_v7 }
 0xa3e   : > { %v3603_v58 = vsel %vm1649_vm9, %v3602_v0, %v3601_v22  ;;  %v3762_v45 = vsel %vm1643_vm7, %v3746_v39, %v3761_v2  ;;  %v3754_v32 = vrot.slane %v3508_v44, %v4716_v10  ;;  %v3758_v46 = vrot.slane %v3509_v38, %v4716_v10 }
 0xa3f   : > { %v3605_v61 = vsel %vm1652_vm10, %v3604_v51, %v3603_v58  ;;  %v3763_v5 = vsel %vm1646_vm8, %v3750_v29, %v3762_v45 }
 0xa40   : > { %v3606_v34 = vpack.c.b16 %v3605_v61, %v3605_v61  ;;  %v3764_v40 = vsel %vm1649_vm9, %v3754_v32, %v3763_v5 }
 0xa41   : > { %v3765_v41 = vsel %vm1652_vm10, %v3758_v46, %v3764_v40 }
 0xa42   : > { %4473 = vmatmul.mubr.msk.bf16.vlgmr.msra.gmra.mxu0 %vm1008_vm2, %v3606_v34 }
 0xb02   : > { %v3647_v28 = vpop.f32.mrf.mxu0 }
 0xb03   : > { %v3648_v20 = vadd.f32 %v4306_v62, %v3647_v28 }
 0xb04   : > { %v4474_v1 = vpop.f32.mrf.mxu0 }
 0xb05   : > { %v3654_v47 = vmul.f32 0.044715, %v3648_v20  ;;  %v3653_v33 = vmul.f32 0.5, %v3648_v20 }
 0xb06   : > { %v3650_v57 = vpop.f32.mrf.mxu0 }
 0xb07   : > { %v3655_v25 = vmul.f32 %v3654_v47, %v3648_v20 }
 0xb08   : > { %v4475_v52 = vpop.f32.mrf.mxu0 }
 0xb09   : > { %v3656_v60 = vmul.f32 %v3655_v25, %v3648_v20 }
 0xb0b   : > { %v3657_v26 = vadd.f32 %v3656_v60, %v3648_v20 }
 0xb0d   : > { %v3658_v27 = vmul.f32 0.7978846, %v3657_v26 }
 0xb0f   : > { %4553 = vtanh.f32 %v3658_v27 }
 0xb1c   : > { %v4554_v13 = vpop.eup %4553 }
 0xb1d   : > { %v3660_v36 = vadd.f32 1.0, %v4554_v13 }
 0xb1f   : > { %v3661_v14 = vmul.f32 %v3660_v36, %v3653_v33 }
 0xb21   : > { %v3662_v3 = vpack.c.bf16 %v3661_v14, %v3661_v14 }
 0xb23   : > { %4479 = vmatmul.mubr.msk.bf16.vlgmr.msra.gmra.mxu1 %vm1008_vm2, %v3662_v3 }
 0xbe3   : > { %v3713_v16 = vpop.f32.mrf.mxu1 }
 0xbe4   : > { %v3714_v15 = vadd.f32 %v4310_v24, %v3713_v16 }
 0xbe5   : > { %v4480_v6 = vpop.f32.mrf.mxu1  ;;  %3770 = sbr.rel (%p4252_p4) target bundleno = 3268 (0xcc4), region = 108 }
 0xbe6   : > { %v5779_v48 = vadd.f32 %v3765_v41, %v3714_v15 }
 0xbe7   : > { %v3716_v43 = vpop.f32.mrf.mxu1 }
 0xbe9   : > { %v4481_v49 = vpop.f32.mrf.mxu1 }
 0xbea   : > { %v3772_v10 = vld [vmem:[%s5891_s13] sm:$0xf]  ;;  %v4584_v17 = vmov 0.0   ;;  %vm4585_vm1 = vmmov 0   ;;  %v3771_v54 = vpack.c.bf16 %v5779_v48, %v5779_v48  ;;  %v4586_v55 = vmov 1966171168  }
 0xbeb   : > { %4482 = vmatprep.subr.bf16.mxu0 %v4584_v17  ;;  %v3784_v53 = vsel %vm1012_vm0, %v3772_v10, 0  ;;  %4484 = vmatprep.mubr.msk.bf16.mxu0 %vm4585_vm1, %v4584_v17  ;;  %v3834_v63 = vunpack.c.l.s4 %v4586_v55  ;;  %v4313_v0 = vld [vmem:[%s5892_s14] ss:$0 sm:$0xff]  ;;  %v4587_v51 = vmov 857870592   ;;  %vm3957_vm0 = vcmask 58369  }
 0xbec   : > { %4483 = vmatpush3.bf16.msra.mxu0 %v3784_v53  ;;  %v3894_v21 = vunpack.c.l.s4 %v4587_v51  ;;  %v3960_v9 = vld [vmem:[%s5130_s16] sm:$0x2]  ;;  %v3963_v19 = vld [vmem:[%s5130_s16 + $0x2] sm:$0x2]  ;;  %v3966_v8 = vld [vmem:[%s5130_s16 + $0x4] sm:$0x2] }
 0xbed   : > { %v3835_v35 = vunpack.c.0.s8 %v3834_v63  ;;  %v3969_v7 = vld [vmem:[%s5130_s16 + $0x6] sm:$0x2]  ;;  %v3972_v24 = vld [vmem:[%s5130_s16 + $0x8] sm:$0x2]  ;;  %v3975_v43 = vld [vmem:[%s5130_s16 + $0xa] sm:$0x2] }
 0xbee   : > { %v3895_v56 = vunpack.c.0.s8 %v3894_v21  ;;  %v3978_v49 = vld [vmem:[%s5130_s16 + $0xc] sm:$0x2]  ;;  %v3981_v53 = vld [vmem:[%s5130_s16 + $0xe] sm:$0x2] }
 0xbef   : > { %4485 = vmatmul.mubr.msk.bf16.vlgmr.msra.gmra.mxu0 %vm1008_vm2, %v3771_v54  ;;  %v3838_v58 = vsub.s32 %v3835_v35, %v4692_v4  ;;  %vm3958_vm2 = vsmask.f32 7942 }
 0xbf0   : > { %v3898_v52 = vsub.s32 %v3895_v56, %v4692_v4  ;;  %vm5795_vm4 = vmand %vm3957_vm0, %vm3958_vm2 }
 0xcaf   : > { %v3820_v50 = vpop.f32.mrf.mxu0 }
 0xcb0   : > { %v3821_v22 = vadd.f32 %v4313_v0, %v3820_v50 }
 0xcb1   : > { %v4486_v61 = vpop.f32.mrf.mxu0 }
 0xcb2   : > { %v3827_v34 = vcombine.high %v3821_v22, %v3821_v22  ;;  %v3829_v12 = vpack.c.bf16 %v3821_v22, %v3821_v22 }
 0xcb3   : > { %v3823_v62 = vpop.f32.mrf.mxu0 }
 0xcb4   : > { %v3830_v28 = vpack.c.bf16 %v3827_v34, %v3827_v34  ;;  %v3839_v20 = vrot.slane %v3829_v12, %v3838_v58 }
 0xcb5   : > { %v4487_v1 = vpop.f32.mrf.mxu0 }
 0xcb6   : > { %v3840_v47 = vcombine.high %v3839_v20, %v3839_v20  ;;  %v3847_v57 = vrot.slane %v3839_v20, %v3838_v58  ;;  %v3861_v25 = vrot.slane %v3830_v28, %v3838_v58 }
 0xcb8   : > { %v3854_v60 = vrot.slane %v3840_v47, %v3838_v58  ;;  %v3862_v26 = vcombine.high %v3861_v25, %v3861_v25  ;;  %v3878_v27 = vunpack.i.h.s16 %v3847_v57  ;;  %v4315_v13 = vpack.i.b16 %v3847_v57, %v3847_v57 }
 0xcb9   : > { %v3869_v33 = vrot.slane %v3861_v25, %v3838_v58 }
 0xcba   : > { %v3880_v36 = vunpack.i.h.s16 %v3854_v60  ;;  %v3886_v14 = vpack.i.b16 %v3878_v27, %v3878_v27  ;;  %v3876_v11 = vrot.slane %v3862_v26, %v3838_v58  ;;  %v4316_v31 = vpack.i.b16 %v3854_v60, %v3854_v60 }
 0xcbb   : > { %v3899_v59 = vrot.slane %v4315_v13, %v3898_v52  ;;  %v3882_v23 = vunpack.i.h.s16 %v3869_v33  ;;  %v4317_v45 = vpack.i.b16 %v3869_v33, %v3869_v33 }
 0xcbc   : > { %v3888_v30 = vpack.i.b16 %v3880_v36, %v3880_v36  ;;  %v3906_v37 = vrot.slane %v3886_v14, %v3898_v52  ;;  %v3913_v42 = vrot.slane %v4316_v31, %v3898_v52  ;;  %v3884_v2 = vunpack.i.h.s16 %v3876_v11 }
 0xcbd   : > { %v3961_v18 = vsel %vm5795_vm4, %v3899_v59, %v3960_v9  ;;  %v3890_v32 = vpack.i.b16 %v3882_v23, %v3882_v23  ;;  %v4318_v5 = vpack.i.b16 %v3876_v11, %v3876_v11  ;;  %v3927_v40 = vrot.slane %v4317_v45, %v3898_v52 }
 0xcbe   : > { %v3920_v39 = vrot.slane %v3888_v30, %v3898_v52  ;;  %3962 = vst [vmem:[%s5130_s16] sm:$0x2] %v3961_v18  ;;  %v3964_v44 = vsel %vm5795_vm4, %v3906_v37, %v3963_v19  ;;  %v3967_v29 = vsel %vm5795_vm4, %v3913_v42, %v3966_v8  ;;  %v3892_v46 = vpack.i.b16 %v3884_v2, %v3884_v2 }
 0xcbf   : > { %3965 = vst [vmem:[%s5130_s16 + $0x2] sm:$0x2] %v3964_v44  ;;  %3968 = vst [vmem:[%s5130_s16 + $0x4] sm:$0x2] %v3967_v29  ;;  %v3934_v16 = vrot.slane %v3890_v32, %v3898_v52  ;;  %v3941_v41 = vrot.slane %v4318_v5, %v3898_v52  ;;  %v3973_v15 = vsel %vm5795_vm4, %v3927_v40, %v3972_v24 }
 0xcc0   : > { %v3970_v38 = vsel %vm5795_vm4, %v3920_v39, %v3969_v7  ;;  %v3948_v6 = vrot.slane %v3892_v46, %v3898_v52  ;;  %3974 = vst [vmem:[%s5130_s16 + $0x8] sm:$0x2] %v3973_v15 }
 0xcc1   : > { %3971 = vst [vmem:[%s5130_s16 + $0x6] sm:$0x2] %v3970_v38  ;;  %v3976_v10 = vsel %vm5795_vm4, %v3934_v16, %v3975_v43  ;;  %v3979_v17 = vsel %vm5795_vm4, %v3941_v41, %v3978_v49 }
 0xcc2   : > { %3977 = vst [vmem:[%s5130_s16 + $0xa] sm:$0x2] %v3976_v10  ;;  %3980 = vst [vmem:[%s5130_s16 + $0xc] sm:$0x2] %v3979_v17  ;;  %v3982_v54 = vsel %vm5795_vm4, %v3948_v6, %v3981_v53 }
 0xcc3   : > { %3983 = vst [vmem:[%s5130_s16 + $0xe] sm:$0x2] %v3982_v54 }
 0xcc4 PF: > { %3986 = sbr.rel (%p4259_p5) target bundleno = 3295 (0xcdf), region = 112 }
 0xcc9   : > { %v4588_v55 = vmov 1966171168   ;;  %v4589_v35 = vmov 857870592   ;;  %v3988_v50 = vcombine.high %v5779_v48, %v5779_v48  ;;  %v3990_v51 = vpack.c.bf16 %v5779_v48, %v5779_v48  ;;  %v4121_v52 = vld [vmem:[%s5130_s16] sm:$0x2] }
 0xcca   : > { %v3995_v63 = vunpack.c.l.s4 %v4588_v55  ;;  %v4055_v0 = vunpack.c.l.s4 %v4589_v35  ;;  %vm4118_vm5 = vcmask 58369   ;;  %vm4119_vm6 = vsmask.f32 7942  ;;  %v4127_v36 = vld [vmem:[%s5130_s16 + $0x4] sm:$0x2] }
 0xccb   : > { %v3991_v22 = vpack.c.bf16 %v3988_v50, %v3988_v50  ;;  %vm5839_vm7 = vmand %vm4118_vm5, %vm4119_vm6  ;;  %v4130_v59 = vld [vmem:[%s5130_s16 + $0x6] sm:$0x2]  ;;  %v4133_v45 = vld [vmem:[%s5130_s16 + $0x8] sm:$0x2] }
 0xccc   : > { %v3996_v21 = vunpack.c.0.s8 %v3995_v63  ;;  %v4056_v61 = vunpack.c.0.s8 %v4055_v0  ;;  %v4136_v5 = vld [vmem:[%s5130_s16 + $0xa] sm:$0x2]  ;;  %v4139_v46 = vld [vmem:[%s5130_s16 + $0xc] sm:$0x2]  ;;  %v4142_v16 = vld [vmem:[%s5130_s16 + $0xe] sm:$0x2] }
 0xcce   : > { %v3999_v58 = vsub.s32 %v3996_v21, %v4692_v4  ;;  %v4059_v62 = vsub.s32 %v4056_v61, %v4692_v4  ;;  %v4124_v4 = vld [vmem:[%s5130_s16 + $0x2] sm:$0x2] }
 0xcd0   : > { %v4000_v34 = vrot.slane %v3990_v51, %v3999_v58  ;;  %v4022_v12 = vrot.slane %v3991_v22, %v3999_v58 }
 0xcd2   : > { %v4008_v56 = vrot.slane %v4000_v34, %v3999_v58  ;;  %v4001_v28 = vcombine.high %v4000_v34, %v4000_v34  ;;  %v4023_v20 = vcombine.high %v4022_v12, %v4022_v12  ;;  %v4030_v1 = vrot.slane %v4022_v12, %v3999_v58 }
 0xcd4   : > { %v4320_v47 = vpack.i.b16 %v4008_v56, %v4008_v56  ;;  %v4039_v48 = vunpack.i.h.s16 %v4008_v56  ;;  %v4015_v57 = vrot.slane %v4001_v28, %v3999_v58  ;;  %v4037_v60 = vrot.slane %v4023_v20, %v3999_v58 }
 0xcd5   : > { %v4043_v14 = vunpack.i.h.s16 %v4030_v1  ;;  %v4322_v30 = vpack.i.b16 %v4030_v1, %v4030_v1 }
 0xcd6   : > { %v4060_v26 = vrot.slane %v4320_v47, %v4059_v62  ;;  %v4047_v27 = vpack.i.b16 %v4039_v48, %v4039_v48  ;;  %v4321_v13 = vpack.i.b16 %v4015_v57, %v4015_v57  ;;  %v4041_v33 = vunpack.i.h.s16 %v4015_v57 }
 0xcd7   : > { %v4045_v19 = vunpack.i.h.s16 %v4037_v60  ;;  %v4051_v18 = vpack.i.b16 %v4043_v14, %v4043_v14  ;;  %v4323_v7 = vpack.i.b16 %v4037_v60, %v4037_v60  ;;  %v4088_v39 = vrot.slane %v4322_v30, %v4059_v62 }
 0xcd8   : > { %v4122_v3 = vsel %vm5839_vm7, %v4060_v26, %v4121_v52  ;;  %v4067_v9 = vrot.slane %v4047_v27, %v4059_v62  ;;  %v4074_v11 = vrot.slane %v4321_v13, %v4059_v62  ;;  %v4049_v31 = vpack.i.b16 %v4041_v33, %v4041_v33 }
 0xcd9   : > { %4123 = vst [vmem:[%s5130_s16] sm:$0x2] %v4122_v3  ;;  %v4053_v2 = vpack.i.b16 %v4045_v19, %v4045_v19  ;;  %v4095_v44 = vrot.slane %v4051_v18, %v4059_v62  ;;  %v4102_v29 = vrot.slane %v4323_v7, %v4059_v62  ;;  %v4134_v38 = vsel %vm5839_vm7, %v4088_v39, %v4133_v45 }
 0xcda   : > { %v4125_v8 = vsel %vm5839_vm7, %v4067_v9, %v4124_v4  ;;  %v4128_v37 = vsel %vm5839_vm7, %v4074_v11, %v4127_v36  ;;  %v4081_v42 = vrot.slane %v4049_v31, %v4059_v62  ;;  %4135 = vst [vmem:[%s5130_s16 + $0x8] sm:$0x2] %v4134_v38 }
 0xcdb   : > { %4126 = vst [vmem:[%s5130_s16 + $0x2] sm:$0x2] %v4125_v8  ;;  %4129 = vst [vmem:[%s5130_s16 + $0x4] sm:$0x2] %v4128_v37  ;;  %v4109_v32 = vrot.slane %v4053_v2, %v4059_v62  ;;  %v4137_v40 = vsel %vm5839_vm7, %v4095_v44, %v4136_v5  ;;  %v4140_v24 = vsel %vm5839_vm7, %v4102_v29, %v4139_v46 }
 0xcdc   : > { %v4131_v23 = vsel %vm5839_vm7, %v4081_v42, %v4130_v59  ;;  %4138 = vst [vmem:[%s5130_s16 + $0xa] sm:$0x2] %v4137_v40  ;;  %4141 = vst [vmem:[%s5130_s16 + $0xc] sm:$0x2] %v4140_v24 }
 0xcdd   : > { %4132 = vst [vmem:[%s5130_s16 + $0x6] sm:$0x2] %v4131_v23  ;;  %v4143_v41 = vsel %vm5839_vm7, %v4109_v32, %v4142_v16 }
 0xcde   : > { %4144 = vst [vmem:[%s5130_s16 + $0xe] sm:$0x2] %v4143_v41 }
 0xcdf PF: > { %s25_s18 = sadd.s32 1, %s4561_s18  }
 0xce0   : > { %p22_p6 = scmp.ge.s32.totalorder %s25_s18, 4  }
 0xce2   :  { %24 = sbr.rel (!%p22_p6) target bundleno = 1 (0x1), region = 169 }

</bundles_post_ra>
